<compile_context>
chip_gen: v5e
topology: v5e:2x2
jax: 0.10.0
libtpu: 0.0.40
codegen_flags: <defaults>
</compile_context>

<pallas_src>
import jax
import jax.numpy as jnp
from jax.experimental import pallas as pl
from jax.experimental.pallas import tpu as pltpu


TEMPORAL_DIM = 24 * 7  # 168


def reward_kernel(
    cat_ref,      # (BT, 1)   int32 : category ids
    coords_ref,   # (BT, 2)   f32   : coordinates
    temp_ref,     # (BT, 168) bf16  : flattened temporal pattern
    wt1_ref,      # (168, H)  bf16  : temporal encoder first Linear
    catvec_ref,   # (1, C)    f32   : folded per-category score  emb@wf_c@w_head
    small_ref,    # (8, H)    f32   : ws1 rows, bs1, bt1, folded v_sp/v_tm, const
    out_ref,      # (BT, 1)   f32   : final scores
):
    BT = coords_ref.shape[0]
    C = catvec_ref.shape[1]

    small = small_ref[...]            # (8, H)
    ws1_r0 = small[0:1, :]            # coords weight, row 0
    ws1_r1 = small[1:2, :]            # coords weight, row 1
    bs1 = small[2:3, :]
    bt1 = small[3:4, :]
    v_sp = small[4:5, :]              # folded  ws2 @ wf_s @ (wts+wss+wps)
    v_tm = small[5:6, :]              # folded  wt2 @ wf_t @ (wts+wss+wps)
    const = small[6:7, 0:1]           # folded bias term (scalar, broadcast)

    # --- category branch: per-id scalar via one-hot select ------------------
    # TODO(synk): for very large n_categories use PrefetchScalarGridSpec +
    # scalar gather instead of an O(BT*C) compare.
    cat = cat_ref[...]                                            # (BT, 1) i32
    lanes = jax.lax.broadcasted_iota(jnp.int32, (BT, C), 1)
    onehot = lanes == cat                                         # (BT, C)
    cat_score = jnp.sum(jnp.where(onehot, catvec_ref[...], 0.0),
                        axis=-1, keepdims=True)                   # (BT, 1)

    # --- spatial branch: K=2 Linear on the VPU, folded head on VPU+XLU ------
    coords = coords_ref[...]                                      # (BT, 2)
    sh = coords[:, 0:1] * ws1_r0 + coords[:, 1:2] * ws1_r1 + bs1  # (BT, H)
    sh = jnp.maximum(sh, 0.0)
    sp_score = jnp.sum(sh * v_sp, axis=-1, keepdims=True)         # (BT, 1)

    # --- temporal branch: dominant bf16 MXU matmul, f32 accumulate ----------
    th = jnp.dot(temp_ref[...], wt1_ref[...],
                 preferred_element_type=jnp.float32) + bt1        # (BT, H)
    th = jnp.maximum(th, 0.0)
    tm_score = jnp.sum(th * v_tm, axis=-1, keepdims=True)         # (BT, 1)

    # softmax gate sums to 1 exactly -> out = ts + ss + ps (folded above).
    out_ref[...] = cat_score + sp_score + tm_score + const


def pack_params(params):
    """Fold the 22 raw parameter arrays into 3 kernel inputs (host-side, once)."""
    hp = jax.lax.Precision.HIGHEST
    mm = lambda a, b: jnp.dot(a, b, precision=hp)

    H = params["ws2"].shape[0]
    wf = params["wf"]
    wf_c, wf_s, wf_t = wf[0:H], wf[H:2 * H], wf[2 * H:3 * H]

    # Gate is identically 1, so the heads collapse to a single (H,1) column.
    w_head = params["wts"] + params["wss"] + params["wps"]            # (H, 1)
    b_head = (params["bts"] + params["bss"] + params["bps"])[0, 0]

    v_sp = mm(mm(params["ws2"], wf_s), w_head)[:, 0]                  # (H,)
    v_tm = mm(mm(params["wt2"], wf_t), w_head)[:, 0]                  # (H,)
    cat_vec = mm(mm(params["emb"], wf_c), w_head)[:, 0]               # (C,)
    const = mm(mm(params["bs2"], wf_s)
               + mm(params["bt2"], wf_t)
               + params["bf"], w_head)[0, 0] + b_head

    small = jnp.zeros((8, H), jnp.float32)
    small = small.at[0].set(params["ws1"][0])
    small = small.at[1].set(params["ws1"][1])
    small = small.at[2].set(params["bs1"][0])
    small = small.at[3].set(params["bt1"][0])
    small = small.at[4].set(v_sp)
    small = small.at[5].set(v_tm)
    small = small.at[6, 0].set(const)

    return {
        "wt1": params["wt1"].astype(jnp.bfloat16),        # bf16 MXU weight
        "cat_vec": cat_vec.reshape(1, -1).astype(jnp.float32),
        "small": small,
    }


def reward_model_forward(packed, cat_ids, coords, temporal, *, block_b=512):
    """Batched RewardModel forward; returns (B,) final scores.

    block_b: batch tile (multiple of 256).  Keep B/block_b >= 2 so both of
    v7x's TensorCores get grid steps.
    """
    B = coords.shape[0]
    H = packed["small"].shape[1]
    C = packed["cat_vec"].shape[1]
    T = temporal.shape[1]

    # Ragged batch: pad to the tile, slice the output afterwards.
    Bp = ((B + block_b - 1) // block_b) * block_b
    if Bp != B:
        pad = Bp - B
        cat_ids = jnp.pad(cat_ids, ((0, pad), (0, 0)))
        coords = jnp.pad(coords, ((0, pad), (0, 0)))
        temporal = jnp.pad(temporal, ((0, pad), (0, 0)))

    # Dominant HBM stream in bf16 (no-op if the caller already stores bf16).
    temporal = temporal.astype(jnp.bfloat16)

    batch_map = lambda i: (i, 0)
    const_map = lambda i: (0, 0)

    # Constant-weight specs are tiny here; single-buffer them (Buffered(1)) or
    # DMA-once if H / n_categories grow and v7x's 64 MiB VMEM gets tight.
    in_specs = [
        pl.BlockSpec((block_b, 1), batch_map),    # category ids
        pl.BlockSpec((block_b, 2), batch_map),    # coordinates
        pl.BlockSpec((block_b, T), batch_map),    # temporal pattern (bf16)
        pl.BlockSpec((T, H), const_map),          # wt1 (bf16)
        pl.BlockSpec((1, C), const_map),          # folded category scores
        pl.BlockSpec((8, H), const_map),          # small pack (biases etc.)
    ]
    out_spec = pl.BlockSpec((block_b, 1), batch_map)

    out = pl.pallas_call(
        reward_kernel,
        out_shape=jax.ShapeDtypeStruct((Bp, 1), jnp.float32),
        grid=(Bp // block_b,),
        in_specs=in_specs,
        out_specs=out_spec,
        compiler_params=pltpu.CompilerParams(
            dimension_semantics=("parallel",)),
    )(cat_ids, coords, temporal, packed["wt1"], packed["cat_vec"],
      packed["small"])
    return out[:B, 0]


def init_params(key, n_categories, hidden_dim):
    H = hidden_dim
    ks = jax.random.split(key, 16)

    def w(k, shape, scale=0.1):
        return (scale * jax.random.normal(k, shape)).astype(jnp.float32)

    return {
        "emb": w(ks[0], (n_categories, H)),
        # spatial encoder
        "ws1": w(ks[1], (2, H)),   "bs1": w(ks[2], (1, H)),
        "ws2": w(ks[3], (H, H)),   "bs2": w(ks[4], (1, H)),
        # temporal encoder
        "wt1": w(ks[5], (TEMPORAL_DIM, H)), "bt1": w(ks[6], (1, H)),
        "wt2": w(ks[7], (H, H)),            "bt2": w(ks[8], (1, H)),
        # fusion
        "wf": w(ks[9], (3 * H, H)), "bf": w(ks[10], (1, H)),
        # scorers + gating
        "wts": w(ks[11], (H, 1)), "bts": jnp.zeros((1, 1), jnp.float32),
        "wss": w(ks[12], (H, 1)), "bss": jnp.zeros((1, 1), jnp.float32),
        "wps": w(ks[13], (H, 1)), "bps": jnp.zeros((1, 1), jnp.float32),
        "ww":  w(ks[14], (H, 3)), "bw":  jnp.zeros((1, 3), jnp.float32),
    }


def reward_model_reference(params, cat_ids, coords, temporal):
    """Pure-JAX batched reference mirroring the PyTorch forward (unfused)."""
    hp = jax.lax.Precision.HIGHEST
    dot = lambda a, b: jnp.dot(a, b, precision=hp)
    cat_emb = params["emb"][cat_ids[:, 0]]
    sh = jnp.maximum(dot(coords, params["ws1"]) + params["bs1"], 0.0)
    spatial = dot(sh, params["ws2"]) + params["bs2"]
    th = jnp.maximum(dot(temporal, params["wt1"]) + params["bt1"], 0.0)
    temp = dot(th, params["wt2"]) + params["bt2"]
    combined = jnp.concatenate([cat_emb, spatial, temp], axis=-1)
    poi = dot(combined, params["wf"]) + params["bf"]
    ts = dot(poi, params["wts"]) + params["bts"]
    ss = dot(poi, params["wss"]) + params["bss"]
    ps = dot(poi, params["wps"]) + params["bps"]
    w = jax.nn.softmax(dot(poi, params["ww"]) + params["bw"], axis=-1)
    # torch: (weights (3,) * scores (3,1)).sum() == sum(w) * (ts+ss+ps)
    return (jnp.sum(w, axis=-1, keepdims=True) * (ts + ss + ps))[:, 0]


if __name__ == "__main__":
    N_CATEGORIES = 10
    HIDDEN_DIM = 32
    BATCH = 1000     # ragged: pads to 2 tiles of 512 rows (>= 2 grid steps)

    key = jax.random.PRNGKey(0)
    kp, kc, kt, ki = jax.random.split(key, 4)

    params = init_params(kp, N_CATEGORIES, HIDDEN_DIM)
    packed = pack_params(params)

    cat_ids = jax.random.randint(ki, (BATCH, 1), 0, N_CATEGORIES,
                                 dtype=jnp.int32)
    coords = jax.random.normal(kc, (BATCH, 2), dtype=jnp.float32)
    temporal = jax.random.uniform(
        kt, (BATCH, TEMPORAL_DIM), dtype=jnp.float32).astype(jnp.bfloat16)

    out = reward_model_forward(packed, cat_ids, coords, temporal)
    out = jax.block_until_ready(out)

    # Reference on the same bf16-rounded temporal stream / wt1 weights the
    # kernel consumes, so the only remaining delta is fold reassociation.
    ref_params = dict(params)
    ref_params["wt1"] = params["wt1"].astype(jnp.bfloat16).astype(jnp.float32)
    ref = reward_model_reference(ref_params, cat_ids, coords,
                                 temporal.astype(jnp.float32))

    assert out.shape == (BATCH,)
    assert jnp.allclose(out, ref, rtol=1e-2, atol=1e-2), (out[:4], ref[:4])

    print("KERNEL_OK")
</pallas_src>

<mosaic_0001>
module attributes {stable_mosaic.version = 11 : i64} {
  func.func @reward_kernel(%arg0: i32, %arg1: memref<512x1xi32, #tpu.memory_space<vmem>>, %arg2: memref<512x2xf32, #tpu.memory_space<vmem>>, %arg3: memref<512x168xbf16, #tpu.memory_space<vmem>>, %arg4: memref<168x32xbf16, #tpu.memory_space<vmem>>, %arg5: memref<1x10xf32, #tpu.memory_space<vmem>>, %arg6: memref<8x32xf32, #tpu.memory_space<vmem>>, %arg7: memref<512x1xf32, #tpu.memory_space<vmem>>) attributes {dimension_semantics = [#tpu.dimension_semantics<parallel>], iteration_bounds = array<i64: 2>, scalar_prefetch = 0 : i64, scratch_operands = 0 : i64, tpu.core_type = #tpu.core_type<tc>, window_params = [{transform_indices = @transform_0, window_bounds = array<i64: 512, 1>}, {transform_indices = @transform_1, window_bounds = array<i64: 512, 2>}, {transform_indices = @transform_2, window_bounds = array<i64: 512, 168>}, {pipeline_mode = #tpu.pipeline_mode<synchronous>, transform_indices = @transform_3, window_bounds = array<i64: 168, 32>}, {pipeline_mode = #tpu.pipeline_mode<synchronous>, transform_indices = @transform_4, window_bounds = array<i64: 1, 10>}, {pipeline_mode = #tpu.pipeline_mode<synchronous>, transform_indices = @transform_5, window_bounds = array<i64: 8, 32>}, {transform_indices = @transform_6, window_bounds = array<i64: 512, 1>}]} {
    %c0 = arith.constant 0 : index
    %c0_0 = arith.constant 0 : index
    %0 = vector.load %arg6[%c0, %c0_0] : memref<8x32xf32, #tpu.memory_space<vmem>>, vector<8x32xf32>
    %1 = vector.extract_strided_slice %0 {offsets = [0, 0], sizes = [1, 32], strides = [1, 1]} : vector<8x32xf32> to vector<1x32xf32>
    %2 = vector.extract_strided_slice %0 {offsets = [1, 0], sizes = [1, 32], strides = [1, 1]} : vector<8x32xf32> to vector<1x32xf32>
    %3 = vector.extract_strided_slice %0 {offsets = [2, 0], sizes = [1, 32], strides = [1, 1]} : vector<8x32xf32> to vector<1x32xf32>
    %4 = vector.extract_strided_slice %0 {offsets = [3, 0], sizes = [1, 32], strides = [1, 1]} : vector<8x32xf32> to vector<1x32xf32>
    %5 = vector.extract_strided_slice %0 {offsets = [4, 0], sizes = [1, 32], strides = [1, 1]} : vector<8x32xf32> to vector<1x32xf32>
    %6 = vector.extract_strided_slice %0 {offsets = [5, 0], sizes = [1, 32], strides = [1, 1]} : vector<8x32xf32> to vector<1x32xf32>
    %7 = vector.extract_strided_slice %0 {offsets = [6, 0], sizes = [1, 1], strides = [1, 1]} : vector<8x32xf32> to vector<1x1xf32>
    %c0_1 = arith.constant 0 : index
    %c0_2 = arith.constant 0 : index
    %8 = vector.load %arg1[%c0_1, %c0_2] : memref<512x1xi32, #tpu.memory_space<vmem>>, vector<512x1xi32>
    %9 = tpu.iota {dimensions = array<i32: 1>} : vector<512x10xi32>
    %10 = vector.broadcast %8 : vector<512x1xi32> to vector<512x10xi32>
    %11 = arith.cmpi eq, %9, %10 : vector<512x10xi32>
    %c0_3 = arith.constant 0 : index
    %c0_4 = arith.constant 0 : index
    %12 = vector.load %arg5[%c0_3, %c0_4] : memref<1x10xf32, #tpu.memory_space<vmem>>, vector<1x10xf32>
    %cst = arith.constant 0.000000e+00 : f32
    %13 = vector.shape_cast %12 : vector<1x10xf32> to vector<1x10xf32>
    %14 = vector.broadcast %13 : vector<1x10xf32> to vector<512x10xf32>
    %15 = vector.broadcast %cst : f32 to vector<512x10xf32>
    %16 = arith.select %11, %14, %15 : vector<512x10xi1>, vector<512x10xf32>
    %cst_5 = arith.constant dense<0.000000e+00> : vector<512xf32>
    %17 = vector.multi_reduction <add>, %16, %cst_5 [1] : vector<512x10xf32> to vector<512xf32>
    %18 = vector.shape_cast %17 : vector<512xf32> to vector<512x1xf32>
    %c0_6 = arith.constant 0 : index
    %c0_7 = arith.constant 0 : index
    %19 = vector.load %arg2[%c0_6, %c0_7] : memref<512x2xf32, #tpu.memory_space<vmem>>, vector<512x2xf32>
    %20 = vector.extract_strided_slice %19 {offsets = [0, 0], sizes = [512, 1], strides = [1, 1]} : vector<512x2xf32> to vector<512x1xf32>
    %21 = vector.broadcast %20 : vector<512x1xf32> to vector<512x32xf32>
    %22 = vector.broadcast %1 : vector<1x32xf32> to vector<512x32xf32>
    %23 = arith.mulf %21, %22 : vector<512x32xf32>
    %24 = vector.extract_strided_slice %19 {offsets = [0, 1], sizes = [512, 1], strides = [1, 1]} : vector<512x2xf32> to vector<512x1xf32>
    %25 = vector.broadcast %24 : vector<512x1xf32> to vector<512x32xf32>
    %26 = vector.broadcast %2 : vector<1x32xf32> to vector<512x32xf32>
    %27 = arith.mulf %25, %26 : vector<512x32xf32>
    %28 = arith.addf %23, %27 : vector<512x32xf32>
    %29 = vector.broadcast %3 : vector<1x32xf32> to vector<512x32xf32>
    %30 = arith.addf %28, %29 : vector<512x32xf32>
    %cst_8 = arith.constant 0.000000e+00 : f32
    %31 = vector.broadcast %cst_8 : f32 to vector<512x32xf32>
    %32 = arith.maximumf %30, %31 : vector<512x32xf32>
    %33 = vector.broadcast %5 : vector<1x32xf32> to vector<512x32xf32>
    %34 = arith.mulf %32, %33 : vector<512x32xf32>
    %cst_9 = arith.constant dense<0.000000e+00> : vector<512xf32>
    %35 = vector.multi_reduction <add>, %34, %cst_9 [1] : vector<512x32xf32> to vector<512xf32>
    %36 = vector.shape_cast %35 : vector<512xf32> to vector<512x1xf32>
    %c0_10 = arith.constant 0 : index
    %c0_11 = arith.constant 0 : index
    %37 = vector.load %arg3[%c0_10, %c0_11] : memref<512x168xbf16, #tpu.memory_space<vmem>>, vector<512x168xbf16>
    %c0_12 = arith.constant 0 : index
    %c0_13 = arith.constant 0 : index
    %38 = vector.load %arg4[%c0_12, %c0_13] : memref<168x32xbf16, #tpu.memory_space<vmem>>, vector<168x32xbf16>
    %cst_14 = arith.constant dense<0.000000e+00> : vector<512x32xf32>
    %39 = tpu.matmul %37, %38, %cst_14 {dimension_numbers = #tpu.dot_dimension_numbers<[1], [0], [0], [1], [0, 0, 1, 1], [], []>} : vector<512x168xbf16>, vector<168x32xbf16>, vector<512x32xf32> -> vector<512x32xf32>
    %40 = vector.broadcast %4 : vector<1x32xf32> to vector<512x32xf32>
    %41 = arith.addf %39, %40 : vector<512x32xf32>
    %cst_15 = arith.constant 0.000000e+00 : f32
    %42 = vector.broadcast %cst_15 : f32 to vector<512x32xf32>
    %43 = arith.maximumf %41, %42 : vector<512x32xf32>
    %44 = vector.broadcast %6 : vector<1x32xf32> to vector<512x32xf32>
    %45 = arith.mulf %43, %44 : vector<512x32xf32>
    %cst_16 = arith.constant dense<0.000000e+00> : vector<512xf32>
    %46 = vector.multi_reduction <add>, %45, %cst_16 [1] : vector<512x32xf32> to vector<512xf32>
    %47 = vector.shape_cast %46 : vector<512xf32> to vector<512x1xf32>
    %48 = arith.addf %18, %36 : vector<512x1xf32>
    %49 = arith.addf %48, %47 : vector<512x1xf32>
    %50 = vector.broadcast %7 : vector<1x1xf32> to vector<512x1xf32>
    %51 = arith.addf %49, %50 : vector<512x1xf32>
    %c0_17 = arith.constant 0 : index
    %c0_18 = arith.constant 0 : index
    %52 = vector.load %arg7[%c0_17, %c0_18] : memref<512x1xf32, #tpu.memory_space<vmem>>, vector<512x1xf32>
    tpu.vector_store %arg7[%c0_17, %c0_18], %51 {strides = array<i32>} : memref<512x1xf32, #tpu.memory_space<vmem>>, vector<512x1xf32>,
    return
  }
  func.func @transform_0(%arg0: i32) -> (i32, i32) {
    %c0_i32 = arith.constant 0 : i32
    %c0_i32_0 = arith.constant 0 : i32
    return %arg0, %c0_i32 : i32, i32
  }
  func.func @transform_1(%arg0: i32) -> (i32, i32) {
    %c0_i32 = arith.constant 0 : i32
    %c0_i32_0 = arith.constant 0 : i32
    return %arg0, %c0_i32 : i32, i32
  }
  func.func @transform_2(%arg0: i32) -> (i32, i32) {
    %c0_i32 = arith.constant 0 : i32
    %c0_i32_0 = arith.constant 0 : i32
    return %arg0, %c0_i32 : i32, i32
  }
  func.func @transform_3(%arg0: i32) -> (i32, i32) {
    %c0_i32 = arith.constant 0 : i32
    %c0_i32_0 = arith.constant 0 : i32
    %c0_i32_1 = arith.constant 0 : i32
    return %c0_i32, %c0_i32_0 : i32, i32
  }
  func.func @transform_4(%arg0: i32) -> (i32, i32) {
    %c0_i32 = arith.constant 0 : i32
    %c0_i32_0 = arith.constant 0 : i32
    %c0_i32_1 = arith.constant 0 : i32
    return %c0_i32, %c0_i32_0 : i32, i32
  }
  func.func @transform_5(%arg0: i32) -> (i32, i32) {
    %c0_i32 = arith.constant 0 : i32
    %c0_i32_0 = arith.constant 0 : i32
    %c0_i32_1 = arith.constant 0 : i32
    return %c0_i32, %c0_i32_0 : i32, i32
  }
  func.func @transform_6(%arg0: i32) -> (i32, i32) {
    %c0_i32 = arith.constant 0 : i32
    %c0_i32_0 = arith.constant 0 : i32
    return %arg0, %c0_i32 : i32, i32
  }
}

</mosaic_0001>

<bundles_post_ra>
// kernel: tpu_custom_call.1
= control target key start
LH: loop header
LB: loop body
LE: loop exit
PB: predicated region body
PF: predicated region fallthrough
CT: control target
= control target key end

     0   :  { %s4136_s21 = smov 0   ;;  %s6947_s0 = inlined_call_operand.vmem [shape: s32[1024,1], index: 0, kind: input, shape index: {}]   ;;  %s6948_s1 = inlined_call_operand.vmem [shape: f32[1024,2], index: 1, kind: input, shape index: {}]   ;;  %s6949_s2 = inlined_call_operand.vmem [shape: bf16[1024,168], index: 2, kind: input, shape index: {}]   ;;  %s6950_s3 = inlined_call_operand.vmem [shape: bf16[168,32], index: 3, kind: input, shape index: {}]   ;;  %s6951_s4 = inlined_call_operand.vmem [shape: f32[1,10], index: 4, kind: input, shape index: {}]   ;;  %s6952_s5 = inlined_call_operand.vmem [shape: f32[8,32], index: 5, kind: input, shape index: {}]   ;;  %s6953_s6 = inlined_call_operand.vmem [shape: f32[1024,1], index: 6, kind: output, shape index: {}]  }
   0x1 LB: > { %s3643_s22 = sadd.s32 4294967295, %s4097_s21   ;;  %p3647_p0 = scmp.ge.s32.totalorder %s4097_s21, 1  ;;  %s4097_s21 = sphi %s4136_s21, %s16_s21  }
   0x2   : > { %p236_p1 = scmp.lt.s32.totalorder %s4097_s21, 3 }
   0x4   : > { %p237_p2 = pnand %p3647_p0, %p236_p1 }
   0x6   : > { %240 = sbr.rel (%p237_p2) target bundleno = 1241 (0x4d9), region = 44 }
   0xb   : > { %s3648_s23 = sshll.u32 %s3643_s22, 6  ;;  %v4099_v0 = vmov 0   ;;  %vm694_vm2 = vcmask 80896  }
   0xc   : > { %4085 = vset.pattern.permute.xlu2 %v4099_v0  ;;  %4084 = vset.pattern.permute.xlu1 %v4099_v0  ;;  %p278_p3 = scmp.lt.s32.totalorder %s3648_s23, 127 }
   0xd   : > { %4083 = vset.pattern.permute.xlu0 %v4099_v0 }
   0xe   : > { %s7357_s23 = smov (!%p278_p3, %s3648_s23), 127 }
   0xf   : > { %s4144_s24 = sshll.u32 %s7357_s23, 3 }
  0x10   : > { %s4150_s27 = scalar_lea.vmem %s6947_s0, %s4144_s24  ;;  %s4658_s8 = scalar_lea.vmem %s6948_s1, %s4144_s24 }
  0x11   : > { %v308_v1 = vld [vmem:[%s4150_s27 + $0x20] sm:$0xff]  ;;  %v306_v2 = vld [vmem:[%s4150_s27 + $0x10] sm:$0xff]  ;;  %v309_v4 = vld [vmem:[%s4150_s27 + $0x28] sm:$0xff]  ;;  %s4748_s15 = scalar_lea.vmem %s6949_s2, %s4144_s24  ;;  %s6532_s18 = scalar_lea.vmem %s6953_s6, %s4144_s24 }
  0x12   : > { %v304_v3 = vld [vmem:[%s4150_s27] sm:$0xff]  ;;  %383 = vperm.xlu2 %4085, %v308_v1   ;;  %377 = vperm.xlu1 %4084, %v306_v2   ;;  %v307_v5 = vld [vmem:[%s4150_s27 + $0x18] sm:$0xff]  ;;  %v305_v6 = vld [vmem:[%s4150_s27 + $0x8] sm:$0xff] }
  0x13   : > { %371 = vperm.xlu0 %4083, %v304_v3   ;;  %v312_v7 = vld [vmem:[%s4150_s27 + $0x40] sm:$0xff]  ;;  %v311_v8 = vld [vmem:[%s4150_s27 + $0x38] sm:$0xff]  ;;  %v310_v9 = vld [vmem:[%s4150_s27 + $0x30] sm:$0xff] }
  0x14   : > { %v315_v10 = vld [vmem:[%s4150_s27 + $0x58] sm:$0xff]  ;;  %v314_v11 = vld [vmem:[%s4150_s27 + $0x50] sm:$0xff]  ;;  %v313_v12 = vld [vmem:[%s4150_s27 + $0x48] sm:$0xff] }
  0x15   : > { %v318_v13 = vld [vmem:[%s4150_s27 + $0x70] sm:$0xff]  ;;  %v317_v14 = vld [vmem:[%s4150_s27 + $0x68] sm:$0xff]  ;;  %v316_v15 = vld [vmem:[%s4150_s27 + $0x60] sm:$0xff] }
  0x16   : > { %v321_v16 = vld [vmem:[%s4150_s27 + $0x88] sm:$0xff]  ;;  %v320_v17 = vld [vmem:[%s4150_s27 + $0x80] sm:$0xff]  ;;  %v319_v18 = vld [vmem:[%s4150_s27 + $0x78] sm:$0xff] }
  0x17   : > { %v324_v19 = vld [vmem:[%s4150_s27 + $0xa0] sm:$0xff]  ;;  %v323_v20 = vld [vmem:[%s4150_s27 + $0x98] sm:$0xff]  ;;  %v322_v21 = vld [vmem:[%s4150_s27 + $0x90] sm:$0xff] }
  0x18   : > { %v327_v22 = vld [vmem:[%s4150_s27 + $0xb8] sm:$0xff]  ;;  %v326_v23 = vld [vmem:[%s4150_s27 + $0xb0] sm:$0xff]  ;;  %v325_v24 = vld [vmem:[%s4150_s27 + $0xa8] sm:$0xff] }
  0x19   : > { %v330_v25 = vld [vmem:[%s4150_s27 + $0xd0] sm:$0xff]  ;;  %v329_v26 = vld [vmem:[%s4150_s27 + $0xc8] sm:$0xff]  ;;  %v328_v27 = vld [vmem:[%s4150_s27 + $0xc0] sm:$0xff] }
  0x1a   : > { %386 = vperm.xlu2 %4085, %v309_v4   ;;  %380 = vperm.xlu1 %4084, %v307_v5   ;;  %v333_v28 = vld [vmem:[%s4150_s27 + $0xe8] sm:$0xff]  ;;  %v332_v29 = vld [vmem:[%s4150_s27 + $0xe0] sm:$0xff]  ;;  %v331_v30 = vld [vmem:[%s4150_s27 + $0xd8] sm:$0xff] }
  0x1b   : > { %374 = vperm.xlu0 %4083, %v305_v6   ;;  %v336_v31 = vld [vmem:[%s4150_s27 + $0x100] sm:$0xff]  ;;  %v335_v32 = vld [vmem:[%s4150_s27 + $0xf8] sm:$0xff]  ;;  %v334_v33 = vld [vmem:[%s4150_s27 + $0xf0] sm:$0xff] }
  0x1c   : > { %v339_v34 = vld [vmem:[%s4150_s27 + $0x118] sm:$0xff]  ;;  %v338_v35 = vld [vmem:[%s4150_s27 + $0x110] sm:$0xff]  ;;  %v337_v36 = vld [vmem:[%s4150_s27 + $0x108] sm:$0xff] }
  0x1d   : > { %v342_v37 = vld [vmem:[%s4150_s27 + $0x130] sm:$0xff]  ;;  %v341_v38 = vld [vmem:[%s4150_s27 + $0x128] sm:$0xff]  ;;  %v340_v39 = vld [vmem:[%s4150_s27 + $0x120] sm:$0xff] }
  0x1e   : > { %v345_v40 = vld [vmem:[%s4150_s27 + $0x148] sm:$0xff]  ;;  %v344_v41 = vld [vmem:[%s4150_s27 + $0x140] sm:$0xff]  ;;  %v343_v42 = vld [vmem:[%s4150_s27 + $0x138] sm:$0xff] }
  0x1f   : > { %v348_v44 = vld [vmem:[%s4150_s27 + $0x160] sm:$0xff]  ;;  %v347_v45 = vld [vmem:[%s4150_s27 + $0x158] sm:$0xff]  ;;  %v346_v46 = vld [vmem:[%s4150_s27 + $0x150] sm:$0xff] }
  0x20   : > { %v351_v49 = vld [vmem:[%s4150_s27 + $0x178] sm:$0xff]  ;;  %v350_v50 = vld [vmem:[%s4150_s27 + $0x170] sm:$0xff]  ;;  %v349_v52 = vld [vmem:[%s4150_s27 + $0x168] sm:$0xff] }
  0x21   : > { %v354_v55 = vld [vmem:[%s4150_s27 + $0x190] sm:$0xff]  ;;  %v353_v56 = vld [vmem:[%s4150_s27 + $0x188] sm:$0xff]  ;;  %v352_v57 = vld [vmem:[%s4150_s27 + $0x180] sm:$0xff] }
  0x22   : > { %395 = vperm.xlu2 %4085, %v312_v7   ;;  %392 = vperm.xlu1 %4084, %v311_v8   ;;  %v357_v61 = vld [vmem:[%s4150_s27 + $0x1a8] sm:$0xff]  ;;  %v356_v62 = vld [vmem:[%s4150_s27 + $0x1a0] sm:$0xff]  ;;  %v355_v63 = vld [vmem:[%s4150_s27 + $0x198] sm:$0xff] }
  0x23   : > { %389 = vperm.xlu0 %4083, %v310_v9   ;;  %v360_v3 = vld [vmem:[%s4150_s27 + $0x1c0] sm:$0xff]  ;;  %v359_v4 = vld [vmem:[%s4150_s27 + $0x1b8] sm:$0xff]  ;;  %v358_v5 = vld [vmem:[%s4150_s27 + $0x1b0] sm:$0xff] }
  0x24   : > { %v363_v9 = vld [vmem:[%s4150_s27 + $0x1d8] sm:$0xff] }
  0x2a   : > { %404 = vperm.xlu2 %4085, %v315_v10   ;;  %401 = vperm.xlu1 %4084, %v314_v11   ;;  %v362_v10 = vld [vmem:[%s4150_s27 + $0x1d0] sm:$0xff]  ;;  %v361_v11 = vld [vmem:[%s4150_s27 + $0x1c8] sm:$0xff] }
  0x2b   : > { %398 = vperm.xlu0 %4083, %v313_v12   ;;  %v366_v12 = vld [vmem:[%s4150_s27 + $0x1f0] sm:$0xff] }
  0x32   : > { %413 = vperm.xlu2 %4085, %v318_v13   ;;  %410 = vperm.xlu1 %4084, %v317_v14   ;;  %v365_v13 = vld [vmem:[%s4150_s27 + $0x1e8] sm:$0xff] }
  0x33   : > { %407 = vperm.xlu0 %4083, %v316_v15  }
  0x3a   : > { %422 = vperm.xlu2 %4085, %v321_v16   ;;  %419 = vperm.xlu1 %4084, %v320_v17   ;;  %v364_v16 = vld [vmem:[%s4150_s27 + $0x1e0] sm:$0xff] }
  0x3b   : > { %416 = vperm.xlu0 %4083, %v319_v18   ;;  %v367_v18 = vld [vmem:[%s4150_s27 + $0x1f8] sm:$0xff] }
  0x42   : > { %431 = vperm.xlu2 %4085, %v324_v19   ;;  %428 = vperm.xlu1 %4084, %v323_v20  }
  0x43   : > { %425 = vperm.xlu0 %4083, %v322_v21  }
  0x4a   : > { %440 = vperm.xlu2 %4085, %v327_v22   ;;  %437 = vperm.xlu1 %4084, %v326_v23  }
  0x4b   : > { %434 = vperm.xlu0 %4083, %v325_v24  }
  0x52   : > { %449 = vperm.xlu2 %4085, %v330_v25   ;;  %446 = vperm.xlu1 %4084, %v329_v26   ;;  %v368_v25 = vlaneseq }
  0x53   : > { %443 = vperm.xlu0 %4083, %v328_v27  }
  0x5a   : > { %458 = vperm.xlu2 %4085, %v333_v28   ;;  %455 = vperm.xlu1 %4084, %v332_v29   ;;  %v4268_v29 = vand.u32 127, %v368_v25 }
  0x5b   : > { %452 = vperm.xlu0 %4083, %v331_v30   ;;  %v4276_v30 = vld [vmem:[%s6951_s4] ss:$0 sm:$0xff] }
  0x62   : > { %467 = vperm.xlu2 %4085, %v336_v31   ;;  %464 = vperm.xlu1 %4084, %v335_v32  }
  0x63   : > { %461 = vperm.xlu0 %4083, %v334_v33  }
  0x6a   : > { %476 = vperm.xlu2 %4085, %v339_v34   ;;  %473 = vperm.xlu1 %4084, %v338_v35  }
  0x6b   : > { %470 = vperm.xlu0 %4083, %v337_v36  }
  0x6c   : > { %v4194_v43 = vpop.permute.xlu2 %383 }
  0x6d   : > { %vm566_vm4 = vcmp.eq.s32.totalorder %v4268_v29, %v4194_v43 }
  0x72   : > { %485 = vperm.xlu2 %4085, %v342_v37   ;;  %482 = vperm.xlu1 %4084, %v341_v38  }
  0x73   : > { %479 = vperm.xlu0 %4083, %v340_v39   ;;  %v634_v39 = vsel %vm566_vm4, %v4276_v30, 0.0 }
  0x74   : > { %v4205_v51 = vpop.permute.xlu2 %386  ;;  %v707_v43 = vsel %vm694_vm2, %v634_v39, 0.0 }
  0x75   : > { %vm567_vm6 = vcmp.eq.s32.totalorder %v4268_v29, %v4205_v51 }
  0x7a   : > { %494 = vperm.xlu2 %4085, %v345_v40   ;;  %491 = vperm.xlu1 %4084, %v344_v41  }
  0x7b   : > { %488 = vperm.xlu0 %4083, %v343_v42  }
  0x7c   : > { %v4213_v58 = vpop.permute.xlu2 %395 }
  0x7d   : > { %vm570_vm9 = vcmp.eq.s32.totalorder %v4268_v29, %v4213_v58 }
  0x82   : > { %503 = vperm.xlu2 %4085, %v348_v44   ;;  %500 = vperm.xlu1 %4084, %v347_v45  }
  0x83   : > { %497 = vperm.xlu0 %4083, %v346_v46  }
  0x84   : > { %v4199_v47 = vpop.permute.xlu1 %377  ;;  %v4222_v0 = vpop.permute.xlu2 %404 }
  0x85   : > { %v4201_v48 = vpop.permute.xlu0 %371  ;;  %vm564_vm5 = vcmp.eq.s32.totalorder %v4268_v29, %v4199_v47  ;;  %v635_v47 = vsel %vm567_vm6, %v4276_v30, 0.0  ;;  %vm573_vm12 = vcmp.eq.s32.totalorder %v4268_v29, %v4222_v0 }
  0x86   : > { %vm562_vm1 = vcmp.eq.s32.totalorder %v4268_v29, %v4201_v48  ;;  %v632_v40 = vsel %vm564_vm5, %v4276_v30, 0.0 }
  0x87   : > { %v630_v34 = vsel %vm562_vm1, %v4276_v30, 0.0  ;;  %v701_v46 = vsel %vm694_vm2, %v632_v40, 0.0 }
  0x88   : > { %v695_v37 = vsel %vm694_vm2, %v630_v34, 0.0 }
  0x8a   : > { %512 = vperm.xlu2 %4085, %v351_v49   ;;  %509 = vperm.xlu1 %4084, %v350_v50   ;;  %v710_v50 = vsel %vm694_vm2, %v635_v47, 0.0 }
  0x8b   : > { %506 = vperm.xlu0 %4083, %v349_v52  }
  0x8c   : > { %v4208_v53 = vpop.permute.xlu1 %380  ;;  %v4231_v6 = vpop.permute.xlu2 %413 }
  0x8d   : > { %v375_v54 = vpop.permute.xlu0 %374  ;;  %vm565_vm3 = vcmp.eq.s32.totalorder %v4268_v29, %v4208_v53  ;;  %vm576_vm15 = vcmp.eq.s32.totalorder %v4268_v29, %v4231_v6 }
  0x8e   : > { %vm563_vm0 = vcmp.eq.s32.totalorder %v4268_v29, %v375_v54  ;;  %v633_v38 = vsel %vm565_vm3, %v4276_v30, 0.0 }
  0x8f   : > { %v631_v31 = vsel %vm563_vm0, %v4276_v30, 0.0  ;;  %v704_v44 = vsel %vm694_vm2, %v633_v38, 0.0 }
  0x90   : > { %v698_v36 = vsel %vm694_vm2, %v631_v31, 0.0 }
  0x92   : > { %521 = vperm.xlu2 %4085, %v354_v55   ;;  %518 = vperm.xlu1 %4084, %v353_v56   ;;  %v638_v56 = vsel %vm570_vm9, %v4276_v30, 0.0 }
  0x93   : > { %515 = vperm.xlu0 %4083, %v352_v57  }
  0x94   : > { %v4215_v59 = vpop.permute.xlu1 %392  ;;  %v4242_v14 = vpop.permute.xlu2 %422 }
  0x95   : > { %v4217_v60 = vpop.permute.xlu0 %389  ;;  %vm569_vm7 = vcmp.eq.s32.totalorder %v4268_v29, %v4215_v59  ;;  %v719_v59 = vsel %vm694_vm2, %v638_v56, 0.0  ;;  %vm579_vm3 = vcmp.eq.s32.totalorder %v4268_v29, %v4242_v14 }
  0x96   : > { %vm568_vm8 = vcmp.eq.s32.totalorder %v4268_v29, %v4217_v60  ;;  %v637_v48 = vsel %vm569_vm7, %v4276_v30, 0.0 }
  0x97   : > { %v636_v49 = vsel %vm568_vm8, %v4276_v30, 0.0  ;;  %v716_v51 = vsel %vm694_vm2, %v637_v48, 0.0 }
  0x98   : > { %v713_v54 = vsel %vm694_vm2, %v636_v49, 0.0 }
  0x9a   : > { %530 = vperm.xlu2 %4085, %v357_v61   ;;  %527 = vperm.xlu1 %4084, %v356_v62  }
  0x9b   : > { %524 = vperm.xlu0 %4083, %v355_v63  }
  0x9c   : > { %v4224_v1 = vpop.permute.xlu1 %401  ;;  %v4250_v19 = vpop.permute.xlu2 %431 }
  0x9d   : > { %v4226_v2 = vpop.permute.xlu0 %398  ;;  %vm572_vm10 = vcmp.eq.s32.totalorder %v4268_v29, %v4224_v1  ;;  %vm582_vm6 = vcmp.eq.s32.totalorder %v4268_v29, %v4250_v19 }
  0x9e   : > { %vm571_vm11 = vcmp.eq.s32.totalorder %v4268_v29, %v4226_v2  ;;  %v640_v57 = vsel %vm572_vm10, %v4276_v30, 0.0  ;;  %v641_v2 = vsel %vm573_vm12, %v4276_v30, 0.0 }
  0x9f   : > { %v639_v58 = vsel %vm571_vm11, %v4276_v30, 0.0  ;;  %v725_v60 = vsel %vm694_vm2, %v640_v57, 0.0 }
  0xa0   : > { %v722_v61 = vsel %vm694_vm2, %v639_v58, 0.0 }
  0xa2   : > { %539 = vperm.xlu2 %4085, %v360_v3   ;;  %536 = vperm.xlu1 %4084, %v359_v4   ;;  %v728_v4 = vsel %vm694_vm2, %v641_v2, 0.0 }
  0xa3   : > { %533 = vperm.xlu0 %4083, %v358_v5  }
  0xa4   : > { %v4235_v8 = vpop.permute.xlu1 %410  ;;  %v4256_v22 = vpop.permute.xlu2 %440 }
  0xa5   : > { %v4233_v7 = vpop.permute.xlu0 %407  ;;  %vm575_vm13 = vcmp.eq.s32.totalorder %v4268_v29, %v4235_v8  ;;  %v644_v8 = vsel %vm576_vm15, %v4276_v30, 0.0  ;;  %vm585_vm9 = vcmp.eq.s32.totalorder %v4268_v29, %v4256_v22 }
  0xa6   : > { %vm574_vm14 = vcmp.eq.s32.totalorder %v4268_v29, %v4233_v7  ;;  %v643_v0 = vsel %vm575_vm13, %v4276_v30, 0.0 }
  0xa7   : > { %v642_v3 = vsel %vm574_vm14, %v4276_v30, 0.0  ;;  %v734_v5 = vsel %vm694_vm2, %v643_v0, 0.0 }
  0xa8   : > { %v731_v7 = vsel %vm694_vm2, %v642_v3, 0.0 }
  0xaa   : > { %548 = vperm.xlu2 %4085, %v363_v9   ;;  %545 = vperm.xlu1 %4084, %v362_v10  }
  0xab   : > { %542 = vperm.xlu0 %4083, %v361_v11  }
  0xac   : > { %v4247_v17 = vpop.permute.xlu1 %419  ;;  %v4262_v26 = vpop.permute.xlu2 %449 }
  0xad   : > { %v4244_v15 = vpop.permute.xlu0 %416  ;;  %vm578_vm0 = vcmp.eq.s32.totalorder %v4268_v29, %v4247_v17  ;;  %v647_v17 = vsel %vm579_vm3, %v4276_v30, 0.0  ;;  %vm588_vm12 = vcmp.eq.s32.totalorder %v4268_v29, %v4262_v26 }
  0xae   : > { %vm577_vm1 = vcmp.eq.s32.totalorder %v4268_v29, %v4244_v15  ;;  %v646_v11 = vsel %vm578_vm0, %v4276_v30, 0.0  ;;  %v746_v14 = vsel %vm694_vm2, %v647_v17, 0.0 }
  0xaf   : > { %v645_v6 = vsel %vm577_vm1, %v4276_v30, 0.0 }
  0xb0   : > { %v740_v15 = vsel %vm694_vm2, %v645_v6, 0.0 }
  0xb2   : > { %557 = vperm.xlu2 %4085, %v366_v12   ;;  %554 = vperm.xlu1 %4084, %v365_v13   ;;  %v737_v13 = vsel %vm694_vm2, %v644_v8, 0.0 }
  0xb3   : > { %551 = vperm.xlu0 %4083, %v364_v16   ;;  %v743_v16 = vsel %vm694_vm2, %v646_v11, 0.0 }
  0xb4   : > { %v4254_v21 = vpop.permute.xlu1 %428  ;;  %v4279_v32 = vpop.permute.xlu2 %458 }
  0xb5   : > { %v4252_v20 = vpop.permute.xlu0 %425  ;;  %vm581_vm4 = vcmp.eq.s32.totalorder %v4268_v29, %v4254_v21  ;;  %vm591_vm15 = vcmp.eq.s32.totalorder %v4268_v29, %v4279_v32 }
  0xb6   : > { %vm580_vm5 = vcmp.eq.s32.totalorder %v4268_v29, %v4252_v20  ;;  %v659_v58 = vsel %vm591_vm15, %v4276_v30, 0.0 }
  0xb7   : > { %v648_v25 = vsel %vm580_vm5, %v4276_v30, 0.0  ;;  %v782_v0 = vsel %vm694_vm2, %v659_v58, 0.0 }
  0xb8   : > { %v749_v20 = vsel %vm694_vm2, %v648_v25, 0.0 }
  0xbb   : > { %560 = vperm.xlu0 %4083, %v367_v18   ;;  %v649_v18 = vsel %vm581_vm4, %v4276_v30, 0.0 }
  0xbc   : > { %v4260_v24 = vpop.permute.xlu1 %437  ;;  %v4297_v41 = vpop.permute.xlu2 %467  ;;  %v752_v21 = vsel %vm694_vm2, %v649_v18, 0.0 }
  0xbd   : > { %v4258_v23 = vpop.permute.xlu0 %434  ;;  %vm584_vm7 = vcmp.eq.s32.totalorder %v4268_v29, %v4260_v24  ;;  %vm594_vm3 = vcmp.eq.s32.totalorder %v4268_v29, %v4297_v41 }
  0xbe   : > { %vm583_vm8 = vcmp.eq.s32.totalorder %v4268_v29, %v4258_v23  ;;  %v652_v38 = vsel %vm584_vm7, %v4276_v30, 0.0  ;;  %v662_v3 = vsel %vm594_vm3, %v4276_v30, 0.0 }
  0xbf   : > { %v651_v39 = vsel %vm583_vm8, %v4276_v30, 0.0  ;;  %v761_v19 = vsel %vm694_vm2, %v652_v38, 0.0  ;;  %v791_v41 = vsel %vm694_vm2, %v662_v3, 0.0 }
  0xc0   : > { %v758_v23 = vsel %vm694_vm2, %v651_v39, 0.0 }
  0xc4   : > { %v4266_v28 = vpop.permute.xlu1 %446  ;;  %v4319_v52 = vpop.permute.xlu2 %476 }
  0xc5   : > { %v4264_v27 = vpop.permute.xlu0 %443  ;;  %vm587_vm10 = vcmp.eq.s32.totalorder %v4268_v29, %v4266_v28 }
  0xc6   : > { %vm586_vm11 = vcmp.eq.s32.totalorder %v4268_v29, %v4264_v27  ;;  %v655_v22 = vsel %vm587_vm10, %v4276_v30, 0.0 }
  0xc7   : > { %v654_v47 = vsel %vm586_vm11, %v4276_v30, 0.0  ;;  %v770_v49 = vsel %vm694_vm2, %v655_v22, 0.0 }
  0xc8   : > { %v767_v28 = vsel %vm694_vm2, %v654_v47, 0.0 }
  0xcc   : > { %v4284_v35 = vpop.permute.xlu1 %455  ;;  %v4342_v62 = vpop.permute.xlu2 %485 }
  0xcd   : > { %v4281_v33 = vpop.permute.xlu0 %452  ;;  %vm590_vm13 = vcmp.eq.s32.totalorder %v4268_v29, %v4284_v35 }
  0xce   : > { %vm589_vm14 = vcmp.eq.s32.totalorder %v4268_v29, %v4281_v33  ;;  %v658_v26 = vsel %vm590_vm13, %v4276_v30, 0.0 }
  0xcf   : > { %v657_v56 = vsel %vm589_vm14, %v4276_v30, 0.0  ;;  %v779_v35 = vsel %vm694_vm2, %v658_v26, 0.0 }
  0xd0   : > { %v776_v33 = vsel %vm694_vm2, %v657_v56, 0.0 }
  0xd4   : > { %v4302_v45 = vpop.permute.xlu1 %464  ;;  %v4361_v9 = vpop.permute.xlu2 %494 }
  0xd5   : > { %v4299_v42 = vpop.permute.xlu0 %461  ;;  %vm593_vm0 = vcmp.eq.s32.totalorder %v4268_v29, %v4302_v45 }
  0xd6   : > { %vm592_vm1 = vcmp.eq.s32.totalorder %v4268_v29, %v4299_v42 }
  0xd7   : > { %v660_v32 = vsel %vm592_vm1, %v4276_v30, 0.0 }
  0xd8   : > { %v785_v42 = vsel %vm694_vm2, %v660_v32, 0.0 }
  0xdb   : > { %699 = vadd.xlane.f32.xlu2 %v698_v36 }
  0xdc   : > { %696 = vadd.xlane.f32.xlu1 %v695_v37  ;;  %v4326_v55 = vpop.permute.xlu1 %473  ;;  %v4381_v31 = vpop.permute.xlu2 %503  ;;  %v650_v37 = vsel %vm582_vm6, %v4276_v30, 0.0  ;;  %vm597_vm6 = vcmp.eq.s32.totalorder %v4268_v29, %v4319_v52 }
  0xdd   : > { %v4321_v53 = vpop.permute.xlu0 %470  ;;  %v755_v40 = vsel %vm694_vm2, %v650_v37, 0.0  ;;  %vm596_vm4 = vcmp.eq.s32.totalorder %v4268_v29, %v4326_v55  ;;  %v665_v6 = vsel %vm597_vm6, %v4276_v30, 0.0  ;;  %vm606_vm15 = vcmp.eq.s32.totalorder %v4268_v29, %v4381_v31 }
  0xde   : > { %vm595_vm5 = vcmp.eq.s32.totalorder %v4268_v29, %v4321_v53  ;;  %v674_v22 = vsel %vm606_vm15, %v4276_v30, 0.0 }
  0xe3   : > { %705 = vadd.xlane.f32.xlu2 %v704_v44 }
  0xe4   : > { %708 = vadd.xlane.f32.xlu1 %v707_v43  ;;  %v4346_v1 = vpop.permute.xlu1 %482  ;;  %v4403_v44 = vpop.permute.xlu2 %512 }
  0xe5   : > { %702 = vadd.xlane.f32.xlu0 %v701_v46  ;;  %v4344_v63 = vpop.permute.xlu0 %479  ;;  %v653_v46 = vsel %vm585_vm9, %v4276_v30, 0.0  ;;  %vm599_vm7 = vcmp.eq.s32.totalorder %v4268_v29, %v4346_v1  ;;  %vm600_vm9 = vcmp.eq.s32.totalorder %v4268_v29, %v4342_v62  ;;  %vm609_vm3 = vcmp.eq.s32.totalorder %v4268_v29, %v4403_v44 }
  0xe6   : > { %v764_v48 = vsel %vm694_vm2, %v653_v46, 0.0  ;;  %vm598_vm8 = vcmp.eq.s32.totalorder %v4268_v29, %v4344_v63  ;;  %v668_v25 = vsel %vm600_vm9, %v4276_v30, 0.0  ;;  %v677_v26 = vsel %vm609_vm3, %v4276_v30, 0.0 }
  0xeb   : > { %711 = vadd.xlane.f32.xlu2 %v710_v50 }
  0xec   : > { %717 = vadd.xlane.f32.xlu1 %v716_v51  ;;  %v4366_v12 = vpop.permute.xlu1 %491  ;;  %v4426_v27 = vpop.permute.xlu2 %521 }
  0xed   : > { %714 = vadd.xlane.f32.xlu0 %v713_v54  ;;  %v4363_v10 = vpop.permute.xlu0 %488  ;;  %v656_v54 = vsel %vm588_vm12, %v4276_v30, 0.0  ;;  %vm602_vm10 = vcmp.eq.s32.totalorder %v4268_v29, %v4366_v12  ;;  %vm603_vm12 = vcmp.eq.s32.totalorder %v4268_v29, %v4361_v9  ;;  %vm612_vm6 = vcmp.eq.s32.totalorder %v4268_v29, %v4426_v27 }
  0xee   : > { %v773_v57 = vsel %vm694_vm2, %v656_v54, 0.0  ;;  %vm601_vm11 = vcmp.eq.s32.totalorder %v4268_v29, %v4363_v10  ;;  %v670_v62 = vsel %vm602_vm10, %v4276_v30, 0.0  ;;  %v671_v39 = vsel %vm603_vm12, %v4276_v30, 0.0 }
  0xf3   : > { %720 = vadd.xlane.f32.xlu2 %v719_v59 }
  0xf4   : > { %726 = vadd.xlane.f32.xlu1 %v725_v60  ;;  %v4386_v36 = vpop.permute.xlu1 %500  ;;  %v4445_v59 = vpop.permute.xlu2 %530 }
  0xf5   : > { %723 = vadd.xlane.f32.xlu0 %v722_v61  ;;  %v4383_v34 = vpop.permute.xlu0 %497  ;;  %v661_v61 = vsel %vm593_vm0, %v4276_v30, 0.0  ;;  %vm605_vm13 = vcmp.eq.s32.totalorder %v4268_v29, %v4386_v36  ;;  %vm615_vm9 = vcmp.eq.s32.totalorder %v4268_v29, %v4445_v59 }
  0xf6   : > { %v788_v45 = vsel %vm694_vm2, %v661_v61, 0.0  ;;  %vm604_vm14 = vcmp.eq.s32.totalorder %v4268_v29, %v4383_v34  ;;  %v673_v9 = vsel %vm605_vm13, %v4276_v30, 0.0  ;;  %v680_v61 = vsel %vm612_vm6, %v4276_v30, 0.0 }
  0xf7   : > { %v824_v36 = vsel %vm694_vm2, %v673_v9, 0.0  ;;  %vm1915_vm6 = vcmask 261120  }
  0xfb   : > { %729 = vadd.xlane.f32.xlu2 %v728_v4  ;;  %v664_v4 = vsel %vm596_vm4, %v4276_v30, 0.0 }
  0xfc   : > { %735 = vadd.xlane.f32.xlu1 %v734_v5  ;;  %v4410_v43 = vpop.permute.xlu1 %509  ;;  %v663_v5 = vsel %vm595_vm5, %v4276_v30, 0.0  ;;  %v797_v55 = vsel %vm694_vm2, %v664_v4, 0.0  ;;  %v683_v4 = vsel %vm615_vm9, %v4276_v30, 0.0 }
  0xfd   : > { %732 = vadd.xlane.f32.xlu0 %v731_v7  ;;  %v4405_v24 = vpop.permute.xlu0 %506  ;;  %v4465_v7 = vpop.permute.xlu2 %539  ;;  %v794_v53 = vsel %vm694_vm2, %v663_v5, 0.0  ;;  %vm608_vm0 = vcmp.eq.s32.totalorder %v4268_v29, %v4410_v43 }
  0xfe   : > { %vm607_vm1 = vcmp.eq.s32.totalorder %v4268_v29, %v4405_v24  ;;  %v676_v31 = vsel %vm608_vm0, %v4276_v30, 0.0  ;;  %vm618_vm12 = vcmp.eq.s32.totalorder %v4268_v29, %v4465_v7 }
  0xff   : > { %v833_v43 = vsel %vm694_vm2, %v676_v31, 0.0 }
 0x103   : > { %738 = vadd.xlane.f32.xlu2 %v737_v13  ;;  %v667_v13 = vsel %vm599_vm7, %v4276_v30, 0.0 }
 0x104   : > { %744 = vadd.xlane.f32.xlu1 %v743_v16  ;;  %v4430_v51 = vpop.permute.xlu1 %518  ;;  %v666_v16 = vsel %vm598_vm8, %v4276_v30, 0.0  ;;  %v806_v52 = vsel %vm694_vm2, %v667_v13, 0.0  ;;  %v686_v13 = vsel %vm618_vm12, %v4276_v30, 0.0 }
 0x105   : > { %741 = vadd.xlane.f32.xlu0 %v740_v15  ;;  %v4428_v50 = vpop.permute.xlu0 %515  ;;  %v800_v15 = vsel %vm694_vm2, %v665_v6, 0.0  ;;  %v4487_v17 = vpop.permute.xlu2 %548  ;;  %v803_v63 = vsel %vm694_vm2, %v666_v16, 0.0  ;;  %vm611_vm4 = vcmp.eq.s32.totalorder %v4268_v29, %v4430_v51 }
 0x106   : > { %vm610_vm5 = vcmp.eq.s32.totalorder %v4268_v29, %v4428_v50  ;;  %v679_v44 = vsel %vm611_vm4, %v4276_v30, 0.0  ;;  %vm621_vm15 = vcmp.eq.s32.totalorder %v4268_v29, %v4487_v17 }
 0x107   : > { %v842_v51 = vsel %vm694_vm2, %v679_v44, 0.0  ;;  %v4676_v44 = vld [vmem:[%s4658_s8 + $0x8] sm:$0xff] }
 0x10b   : > { %747 = vadd.xlane.f32.xlu2 %v746_v14  ;;  %v669_v14 = vsel %vm601_vm11, %v4276_v30, 0.0 }
 0x10c   : > { %753 = vadd.xlane.f32.xlu1 %v752_v21  ;;  %v4450_v2 = vpop.permute.xlu1 %527  ;;  %v809_v21 = vsel %vm694_vm2, %v668_v25, 0.0  ;;  %v812_v12 = vsel %vm694_vm2, %v669_v14, 0.0 }
 0x10d   : > { %750 = vadd.xlane.f32.xlu0 %v749_v20  ;;  %v4447_v60 = vpop.permute.xlu0 %524  ;;  %v815_v20 = vsel %vm694_vm2, %v670_v62, 0.0  ;;  %v4510_v10 = vpop.permute.xlu2 %557  ;;  %vm614_vm7 = vcmp.eq.s32.totalorder %v4268_v29, %v4450_v2  ;;  %v689_v62 = vsel %vm621_vm15, %v4276_v30, 0.0 }
 0x10e   : > { %vm613_vm8 = vcmp.eq.s32.totalorder %v4268_v29, %v4447_v60  ;;  %v682_v27 = vsel %vm614_vm7, %v4276_v30, 0.0  ;;  %vm624_vm3 = vcmp.eq.s32.totalorder %v4268_v29, %v4510_v10  ;;  %vm3498_vm7 = vcmask 7168  }
 0x10f   : > { %v851_v2 = vsel %vm694_vm2, %v682_v27, 0.0  ;;  %v692_v9 = vsel %vm624_vm3, %v4276_v30, 0.0  ;;  %v4694_v27 = vld [vmem:[%s4658_s8 + $0x28] sm:$0xff] }
 0x110   : > { %v881_v10 = vsel %vm694_vm2, %v692_v9, 0.0  ;;  %v4761_v9 = vld [vmem:[%s4658_s8 + $0x70] sm:$0xff] }
 0x113   : > { %756 = vadd.xlane.f32.xlu2 %v755_v40  ;;  %v672_v40 = vsel %vm604_vm14, %v4276_v30, 0.0 }
 0x114   : > { %762 = vadd.xlane.f32.xlu1 %v761_v19  ;;  %v4470_v11 = vpop.permute.xlu1 %536  ;;  %v818_v19 = vsel %vm694_vm2, %v671_v39, 0.0  ;;  %v821_v34 = vsel %vm694_vm2, %v672_v40, 0.0 }
 0x115   : > { %759 = vadd.xlane.f32.xlu0 %v758_v23  ;;  %v4467_v8 = vpop.permute.xlu0 %533  ;;  %vm617_vm10 = vcmp.eq.s32.totalorder %v4268_v29, %v4470_v11 }
 0x116   : > { %vm616_vm11 = vcmp.eq.s32.totalorder %v4268_v29, %v4467_v8  ;;  %v685_v59 = vsel %vm617_vm10, %v4276_v30, 0.0 }
 0x117   : > { %v860_v11 = vsel %vm694_vm2, %v685_v59, 0.0  ;;  %v4712_v59 = vld [vmem:[%s4658_s8 + $0x40] sm:$0xff] }
 0x11b   : > { %765 = vadd.xlane.f32.xlu2 %v764_v48  ;;  %v675_v48 = vsel %vm607_vm1, %v4276_v30, 0.0 }
 0x11c   : > { %771 = vadd.xlane.f32.xlu1 %v770_v49  ;;  %v4494_v18 = vpop.permute.xlu1 %545  ;;  %v827_v49 = vsel %vm694_vm2, %v674_v22, 0.0  ;;  %v830_v24 = vsel %vm694_vm2, %v675_v48, 0.0  ;;  %v4663_v48 = vld [vmem:[%s4658_s8] sm:$0xff] }
 0x11d   : > { %768 = vadd.xlane.f32.xlu0 %v767_v28  ;;  %v4489_v1 = vpop.permute.xlu0 %542  ;;  %vm620_vm13 = vcmp.eq.s32.totalorder %v4268_v29, %v4494_v18 }
 0x11e   : > { %vm619_vm14 = vcmp.eq.s32.totalorder %v4268_v29, %v4489_v1  ;;  %v688_v7 = vsel %vm620_vm13, %v4276_v30, 0.0 }
 0x123   : > { %774 = vadd.xlane.f32.xlu2 %v773_v57  ;;  %v678_v57 = vsel %vm610_vm5, %v4276_v30, 0.0  ;;  %vm2545_vm5 = vcmask 326656  }
 0x124   : > { %780 = vadd.xlane.f32.xlu1 %v779_v35  ;;  %v4514_v38 = vpop.permute.xlu1 %554  ;;  %v836_v35 = vsel %vm694_vm2, %v677_v26, 0.0  ;;  %v839_v50 = vsel %vm694_vm2, %v678_v57, 0.0  ;;  %v4680_v57 = vld [vmem:[%s4658_s8 + $0x18] sm:$0xff] }
 0x125   : > { %777 = vadd.xlane.f32.xlu0 %v776_v33  ;;  %v4512_v37 = vpop.permute.xlu0 %551  ;;  %vm623_vm0 = vcmp.eq.s32.totalorder %v4268_v29, %v4514_v38 }
 0x126   : > { %vm622_vm1 = vcmp.eq.s32.totalorder %v4268_v29, %v4512_v37  ;;  %v691_v17 = vsel %vm623_vm0, %v4276_v30, 0.0 }
 0x12b   : > { %783 = vadd.xlane.f32.xlu2 %v782_v0  ;;  %v681_v0 = vsel %vm613_vm8, %v4276_v30, 0.0 }
 0x12c   : > { %789 = vadd.xlane.f32.xlu1 %v788_v45  ;;  %v845_v45 = vsel %vm694_vm2, %v680_v61, 0.0  ;;  %v848_v60 = vsel %vm694_vm2, %v681_v0, 0.0  ;;  %v4698_v0 = vld [vmem:[%s4658_s8 + $0x30] sm:$0xff] }
 0x12d   : > { %786 = vadd.xlane.f32.xlu0 %v785_v42  ;;  %v4533_v47 = vpop.permute.xlu0 %560 }
 0x12e   : > { %vm625_vm4 = vcmp.eq.s32.totalorder %v4268_v29, %v4533_v47 }
 0x133   : > { %792 = vadd.xlane.f32.xlu2 %v791_v41  ;;  %v684_v41 = vsel %vm616_vm11, %v4276_v30, 0.0 }
 0x134   : > { %798 = vadd.xlane.f32.xlu1 %v797_v55  ;;  %v854_v55 = vsel %vm694_vm2, %v683_v4, 0.0  ;;  %v857_v8 = vsel %vm694_vm2, %v684_v41, 0.0  ;;  %v4716_v41 = vld [vmem:[%s4658_s8 + $0x48] sm:$0xff] }
 0x135   : > { %795 = vadd.xlane.f32.xlu0 %v794_v53 }
 0x13b   : > { %801 = vadd.xlane.f32.xlu2 %v800_v15  ;;  %v687_v15 = vsel %vm619_vm14, %v4276_v30, 0.0 }
 0x13c   : > { %807 = vadd.xlane.f32.xlu1 %v806_v52  ;;  %v863_v52 = vsel %vm694_vm2, %v686_v13, 0.0  ;;  %v866_v1 = vsel %vm694_vm2, %v687_v15, 0.0  ;;  %v4726_v13 = vld [vmem:[%s4658_s8 + $0x50] sm:$0xff] }
 0x13d   : > { %804 = vadd.xlane.f32.xlu0 %v803_v63  ;;  %v869_v63 = vsel %vm694_vm2, %v688_v7, 0.0 }
 0x143   : > { %810 = vadd.xlane.f32.xlu2 %v809_v21  ;;  %v690_v21 = vsel %vm622_vm1, %v4276_v30, 0.0 }
 0x144   : > { %816 = vadd.xlane.f32.xlu1 %v815_v20  ;;  %v872_v20 = vsel %vm694_vm2, %v689_v62, 0.0  ;;  %v875_v37 = vsel %vm694_vm2, %v690_v21, 0.0  ;;  %v4737_v62 = vld [vmem:[%s4658_s8 + $0x60] sm:$0xff] }
 0x145   : > { %813 = vadd.xlane.f32.xlu0 %v812_v12  ;;  %v878_v12 = vsel %vm694_vm2, %v691_v17, 0.0  ;;  %v4061_v17 = vld [vmem:[%s6950_s3 + $0x48] sm:$0xff] }
 0x14b   : > { %819 = vadd.xlane.f32.xlu2 %v818_v19  ;;  %v693_v19 = vsel %vm625_vm4, %v4276_v30, 0.0 }
 0x14c   : > { %825 = vadd.xlane.f32.xlu1 %v824_v36  ;;  %v884_v36 = vsel %vm694_vm2, %v693_v19, 0.0  ;;  %vm2642_vm2 = vcmask 1043456  }
 0x14d   : > { %822 = vadd.xlane.f32.xlu0 %v821_v34 }
 0x14e   : > { %v4528_v23 = vpop.xlane.xlu2 %699 }
 0x14f   : > { %6962 = vst [vmem:[#allocation2_spill] sm:$0xff] %v4528_v23  ;;  %v4530_v46 = vpop.xlane.xlu1 %696  ;;  %v3709_v23 = vld [vmem:[%s4748_s15 + $0x68] sm:$0xf0] }
 0x150   : > { %6963 = vst [vmem:[#allocation3_spill] sm:$0xff] %v4530_v46 }
 0x153   : > { %828 = vadd.xlane.f32.xlu2 %v827_v49 }
 0x154   : > { %834 = vadd.xlane.f32.xlu1 %v833_v43  ;;  %v4669_v43 = vld [vmem:[%s4658_s8 + $0x10] sm:$0xff] }
 0x155   : > { %831 = vadd.xlane.f32.xlu0 %v830_v24 }
 0x156   : > { %v4546_v28 = vpop.xlane.xlu2 %705 }
 0x157   : > { %6964 = vst [vmem:[#allocation4_spill] sm:$0xff] %v4546_v28  ;;  %v4548_v54 = vpop.xlane.xlu1 %708  ;;  %v4995_v28 = vld [vmem:[%s4658_s8 + $0x198] sm:$0xff] }
 0x158   : > { %6965 = vst [vmem:[#allocation5_spill] sm:$0xff] %v4548_v54  ;;  %v4551_v56 = vpop.xlane.xlu0 %702 }
 0x159   : > { %6966 = vst [vmem:[#allocation6_spill] sm:$0xff] %v4551_v56  ;;  %v4000_v56 = vld [vmem:[%s4748_s15 + $0x64] sm:$0xf] }
 0x15a   : > { %v3712_v46 = vor.u32 %v4000_v56, %v3709_v23  ;;  %v5014_v23 = vld [vmem:[%s4658_s8 + $0x1b0] sm:$0xff] }
 0x15b   : > { %837 = vadd.xlane.f32.xlu2 %v836_v35  ;;  %7038 = vst [vmem:[#allocation78_spill] sm:$0xff] %v5014_v23 }
 0x15c   : > { %843 = vadd.xlane.f32.xlu1 %v842_v51  ;;  %v4687_v51 = vld [vmem:[%s4658_s8 + $0x20] sm:$0xff] }
 0x15d   : > { %840 = vadd.xlane.f32.xlu0 %v839_v50 }
 0x15e   : > { %v4564_v33 = vpop.xlane.xlu2 %711 }
 0x15f   : > { %6967 = vst [vmem:[#allocation7_spill] sm:$0xff] %v4564_v33  ;;  %v4566_v58 = vpop.xlane.xlu1 %717  ;;  %v4984_v33 = vld [vmem:[%s4658_s8 + $0x188] sm:$0xff] }
 0x160   : > { %6968 = vst [vmem:[#allocation8_spill] sm:$0xff] %v4566_v58  ;;  %v4569_v32 = vpop.xlane.xlu0 %714 }
 0x161   : > { %6969 = vst [vmem:[#allocation9_spill] sm:$0xff] %v4569_v32  ;;  %v4989_v32 = vld [vmem:[%s4658_s8 + $0x190] sm:$0xff] }
 0x163   : > { %846 = vadd.xlane.f32.xlu2 %v845_v45 }
 0x164   : > { %852 = vadd.xlane.f32.xlu1 %v851_v2  ;;  %v4705_v2 = vld [vmem:[%s4658_s8 + $0x38] sm:$0xff] }
 0x165   : > { %849 = vadd.xlane.f32.xlu0 %v848_v60 }
 0x166   : > { %v4582_v42 = vpop.xlane.xlu2 %720 }
 0x167   : > { %6970 = vst [vmem:[#allocation10_spill] sm:$0xff] %v4582_v42  ;;  %v4584_v3 = vpop.xlane.xlu1 %726  ;;  %v4966_v42 = vld [vmem:[%s4658_s8 + $0x170] sm:$0xff] }
 0x168   : > { %6971 = vst [vmem:[#allocation11_spill] sm:$0xff] %v4584_v3  ;;  %v4587_v5 = vpop.xlane.xlu0 %723 }
 0x169   : > { %6972 = vst [vmem:[#allocation12_spill] sm:$0xff] %v4587_v5  ;;  %v4971_v5 = vld [vmem:[%s4658_s8 + $0x178] sm:$0xff] }
 0x16b   : > { %855 = vadd.xlane.f32.xlu2 %v854_v55  ;;  %v2192_v55 = vld [vmem:[%s6950_s3 + $0x50] sm:$0xf] }
 0x16c   : > { %861 = vadd.xlane.f32.xlu1 %v860_v11  ;;  %v2523_v11 = vunpack.c.l.b16 %v2192_v55  ;;  %v4769_v55 = vld [vmem:[%s4658_s8 + $0x78] sm:$0xff] }
 0x16d   : > { %858 = vadd.xlane.f32.xlu0 %v857_v8 }
 0x16e   : > { %v4600_v53 = vpop.xlane.xlu2 %729  ;;  %v2534_v7 = vpack.c.b16 %v2523_v11, %v2523_v11 }
 0x16f   : > { %6973 = vst [vmem:[#allocation13_spill] sm:$0xff] %v4600_v53  ;;  %v4602_v6 = vpop.xlane.xlu1 %735 }
 0x170   : > { %6974 = vst [vmem:[#allocation14_spill] sm:$0xff] %v4602_v6  ;;  %v4605_v16 = vpop.xlane.xlu0 %732  ;;  %v3701_v6 = vld [vmem:[%s4748_s15 + $0x58] sm:$0xf0] }
 0x171   : > { %6975 = vst [vmem:[#allocation15_spill] sm:$0xff] %v4605_v16 }
 0x173   : > { %864 = vadd.xlane.f32.xlu2 %v863_v52 }
 0x174   : > { %870 = vadd.xlane.f32.xlu1 %v869_v63  ;;  %v4733_v63 = vld [vmem:[%s4658_s8 + $0x58] sm:$0xff] }
 0x175   : > { %867 = vadd.xlane.f32.xlu0 %v866_v1  ;;  %v2644_v1 = vsel %vm2642_vm2, %v2534_v7, 0 }
 0x176   : > { %v4618_v18 = vpop.xlane.xlu2 %738  ;;  %2820 = vmatpush.bf16.msra.mxu1 %v2644_v1  ;;  %4070 = vmatpush.bf16.msra.mxu3 %v2644_v1  ;;  %v4777_v1 = vld [vmem:[%s4658_s8 + $0x80] sm:$0xff] }
 0x177   : > { %6976 = vst [vmem:[#allocation16_spill] sm:$0xff] %v4618_v18  ;;  %v4620_v25 = vpop.xlane.xlu1 %744 }
 0x178   : > { %6977 = vst [vmem:[#allocation17_spill] sm:$0xff] %v4620_v25  ;;  %v4623_v14 = vpop.xlane.xlu0 %741  ;;  %v4932_v25 = vld [vmem:[%s4658_s8 + $0x148] sm:$0xff] }
 0x179   : > { %6978 = vst [vmem:[#allocation18_spill] sm:$0xff] %v4623_v14  ;;  %v3998_v14 = vld [vmem:[%s4748_s15 + $0x54] sm:$0xf] }
 0x17a   : > { %2821 = vmatpush.bf16.msra.mxu1 %v4061_v17  ;;  %4071 = vmatpush.bf16.msra.mxu3 %v4061_v17  ;;  %v3704_v53 = vor.u32 %v3998_v14, %v3701_v6  ;;  %v4975_v6 = vld [vmem:[%s4658_s8 + $0x180] sm:$0xff] }
 0x17b   : > { %873 = vadd.xlane.f32.xlu2 %v872_v20  ;;  %v4753_v20 = vld [vmem:[%s4658_s8 + $0x68] sm:$0xff] }
 0x17c   : > { %879 = vadd.xlane.f32.xlu1 %v878_v12  ;;  %v4060_v12 = vld [vmem:[%s6950_s3 + $0x40] sm:$0xff] }
 0x17d   : > { %876 = vadd.xlane.f32.xlu0 %v875_v37 }
 0x17e   : > { %v4634_v38 = vpop.xlane.xlu2 %747  ;;  %2822 = vmatpush.bf16.msra.mxu1 %v4060_v12  ;;  %4072 = vmatpush.bf16.msra.mxu3 %v4060_v12  ;;  %v4786_v12 = vld [vmem:[%s4658_s8 + $0x90] sm:$0xff] }
 0x17f   : > { %6979 = vst [vmem:[#allocation19_spill] sm:$0xff] %v4634_v38  ;;  %v4636_v39 = vpop.xlane.xlu1 %753 }
 0x180   : > { %6980 = vst [vmem:[#allocation20_spill] sm:$0xff] %v4636_v39  ;;  %v4639_v40 = vpop.xlane.xlu0 %750  ;;  %v3693_v39 = vld [vmem:[%s4748_s15 + $0x48] sm:$0xf0] }
 0x181   : > { %6981 = vst [vmem:[#allocation21_spill] sm:$0xff] %v4639_v40  ;;  %v4945_v40 = vld [vmem:[%s4658_s8 + $0x158] sm:$0xff] }
 0x183   : > { %882 = vadd.xlane.f32.xlu2 %v881_v10  ;;  %v3988_v10 = vld [vmem:[%s4748_s15 + $0x4] sm:$0xf] }
 0x185   : > { %885 = vadd.xlane.f32.xlu0 %v884_v36  ;;  %v3661_v36 = vld [vmem:[%s4748_s15 + $0x8] sm:$0xf0] }
 0x186   : > { %v4644_v34 = vpop.xlane.xlu2 %756  ;;  %v3664_v11 = vor.u32 %v3988_v10, %v3661_v36 }
 0x187   : > { %6982 = vst [vmem:[#allocation22_spill] sm:$0xff] %v4644_v34  ;;  %v4646_v22 = vpop.xlane.xlu1 %762  ;;  %v3996_v34 = vld [vmem:[%s4748_s15 + $0x44] sm:$0xf] }
 0x188   : > { %6983 = vst [vmem:[#allocation23_spill] sm:$0xff] %v4646_v22  ;;  %v4648_v29 = vpop.xlane.xlu0 %759  ;;  %3953 = vmatmul.msk.bf16.vlgmr.msra.gmra.mxu1 %vm2545_vm5, %v3664_v11  ;;  %v4795_v11 = vld [vmem:[%s4658_s8 + $0x98] sm:$0xff] }
 0x189   : > { %6984 = vst [vmem:[#allocation24_spill] sm:$0xff] %v4648_v29  ;;  %v4919_v29 = vld [vmem:[%s4658_s8 + $0x138] sm:$0xff] }
 0x18e   : > { %v4650_v47 = vpop.xlane.xlu2 %765 }
 0x18f   : > { %6985 = vst [vmem:[#allocation25_spill] sm:$0xff] %v4650_v47  ;;  %v4652_v31 = vpop.xlane.xlu1 %771  ;;  %v4890_v47 = vld [vmem:[%s4658_s8 + $0x110] sm:$0xff] }
 0x190   : > { %6986 = vst [vmem:[#allocation26_spill] sm:$0xff] %v4652_v31  ;;  %v4660_v30 = vpop.xlane.xlu0 %768  ;;  %v4880_v31 = vld [vmem:[%s4658_s8 + $0x108] sm:$0xff] }
 0x191   : > { %6987 = vst [vmem:[#allocation27_spill] sm:$0xff] %v4660_v30  ;;  %v4895_v30 = vld [vmem:[%s4658_s8 + $0x118] sm:$0xff] }
 0x195   : > { %953 = vperm.xlu1 %4084, %v4663_v48  }
 0x196   : > { %v4666_v49 = vpop.xlane.xlu2 %774 }
 0x197   : > { %6988 = vst [vmem:[#allocation28_spill] sm:$0xff] %v4666_v49  ;;  %v4671_v24 = vpop.xlane.xlu1 %780  ;;  %v3685_v49 = vld [vmem:[%s4748_s15 + $0x38] sm:$0xf0] }
 0x198   : > { %6989 = vst [vmem:[#allocation29_spill] sm:$0xff] %v4671_v24  ;;  %v4673_v26 = vpop.xlane.xlu0 %777  ;;  %v4856_v24 = vld [vmem:[%s4658_s8 + $0xe8] sm:$0xff] }
 0x199   : > { %6990 = vst [vmem:[#allocation30_spill] sm:$0xff] %v4673_v26  ;;  %963 = vperm.xlu0 %4083, %v4669_v43  }
 0x19b   : > { %958 = vperm.xlu2 %4085, %v4676_v44  }
 0x19d   : > { %968 = vperm.xlu1 %4084, %v4680_v57  }
 0x19e   : > { %v4684_v35 = vpop.xlane.xlu2 %783 }
 0x19f   : > { %6991 = vst [vmem:[#allocation31_spill] sm:$0xff] %v4684_v35  ;;  %v4689_v50 = vpop.xlane.xlu1 %789 }
 0x1a0   : > { %6992 = vst [vmem:[#allocation32_spill] sm:$0xff] %v4689_v50  ;;  %v4691_v61 = vpop.xlane.xlu0 %786  ;;  %v4843_v50 = vld [vmem:[%s4658_s8 + $0xd8] sm:$0xff] }
 0x1a1   : > { %6993 = vst [vmem:[#allocation33_spill] sm:$0xff] %v4691_v61  ;;  %973 = vperm.xlu0 %4083, %v4687_v51  }
 0x1a3   : > { %978 = vperm.xlu2 %4085, %v4694_v27  }
 0x1a5   : > { %983 = vperm.xlu1 %4084, %v4698_v0  }
 0x1a6   : > { %v4702_v45 = vpop.xlane.xlu2 %792 }
 0x1a7   : > { %6994 = vst [vmem:[#allocation34_spill] sm:$0xff] %v4702_v45  ;;  %v4707_v60 = vpop.xlane.xlu1 %798  ;;  %v3677_v45 = vld [vmem:[%s4748_s15 + $0x28] sm:$0xf0] }
 0x1a8   : > { %6995 = vst [vmem:[#allocation35_spill] sm:$0xff] %v4707_v60  ;;  %v4709_v4 = vpop.xlane.xlu0 %795  ;;  %v4819_v60 = vld [vmem:[%s4658_s8 + $0xb8] sm:$0xff] }
 0x1a9   : > { %6996 = vst [vmem:[#allocation36_spill] sm:$0xff] %v4709_v4  ;;  %988 = vperm.xlu0 %4083, %v4705_v2  }
 0x1ab   : > { %993 = vperm.xlu2 %4085, %v4712_v59  }
 0x1ad   : > { %998 = vperm.xlu1 %4084, %v4716_v41  }
 0x1ae   : > { %v4723_v8 = vpop.xlane.xlu2 %801 }
 0x1af   : > { %6997 = vst [vmem:[#allocation37_spill] sm:$0xff] %v4723_v8  ;;  %v4728_v15 = vpop.xlane.xlu1 %807  ;;  %v4816_v8 = vld [vmem:[%s4658_s8 + $0xb0] sm:$0xff] }
 0x1b0   : > { %6998 = vst [vmem:[#allocation38_spill] sm:$0xff] %v4728_v15  ;;  %v4730_v52 = vpop.xlane.xlu0 %804  ;;  %v3669_v15 = vld [vmem:[%s4748_s15 + $0x18] sm:$0xf0] }
 0x1b1   : > { %6999 = vst [vmem:[#allocation39_spill] sm:$0xff] %v4730_v52  ;;  %1003 = vperm.xlu0 %4083, %v4726_v13  }
 0x1b3   : > { %1008 = vperm.xlu2 %4085, %v4733_v63  }
 0x1b5   : > { %1013 = vperm.xlu1 %4084, %v4737_v62  }
 0x1b6   : > { %v4750_v21 = vpop.xlane.xlu2 %810 }
 0x1b7   : > { %7000 = vst [vmem:[#allocation40_spill] sm:$0xff] %v4750_v21  ;;  %v4763_v19 = vpop.xlane.xlu1 %816  ;;  %v3990_v21 = vld [vmem:[%s4748_s15 + $0x14] sm:$0xf] }
 0x1b8   : > { %v4758_v37 = vpop.xlane.xlu0 %813  ;;  %7002 = vst [vmem:[#allocation42_spill] sm:$0xff] %v4763_v19  ;;  %v4782_v19 = vld [vmem:[%s4658_s8 + $0x88] sm:$0xff] }
 0x1b9   : > { %7001 = vst [vmem:[#allocation41_spill] sm:$0xff] %v4758_v37  ;;  %1018 = vperm.xlu0 %4083, %v4753_v20   ;;  %v3672_v37 = vor.u32 %v3990_v21, %v3669_v15  ;;  %v4825_v15 = vld [vmem:[%s4658_s8 + $0xc0] sm:$0xff] }
 0x1bb   : > { %1023 = vperm.xlu2 %4085, %v4761_v9   ;;  %3954 = vmatmul.msk.bf16.gmra.mxu1 %vm2545_vm5, %v3672_v37  ;;  %v4832_v37 = vld [vmem:[%s4658_s8 + $0xc8] sm:$0xff] }
 0x1bd   : > { %1028 = vperm.xlu1 %4084, %v4769_v55  }
 0x1be   : > { %v4774_v7 = vpop.xlane.xlu2 %819 }
 0x1bf   : > { %7003 = vst [vmem:[#allocation43_spill] sm:$0xff] %v4774_v7  ;;  %v4788_v10 = vpop.xlane.xlu1 %825 }
 0x1c0   : > { %v4779_v17 = vpop.xlane.xlu0 %822  ;;  %7005 = vst [vmem:[#allocation45_spill] sm:$0xff] %v4788_v10  ;;  %v4806_v10 = vld [vmem:[%s4658_s8 + $0xa8] sm:$0xff] }
 0x1c1   : > { %7004 = vst [vmem:[#allocation44_spill] sm:$0xff] %v4779_v17  ;;  %1033 = vperm.xlu0 %4083, %v4777_v1   ;;  %v4800_v17 = vld [vmem:[%s4658_s8 + $0xa0] sm:$0xff] }
 0x1c3   : > { %1038 = vperm.xlu2 %4085, %v4782_v19  }
 0x1c5   : > { %1043 = vperm.xlu1 %4084, %v4786_v12  }
 0x1c6   : > { %v4792_v36 = vpop.xlane.xlu2 %828 }
 0x1c7   : > { %7006 = vst [vmem:[#allocation46_spill] sm:$0xff] %v4792_v36  ;;  %v4810_v36 = vpop.xlane.xlu1 %834 }
 0x1c8   : > { %v4797_v7 = vpop.xlane.xlu0 %831  ;;  %7008 = vst [vmem:[#allocation48_spill] sm:$0xff] %v4810_v36  ;;  %v4837_v36 = vld [vmem:[%s4658_s8 + $0xd0] sm:$0xff] }
 0x1c9   : > { %7007 = vst [vmem:[#allocation47_spill] sm:$0xff] %v4797_v7  ;;  %1048 = vperm.xlu0 %4083, %v4795_v11  }
 0x1cb   : > { %1053 = vperm.xlu2 %4085, %v4800_v17  }
 0x1cd   : > { %1058 = vperm.xlu1 %4084, %v4806_v10  }
 0x1ce   : > { %v4813_v7 = vpop.xlane.xlu2 %837 }
 0x1cf   : > { %7009 = vst [vmem:[#allocation49_spill] sm:$0xff] %v4813_v7  ;;  %v4834_v7 = vpop.xlane.xlu1 %843 }
 0x1d0   : > { %v4821_v52 = vpop.xlane.xlu0 %840  ;;  %7012 = vst [vmem:[#allocation52_spill] sm:$0xff] %v4834_v7  ;;  %v4853_v7 = vld [vmem:[%s4658_s8 + $0xe0] sm:$0xff] }
 0x1d1   : > { %7010 = vst [vmem:[#allocation50_spill] sm:$0xff] %v4821_v52  ;;  %1063 = vperm.xlu0 %4083, %v4816_v8   ;;  %v3992_v52 = vld [vmem:[%s4748_s15 + $0x24] sm:$0xf] }
 0x1d2   : > { %v3680_v4 = vor.u32 %v3992_v52, %v3677_v45  ;;  %v4862_v45 = vld [vmem:[%s4658_s8 + $0xf0] sm:$0xff] }
 0x1d3   : > { %1068 = vperm.xlu2 %4085, %v4819_v60  }
 0x1d4   : > { %3955 = vmatmul.msk.bf16.gmra.mxu1 %vm2545_vm5, %v3680_v4 }
 0x1d5   : > { %1073 = vperm.xlu1 %4084, %v4825_v15  }
 0x1d6   : > { %v4829_v21 = vpop.xlane.xlu2 %846 }
 0x1d7   : > { %7011 = vst [vmem:[#allocation51_spill] sm:$0xff] %v4829_v21  ;;  %v4858_v61 = vpop.xlane.xlu1 %852 }
 0x1d8   : > { %v4845_v35 = vpop.xlane.xlu0 %849  ;;  %7015 = vst [vmem:[#allocation55_spill] sm:$0xff] %v4858_v61  ;;  %v3994_v61 = vld [vmem:[%s4748_s15 + $0x34] sm:$0xf] }
 0x1d9   : > { %1078 = vperm.xlu0 %4083, %v4832_v37   ;;  %7013 = vst [vmem:[#allocation53_spill] sm:$0xff] %v4845_v35  ;;  %v4874_v35 = vld [vmem:[%s4658_s8 + $0x100] sm:$0xff]  ;;  %v3688_v26 = vor.u32 %v3994_v61, %v3685_v49 }
 0x1da   : > { %v4899_v49 = vld [vmem:[%s4658_s8 + $0x120] sm:$0xff] }
 0x1db   : > { %1083 = vperm.xlu2 %4085, %v4837_v36  }
 0x1dd   : > { %1088 = vperm.xlu1 %4084, %v4843_v50  }
 0x1de   : > { %v4850_v21 = vpop.xlane.xlu2 %855 }
 0x1df   : > { %7014 = vst [vmem:[#allocation54_spill] sm:$0xff] %v4850_v21  ;;  %v4871_v21 = vld [vmem:[%s4658_s8 + $0xf8] sm:$0xff] }
 0x1e0   : > { %v4865_v4 = vpop.xlane.xlu0 %858 }
 0x1e1   : > { %1093 = vperm.xlu0 %4083, %v4853_v7   ;;  %7016 = vst [vmem:[#allocation56_spill] sm:$0xff] %v4865_v4  ;;  %v4882_v4 = vpop.xlane.xlu1 %861 }
 0x1e2   : > { %7018 = vst [vmem:[#allocation58_spill] sm:$0xff] %v4882_v4  ;;  %v4911_v4 = vld [vmem:[%s4658_s8 + $0x130] sm:$0xff] }
 0x1e3   : > { %1098 = vperm.xlu2 %4085, %v4856_v24  }
 0x1e4   : > { %3956 = vmatmul.msk.bf16.gmra.mxu1 %vm2545_vm5, %v3688_v26 }
 0x1e5   : > { %1103 = vperm.xlu1 %4084, %v4862_v45  }
 0x1e6   : > { %v4868_v52 = vpop.xlane.xlu2 %864 }
 0x1e7   : > { %7017 = vst [vmem:[#allocation57_spill] sm:$0xff] %v4868_v52 }
 0x1e8   : > { %v4892_v22 = vpop.xlane.xlu0 %867 }
 0x1e9   : > { %1108 = vperm.xlu0 %4083, %v4871_v21   ;;  %7020 = vst [vmem:[#allocation60_spill] sm:$0xff] %v4892_v22  ;;  %v4902_v26 = vpop.xlane.xlu1 %870 }
 0x1ea   : > { %7021 = vst [vmem:[#allocation61_spill] sm:$0xff] %v4902_v26  ;;  %v3696_v26 = vor.u32 %v3996_v34, %v3693_v39  ;;  %v4936_v39 = vld [vmem:[%s4658_s8 + $0x150] sm:$0xff] }
 0x1eb   : > { %1113 = vperm.xlu2 %4085, %v4874_v35  }
 0x1ed   : > { %1118 = vperm.xlu1 %4084, %v4880_v31  }
 0x1ee   : > { %v4887_v52 = vpop.xlane.xlu2 %873 }
 0x1ef   : > { %7019 = vst [vmem:[#allocation59_spill] sm:$0xff] %v4887_v52  ;;  %v4908_v52 = vld [vmem:[%s4658_s8 + $0x128] sm:$0xff] }
 0x1f0   : > { %v4913_v22 = vpop.xlane.xlu0 %876 }
 0x1f1   : > { %1123 = vperm.xlu0 %4083, %v4890_v47   ;;  %7023 = vst [vmem:[#allocation63_spill] sm:$0xff] %v4913_v22  ;;  %v4927_v22 = vld [vmem:[%s4658_s8 + $0x140] sm:$0xff]  ;;  %v4929_v38 = vpop.xlane.xlu1 %879 }
 0x1f2   : > { %7025 = vst [vmem:[#allocation65_spill] sm:$0xff] %v4929_v38  ;;  %v4950_v38 = vld [vmem:[%s4658_s8 + $0x160] sm:$0xff] }
 0x1f3   : > { %1128 = vperm.xlu2 %4085, %v4895_v30  }
 0x1f4   : > { %3957 = vmatmul.msk.bf16.gmra.mxu1 %vm2545_vm5, %v3696_v26 }
 0x1f5   : > { %1133 = vperm.xlu1 %4084, %v4899_v49  }
 0x1f6   : > { %v4905_v61 = vpop.xlane.xlu2 %882 }
 0x1f7   : > { %7022 = vst [vmem:[#allocation62_spill] sm:$0xff] %v4905_v61 }
 0x1f8   : > { %v4938_v34 = vpop.xlane.xlu0 %885 }
 0x1f9   : > { %1138 = vperm.xlu0 %4083, %v4908_v52   ;;  %7026 = vst [vmem:[#allocation66_spill] sm:$0xff] %v4938_v34  ;;  %v4956_v34 = vld [vmem:[%s4658_s8 + $0x168] sm:$0xff] }
 0x1fb   : > { %1143 = vperm.xlu2 %4085, %v4911_v4  }
 0x1fd   : > { %1148 = vperm.xlu1 %4084, %v4919_v29  }
 0x1fe   : > { %v4924_v61 = vpop.permute.xlu2 %958 }
 0x1ff   : > { %7024 = vst [vmem:[#allocation64_spill] sm:$0xff] %v4924_v61 }
 0x201   : > { %1153 = vperm.xlu0 %4083, %v4927_v22  }
 0x203   : > { %1158 = vperm.xlu2 %4085, %v4932_v25  }
 0x204   : > { %3958 = vmatmul.msk.bf16.gmra.mxu1 %vm2545_vm5, %v3704_v53 }
 0x205   : > { %1163 = vperm.xlu1 %4084, %v4936_v39  }
 0x206   : > { %v4942_v26 = vpop.permute.xlu2 %978 }
 0x207   : > { %7027 = vst [vmem:[#allocation67_spill] sm:$0xff] %v4942_v26  ;;  %v4947_v18 = vpop.permute.xlu1 %953 }
 0x208   : > { %7028 = vst [vmem:[#allocation68_spill] sm:$0xff] %v4947_v18 }
 0x209   : > { %1168 = vperm.xlu0 %4083, %v4945_v40  }
 0x20b   : > { %v4958_v3 = vpop.permute.xlu0 %963  ;;  %1173 = vperm.xlu2 %4085, %v4950_v38  }
 0x20c   : > { %7029 = vst [vmem:[#allocation69_spill] sm:$0xff] %v4958_v3  ;;  %v4002_v3 = vld [vmem:[%s4748_s15 + $0x74] sm:$0xf] }
 0x20d   : > { %1178 = vperm.xlu1 %4084, %v4956_v34  }
 0x20e   : > { %v4963_v16 = vpop.permute.xlu2 %993 }
 0x20f   : > { %7030 = vst [vmem:[#allocation70_spill] sm:$0xff] %v4963_v16  ;;  %v4968_v58 = vpop.permute.xlu1 %968 }
 0x210   : > { %7031 = vst [vmem:[#allocation71_spill] sm:$0xff] %v4968_v58  ;;  %v5010_v58 = vld [vmem:[%s4658_s8 + $0x1a8] sm:$0xff] }
 0x211   : > { %1183 = vperm.xlu0 %4083, %v4966_v42  }
 0x213   : > { %v4977_v14 = vpop.permute.xlu0 %973  ;;  %1188 = vperm.xlu2 %4085, %v4971_v5  }
 0x214   : > { %7032 = vst [vmem:[#allocation72_spill] sm:$0xff] %v4977_v14  ;;  %3959 = vmatmul.msk.bf16.gmra.mxu1 %vm2545_vm5, %v3712_v46  ;;  %v3717_v14 = vld [vmem:[%s4748_s15 + $0x78] sm:$0xf0] }
 0x215   : > { %1193 = vperm.xlu1 %4084, %v4975_v6   ;;  %v3720_v18 = vor.u32 %v4002_v3, %v3717_v14  ;;  %v5053_v3 = vld [vmem:[%s4658_s8 + $0x1e0] sm:$0xff] }
 0x216   : > { %v4981_v53 = vpop.permute.xlu2 %1008  ;;  %7050 = vst [vmem:[#allocation90_spill] sm:$0xff] %v5053_v3 }
 0x217   : > { %7033 = vst [vmem:[#allocation73_spill] sm:$0xff] %v4981_v53  ;;  %v4986_v54 = vpop.permute.xlu1 %983 }
 0x218   : > { %7034 = vst [vmem:[#allocation74_spill] sm:$0xff] %v4986_v54  ;;  %v5005_v54 = vld [vmem:[%s4658_s8 + $0x1a0] sm:$0xff] }
 0x219   : > { %1198 = vperm.xlu0 %4083, %v4984_v33  }
 0x21b   : > { %v4997_v16 = vpop.permute.xlu0 %988  ;;  %1203 = vperm.xlu2 %4085, %v4989_v32  }
 0x21c   : > { %7035 = vst [vmem:[#allocation75_spill] sm:$0xff] %v4997_v16 }
 0x21d   : > { %1208 = vperm.xlu1 %4084, %v4995_v28  }
 0x21e   : > { %v5002_v53 = vpop.permute.xlu2 %1023 }
 0x21f   : > { %7036 = vst [vmem:[#allocation76_spill] sm:$0xff] %v5002_v53  ;;  %v5007_v26 = vpop.permute.xlu1 %998  ;;  %v5023_v53 = vld [vmem:[%s4658_s8 + $0x1b8] sm:$0xff] }
 0x220   : > { %7037 = vst [vmem:[#allocation77_spill] sm:$0xff] %v5007_v26  ;;  %v5028_v26 = vld [vmem:[%s4658_s8 + $0x1c0] sm:$0xff] }
 0x221   : > { %1213 = vperm.xlu0 %4083, %v5005_v54   ;;  %7041 = vst [vmem:[#allocation81_spill] sm:$0xff] %v5023_v53 }
 0x222   : > { %7043 = vst [vmem:[#allocation83_spill] sm:$0xff] %v5028_v26 }
 0x223   : > { %v5016_v56 = vpop.permute.xlu0 %1003  ;;  %1218 = vperm.xlu2 %4085, %v5010_v58  }
 0x224   : > { %7039 = vst [vmem:[#allocation79_spill] sm:$0xff] %v5016_v56  ;;  %v5034_v56 = vld [vmem:[%s4658_s8 + $0x1c8] sm:$0xff]  ;;  %3960 = vmatmul.msk.bf16.gmra.mxu1 %vm2545_vm5, %v3720_v18 }
 0x225   : > { %1223 = vperm.xlu1 %4084, %v5014_v23   ;;  %7044 = vst [vmem:[#allocation84_spill] sm:$0xff] %v5034_v56  ;;  %v5049_v23 = vld [vmem:[%s4658_s8 + $0x1d8] sm:$0xff] }
 0x226   : > { %v5020_v46 = vpop.permute.xlu2 %1038  ;;  %7049 = vst [vmem:[#allocation89_spill] sm:$0xff] %v5049_v23 }
 0x227   : > { %7040 = vst [vmem:[#allocation80_spill] sm:$0xff] %v5020_v46  ;;  %v5025_v16 = vpop.permute.xlu1 %1013 }
 0x228   : > { %7042 = vst [vmem:[#allocation82_spill] sm:$0xff] %v5025_v16  ;;  %v5044_v16 = vld [vmem:[%s4658_s8 + $0x1d0] sm:$0xff] }
 0x229   : > { %1228 = vperm.xlu0 %4083, %v5023_v53   ;;  %7047 = vst [vmem:[#allocation87_spill] sm:$0xff] %v5044_v16 }
 0x22b   : > { %v5036_v61 = vpop.permute.xlu0 %1018  ;;  %1233 = vperm.xlu2 %4085, %v5028_v26   ;;  %v5076_v26 = vld [vmem:[%s4658_s8 + $0x1f8] sm:$0xff] }
 0x22c   : > { %7045 = vst [vmem:[#allocation85_spill] sm:$0xff] %v5036_v61 }
 0x22d   : > { %1238 = vperm.xlu1 %4084, %v5034_v56   ;;  %v5067_v56 = vld [vmem:[%s4658_s8 + $0x1f0] sm:$0xff] }
 0x22e   : > { %v5041_v46 = vpop.permute.xlu2 %1053 }
 0x22f   : > { %7046 = vst [vmem:[#allocation86_spill] sm:$0xff] %v5041_v46  ;;  %v5046_v53 = vpop.permute.xlu1 %1028  ;;  %v5062_v46 = vld [vmem:[%s4658_s8 + $0x1e8] sm:$0xff] }
 0x230   : > { %7048 = vst [vmem:[#allocation88_spill] sm:$0xff] %v5046_v53  ;;  %v4059_v53 = vld [vmem:[%s6950_s3 + $0x38] sm:$0xff] }
 0x231   : > { %1243 = vperm.xlu0 %4083, %v5044_v16   ;;  %7053 = vst [vmem:[#allocation93_spill] sm:$0xff] %v5062_v46  ;;  %v4004_v16 = vld [vmem:[%s4748_s15 + $0x84] sm:$0xf]  ;;  %2646 = vmatpush.bf16.msra.mxu0 %v4059_v53 }
 0x232   : > { %4062 = vmatpush.bf16.msra.mxu2 %v4059_v53  ;;  %v4056_v53 = vld [vmem:[%s6950_s3 + $0x20] sm:$0xff] }
 0x233   : > { %v5055_v14 = vpop.permute.xlu0 %1033  ;;  %1248 = vperm.xlu2 %4085, %v5049_v23  }
 0x234   : > { %7051 = vst [vmem:[#allocation91_spill] sm:$0xff] %v5055_v14  ;;  %v3725_v14 = vld [vmem:[%s4748_s15 + $0x88] sm:$0xf0] }
 0x235   : > { %1253 = vperm.xlu1 %4084, %v5053_v3   ;;  %v3728_v23 = vor.u32 %v4004_v16, %v3725_v14  ;;  %v4100_v16 = vmov 1  }
 0x236   : > { %v5059_v18 = vpop.permute.xlu2 %1068 }
 0x237   : > { %7052 = vst [vmem:[#allocation92_spill] sm:$0xff] %v5059_v18  ;;  %v5064_v61 = vpop.permute.xlu1 %1043  ;;  %3961 = vmatmul.msk.bf16.gmra.mxu1 %vm2545_vm5, %v3728_v23  ;;  %v4058_v18 = vld [vmem:[%s6950_s3 + $0x30] sm:$0xff]  ;;  %v4057_v23 = vld [vmem:[%s6950_s3 + $0x28] sm:$0xff] }
 0x238   : > { %7054 = vst [vmem:[#allocation94_spill] sm:$0xff] %v5064_v61  ;;  %2647 = vmatpush.bf16.msra.mxu0 %v4058_v18  ;;  %4063 = vmatpush.bf16.msra.mxu2 %v4058_v18 }
 0x239   : > { %1258 = vperm.xlu0 %4083, %v5062_v46  }
 0x23b   : > { %v5078_v3 = vpop.permute.xlu0 %1048  ;;  %1263 = vperm.xlu2 %4085, %v5067_v56  }
 0x23c   : > { %7055 = vst [vmem:[#allocation95_spill] sm:$0xff] %v5078_v3  ;;  %2648 = vmatpush.bf16.msra.mxu0 %v4057_v23  ;;  %4064 = vmatpush.bf16.msra.mxu2 %v4057_v23 }
 0x23d   : > { %1268 = vperm.xlu1 %4084, %v5076_v26  }
 0x23e   : > { %v5086_v61 = vpop.permute.xlu2 %1083 }
 0x23f   : > { %7056 = vst [vmem:[#allocation96_spill] sm:$0xff] %v5086_v61  ;;  %v5088_v46 = vpop.permute.xlu1 %1058 }
 0x240   : > { %7057 = vst [vmem:[#allocation97_spill] sm:$0xff] %v5088_v46  ;;  %2649 = vmatpush.bf16.msra.mxu0 %v4056_v53  ;;  %4065 = vmatpush.bf16.msra.mxu2 %v4056_v53  ;;  %v4006_v46 = vld [vmem:[%s4748_s15 + $0x94] sm:$0xf]  ;;  %v3659_v53 = vld [vmem:[%s4748_s15] sm:$0xf] }
 0x241   : > { %4086 = vset.pattern.permute.xlu0 %v4100_v16 }
 0x242   : > { %1337 = vperm.xlu0 %4086, %v4663_v48   ;;  %v4055_v48 = vld [vmem:[%s6950_s3 + $0x18] sm:$0xff] }
 0x243   : > { %v5094_v14 = vpop.permute.xlu0 %1063  ;;  %4087 = vset.pattern.permute.xlu2 %v4100_v16 }
 0x244   : > { %7058 = vst [vmem:[#allocation98_spill] sm:$0xff] %v5094_v14  ;;  %1341 = vperm.xlu2 %4087, %v4676_v44   ;;  %v3733_v44 = vld [vmem:[%s4748_s15 + $0x98] sm:$0xf0]  ;;  %2650 = vmatpush.bf16.msra.mxu0 %v4055_v48 }
 0x245   : > { %4088 = vset.pattern.permute.xlu1 %v4100_v16  ;;  %v3736_v14 = vor.u32 %v4006_v46, %v3733_v44  ;;  %4066 = vmatpush.bf16.msra.mxu2 %v4055_v48  ;;  %v3989_v48 = vld [vmem:[%s4748_s15 + $0x4] sm:$0xf0]  ;;  %v4008_v44 = vld [vmem:[%s4748_s15 + $0xa4] sm:$0xf] }
 0x246   : > { %1345 = vperm.xlu1 %4088, %v4669_v43   ;;  %v5101_v18 = vpop.permute.xlu2 %1098  ;;  %v4054_v43 = vld [vmem:[%s6950_s3 + $0x10] sm:$0xff] }
 0x247   : > { %v5103_v61 = vpop.permute.xlu1 %1073  ;;  %3962 = vmatmul.msk.bf16.gmra.mxu1 %vm2545_vm5, %v3736_v14 }
 0x248   : > { %2651 = vmatpush.bf16.msra.mxu0 %v4054_v43 }
 0x249   : > { %4067 = vmatpush.bf16.msra.mxu2 %v4054_v43  ;;  %v3741_v43 = vld [vmem:[%s4748_s15 + $0xa8] sm:$0xf0] }
 0x24a   : > { %1357 = vperm.xlu0 %4086, %v4694_v27  }
 0x24b   : > { %v5111_v3 = vpop.permute.xlu0 %1078 }
 0x24c   : > { %1349 = vperm.xlu2 %4087, %v4680_v57   ;;  %v4053_v57 = vld [vmem:[%s6950_s3 + $0x8] sm:$0xff] }
 0x24d   : > { %2652 = vmatpush.bf16.msra.mxu0 %v4053_v57  ;;  %4068 = vmatpush.bf16.msra.mxu2 %v4053_v57 }
 0x24e   : > { %1353 = vperm.xlu1 %4088, %v4687_v51   ;;  %v5119_v16 = vpop.permute.xlu2 %1113  ;;  %v4052_v51 = vld [vmem:[%s6950_s3] sm:$0xff] }
 0x24f   : > { %v5121_v27 = vpop.permute.xlu1 %1088 }
 0x251   : > { %2653 = vmatpush.bf16.msra.mxu0 %v4052_v51  ;;  %4069 = vmatpush.bf16.msra.mxu2 %v4052_v51  ;;  %v5152_v51 = vpop.f32.mrf.mxu1 }
 0x252   : > { %1369 = vperm.xlu0 %4086, %v4712_v59   ;;  %v3660_v59 = vor.u32 %v3989_v48, %v3659_v53  ;;  %7060 = vst [vmem:[#allocation100_spill] sm:$0xff] %v5152_v51 }
 0x253   : > { %v5127_v46 = vpop.permute.xlu0 %1093 }
 0x254   : > { %1361 = vperm.xlu2 %4087, %v4698_v0   ;;  %2654 = vmatmul.bf16.vlgmr.msra.gmra.mxu0 %v3660_v59  ;;  %v3744_v0 = vor.u32 %v4008_v44, %v3741_v43  ;;  %v3667_v59 = vld [vmem:[%s4748_s15 + $0x10] sm:$0xf]  ;;  %v4010_v43 = vld [vmem:[%s4748_s15 + $0xb4] sm:$0xf] }
 0x256   : > { %1365 = vperm.xlu1 %4088, %v4705_v2   ;;  %v5134_v23 = vpop.permute.xlu2 %1128 }
 0x257   : > { %v5136_v14 = vpop.permute.xlu1 %1103  ;;  %3963 = vmatmul.msk.bf16.gmra.mxu1 %vm2545_vm5, %v3744_v0  ;;  %v3749_v0 = vld [vmem:[%s4748_s15 + $0xb8] sm:$0xf0] }
 0x25a   : > { %1381 = vperm.xlu0 %4086, %v4733_v63  }
 0x25b   : > { %v5143_v57 = vpop.permute.xlu0 %1108 }
 0x25c   : > { %1373 = vperm.xlu2 %4087, %v4716_v41  }
 0x25e   : > { %1377 = vperm.xlu1 %4088, %v4726_v13   ;;  %v5148_v2 = vpop.permute.xlu2 %1143  ;;  %v3991_v13 = vld [vmem:[%s4748_s15 + $0x14] sm:$0xf0] }
 0x25f   : > { %7059 = vst [vmem:[#allocation99_spill] sm:$0xff] %v5148_v2  ;;  %v5150_v53 = vpop.permute.xlu1 %1118  ;;  %v3668_v44 = vor.u32 %v3991_v13, %v3667_v59 }
 0x262   : > { %1393 = vperm.xlu0 %4086, %v4761_v9   ;;  %v3752_v9 = vor.u32 %v4010_v43, %v3749_v0  ;;  %v3675_v43 = vld [vmem:[%s4748_s15 + $0x20] sm:$0xf] }
 0x263   : > { %v5155_v63 = vpop.permute.xlu0 %1123 }
 0x264   : > { %1385 = vperm.xlu2 %4087, %v4737_v62   ;;  %2659 = vmatmul.bf16.gmra.mxu0 %v3668_v44  ;;  %v5170_v62 = vpop.f32.mrf.mxu1 }
 0x265   : > { %7064 = vst [vmem:[#allocation104_spill] sm:$0xff] %v5170_v62  ;;  %v3757_v62 = vld [vmem:[%s4748_s15 + $0xc8] sm:$0xf0] }
 0x266   : > { %1389 = vperm.xlu1 %4088, %v4753_v20   ;;  %v5159_v41 = vpop.permute.xlu2 %1158 }
 0x267   : > { %7061 = vst [vmem:[#allocation101_spill] sm:$0xff] %v5159_v41  ;;  %v5161_v48 = vpop.permute.xlu1 %1133  ;;  %3964 = vmatmul.msk.bf16.gmra.mxu1 %vm2545_vm5, %v3752_v9  ;;  %v4012_v9 = vld [vmem:[%s4748_s15 + $0xc4] sm:$0xf] }
 0x268   : > { %7062 = vst [vmem:[#allocation102_spill] sm:$0xff] %v5161_v48 }
 0x26a   : > { %1405 = vperm.xlu0 %4086, %v4782_v19  }
 0x26b   : > { %v5168_v51 = vpop.permute.xlu0 %1138 }
 0x26c   : > { %7063 = vst [vmem:[#allocation103_spill] sm:$0xff] %v5168_v51  ;;  %1397 = vperm.xlu2 %4087, %v4769_v55   ;;  %v5183_v13 = vpop.f32.mrf.mxu1 }
 0x26d   : > { %7068 = vst [vmem:[#allocation108_spill] sm:$0xff] %v5183_v13  ;;  %v3765_v13 = vld [vmem:[%s4748_s15 + $0xd8] sm:$0xf0] }
 0x26e   : > { %1401 = vperm.xlu1 %4088, %v4777_v1   ;;  %v5175_v20 = vpop.permute.xlu2 %1173  ;;  %v3993_v1 = vld [vmem:[%s4748_s15 + $0x24] sm:$0xf0] }
 0x26f   : > { %7065 = vst [vmem:[#allocation105_spill] sm:$0xff] %v5175_v20  ;;  %v5177_v59 = vpop.permute.xlu1 %1148  ;;  %v3676_v0 = vor.u32 %v3993_v1, %v3675_v43  ;;  %v7115_v20 = vld [vmem:[#allocation71_spill] sm:$0xff] }
 0x270   : > { %7066 = vst [vmem:[#allocation106_spill] sm:$0xff] %v5177_v59  ;;  %v3837_v59 = vld [vmem:[%s4748_s15 + $0x168] sm:$0xf0] }
 0x272   : > { %1417 = vperm.xlu0 %4086, %v4800_v17   ;;  %v3760_v17 = vor.u32 %v4012_v9, %v3757_v62 }
 0x273   : > { %v5180_v19 = vpop.permute.xlu0 %1153 }
 0x274   : > { %7067 = vst [vmem:[#allocation107_spill] sm:$0xff] %v5180_v19  ;;  %1409 = vperm.xlu2 %4087, %v4786_v12   ;;  %2664 = vmatmul.bf16.gmra.mxu0 %v3676_v0  ;;  %v5204_v1 = vpop.f32.mrf.mxu1  ;;  %v3683_v0 = vld [vmem:[%s4748_s15 + $0x30] sm:$0xf] }
 0x275   : > { %7074 = vst [vmem:[#allocation114_spill] sm:$0xff] %v5204_v1 }
 0x276   : > { %1413 = vperm.xlu1 %4088, %v4795_v11   ;;  %v5186_v55 = vpop.permute.xlu2 %1188 }
 0x277   : > { %7069 = vst [vmem:[#allocation109_spill] sm:$0xff] %v5186_v55  ;;  %v5188_v44 = vpop.permute.xlu1 %1163  ;;  %3965 = vmatmul.msk.bf16.gmra.mxu1 %vm2545_vm5, %v3760_v17  ;;  %v4014_v17 = vld [vmem:[%s4748_s15 + $0xd4] sm:$0xf] }
 0x278   : > { %7070 = vst [vmem:[#allocation110_spill] sm:$0xff] %v5188_v44 }
 0x27a   : > { %1429 = vperm.xlu0 %4086, %v4819_v60  }
 0x27b   : > { %v5195_v12 = vpop.permute.xlu0 %1168 }
 0x27c   : > { %7071 = vst [vmem:[#allocation111_spill] sm:$0xff] %v5195_v12  ;;  %1421 = vperm.xlu2 %4087, %v4806_v10   ;;  %v3747_v12 = vld [vmem:[%s4748_s15 + $0xb0] sm:$0xf] }
 0x27e   : > { %1425 = vperm.xlu1 %4088, %v4816_v8   ;;  %v5200_v11 = vpop.permute.xlu2 %1203  ;;  %v3995_v8 = vld [vmem:[%s4748_s15 + $0x34] sm:$0xf0] }
 0x27f   : > { %7072 = vst [vmem:[#allocation112_spill] sm:$0xff] %v5200_v11  ;;  %v5202_v43 = vpop.permute.xlu1 %1178  ;;  %v3684_v9 = vor.u32 %v3995_v8, %v3683_v0  ;;  %v5219_v11 = vpop.f32.mrf.mxu1 }
 0x280   : > { %7073 = vst [vmem:[#allocation113_spill] sm:$0xff] %v5202_v43  ;;  %v3829_v43 = vld [vmem:[%s4748_s15 + $0x158] sm:$0xf0] }
 0x281   : > { %7078 = vst [vmem:[#allocation118_spill] sm:$0xff] %v5219_v11  ;;  %v3773_v11 = vld [vmem:[%s4748_s15 + $0xe8] sm:$0xf0] }
 0x282   : > { %1441 = vperm.xlu0 %4086, %v4837_v36   ;;  %v3768_v36 = vor.u32 %v4014_v17, %v3765_v13  ;;  %v3691_v13 = vld [vmem:[%s4748_s15 + $0x40] sm:$0xf] }
 0x283   : > { %v5207_v60 = vpop.permute.xlu0 %1183 }
 0x284   : > { %7075 = vst [vmem:[#allocation115_spill] sm:$0xff] %v5207_v60  ;;  %1433 = vperm.xlu2 %4087, %v4825_v15   ;;  %2669 = vmatmul.bf16.gmra.mxu0 %v3684_v9  ;;  %v3997_v9 = vld [vmem:[%s4748_s15 + $0x44] sm:$0xf0] }
 0x285   : > { %v3692_v17 = vor.u32 %v3997_v9, %v3691_v13  ;;  %v3999_v9 = vld [vmem:[%s4748_s15 + $0x54] sm:$0xf0] }
 0x286   : > { %1437 = vperm.xlu1 %4088, %v4832_v37   ;;  %v5211_v10 = vpop.permute.xlu2 %1218 }
 0x287   : > { %7076 = vst [vmem:[#allocation116_spill] sm:$0xff] %v5211_v10  ;;  %v5213_v62 = vpop.permute.xlu1 %1193  ;;  %3966 = vmatmul.msk.bf16.gmra.mxu1 %vm2545_vm5, %v3768_v36  ;;  %v5234_v8 = vpop.f32.mrf.mxu1  ;;  %v4016_v36 = vld [vmem:[%s4748_s15 + $0xe4] sm:$0xf]  ;;  %v7110_v10 = vld [vmem:[#allocation64_spill] sm:$0xff] }
 0x288   : > { %7077 = vst [vmem:[#allocation117_spill] sm:$0xff] %v5213_v62  ;;  %v4031_v62 = vld [vmem:[%s4748_s15 + $0x154] sm:$0xf0] }
 0x289   : > { %7083 = vst [vmem:[#allocation123_spill] sm:$0xff] %v5234_v8 }
 0x28a   : > { %1453 = vperm.xlu0 %4086, %v4856_v24  }
 0x28b   : > { %v5222_v15 = vpop.permute.xlu0 %1198 }
 0x28c   : > { %7079 = vst [vmem:[#allocation119_spill] sm:$0xff] %v5222_v15  ;;  %1445 = vperm.xlu2 %4087, %v4843_v50   ;;  %v7114_v15 = vld [vmem:[#allocation69_spill] sm:$0xff] }
 0x28e   : > { %1449 = vperm.xlu1 %4088, %v4853_v7   ;;  %v5227_v37 = vpop.permute.xlu2 %1233 }
 0x28f   : > { %7080 = vst [vmem:[#allocation120_spill] sm:$0xff] %v5227_v37  ;;  %v5229_v0 = vpop.permute.xlu1 %1208  ;;  %v4009_v37 = vld [vmem:[%s4748_s15 + $0xa4] sm:$0xf0] }
 0x290   : > { %7081 = vst [vmem:[#allocation121_spill] sm:$0xff] %v5229_v0 }
 0x292   : > { %1465 = vperm.xlu0 %4086, %v4874_v35   ;;  %v3776_v35 = vor.u32 %v4016_v36, %v3773_v11  ;;  %v3699_v11 = vld [vmem:[%s4748_s15 + $0x50] sm:$0xf]  ;;  %v4018_v36 = vld [vmem:[%s4748_s15 + $0xf4] sm:$0xf] }
 0x293   : > { %v5232_v24 = vpop.permute.xlu0 %1213 }
 0x294   : > { %7082 = vst [vmem:[#allocation122_spill] sm:$0xff] %v5232_v24  ;;  %1457 = vperm.xlu2 %4087, %v4862_v45   ;;  %2674 = vmatmul.bf16.gmra.mxu0 %v3692_v17 }
 0x296   : > { %1461 = vperm.xlu1 %4088, %v4871_v21   ;;  %v5242_v7 = vpop.permute.xlu2 %1248  ;;  %v5251_v21 = vpop.f32.mrf.mxu1 }
 0x297   : > { %v5238_v50 = vpop.permute.xlu1 %1223  ;;  %7085 = vst [vmem:[#allocation125_spill] sm:$0xff] %v5242_v7  ;;  %3967 = vmatmul.msk.bf16.gmra.mxu1 %vm2545_vm5, %v3776_v35  ;;  %v3781_v35 = vld [vmem:[%s4748_s15 + $0xf8] sm:$0xf0]  ;;  %v3731_v7 = vld [vmem:[%s4748_s15 + $0x90] sm:$0xf] }
 0x298   : > { %7084 = vst [vmem:[#allocation124_spill] sm:$0xff] %v5238_v50 }
 0x299   : > { %7087 = vst [vmem:[#allocation127_spill] sm:$0xff] %v5251_v21 }
 0x29a   : > { %1477 = vperm.xlu0 %4086, %v4895_v30  }
 0x29b   : > { %v5247_v8 = vpop.permute.xlu0 %1228 }
 0x29c   : > { %7086 = vst [vmem:[#allocation126_spill] sm:$0xff] %v5247_v8  ;;  %1469 = vperm.xlu2 %4087, %v4880_v31  }
 0x29e   : > { %1473 = vperm.xlu1 %4088, %v4890_v47   ;;  %v5257_v30 = vpop.permute.xlu2 %1263  ;;  %v5267_v17 = vpop.f32.mrf.mxu1  ;;  %v3700_v47 = vor.u32 %v3999_v9, %v3699_v11  ;;  %v3787_v11 = vld [vmem:[%s4748_s15 + $0x100] sm:$0xf] }
 0x29f   : > { %v5254_v45 = vpop.permute.xlu1 %1238  ;;  %7089 = vst [vmem:[#allocation129_spill] sm:$0xff] %v5257_v30  ;;  %v4027_v30 = vld [vmem:[%s4748_s15 + $0x134] sm:$0xf0] }
 0x2a0   : > { %7088 = vst [vmem:[#allocation128_spill] sm:$0xff] %v5254_v45 }
 0x2a1   : > { %7092 = vst [vmem:[#allocation132_spill] sm:$0xff] %v5267_v17 }
 0x2a2   : > { %1489 = vperm.xlu0 %4086, %v4911_v4   ;;  %v3784_v4 = vor.u32 %v4018_v36, %v3781_v35  ;;  %v4001_v35 = vld [vmem:[%s4748_s15 + $0x64] sm:$0xf0] }
 0x2a3   : > { %v5259_v13 = vpop.permute.xlu0 %1243 }
 0x2a4   : > { %7090 = vst [vmem:[#allocation130_spill] sm:$0xff] %v5259_v13  ;;  %1481 = vperm.xlu2 %4087, %v4899_v49   ;;  %2679 = vmatmul.bf16.gmra.mxu0 %v3700_v47 }
 0x2a6   : > { %1485 = vperm.xlu1 %4088, %v4908_v52   ;;  %v5276_v52 = vpop.permute.xlu2 %1341  ;;  %v5283_v9 = vpop.f32.mrf.mxu1 }
 0x2a7   : > { %v5263_v31 = vpop.permute.xlu1 %1253  ;;  %3968 = vmatmul.msk.bf16.gmra.mxu1 %vm2545_vm5, %v3784_v4  ;;  %7095 = vst [vmem:[#allocation135_spill] sm:$0xff] %v5283_v9  ;;  %v4020_v9 = vld [vmem:[%s4748_s15 + $0x104] sm:$0xf] }
 0x2a8   : > { %7091 = vst [vmem:[#allocation131_spill] sm:$0xff] %v5263_v31  ;;  %v7106_v31 = vld [vmem:[#allocation93_spill] sm:$0xff] }
 0x2aa   : > { %1501 = vperm.xlu0 %4086, %v4932_v25   ;;  %v4021_v25 = vld [vmem:[%s4748_s15 + $0x104] sm:$0xf0] }
 0x2ab   : > { %v5272_v21 = vpop.permute.xlu0 %1258  ;;  %v3788_v47 = vor.u32 %v4021_v25, %v3787_v11 }
 0x2ac   : > { %7093 = vst [vmem:[#allocation133_spill] sm:$0xff] %v5272_v21  ;;  %1493 = vperm.xlu2 %4087, %v4919_v29  }
 0x2ad   : > { %2734 = vmatmul.bf16.vlgmr.msra.gmra.mxu2 %v3788_v47 }
 0x2ae   : > { %1497 = vperm.xlu1 %4088, %v4927_v22   ;;  %v5290_v29 = vpop.permute.xlu2 %1349  ;;  %v3707_v22 = vld [vmem:[%s4748_s15 + $0x60] sm:$0xf]  ;;  %v5299_v11 = vpop.f32.mrf.mxu1 }
 0x2af   : > { %v5279_v49 = vpop.permute.xlu1 %1268  ;;  %v3708_v17 = vor.u32 %v4001_v35, %v3707_v22  ;;  %7096 = vst [vmem:[#allocation136_spill] sm:$0xff] %v5299_v11  ;;  %v3795_v22 = vld [vmem:[%s4748_s15 + $0x110] sm:$0xf]  ;;  %v3797_v35 = vld [vmem:[%s4748_s15 + $0x118] sm:$0xf0] }
 0x2b0   : > { %7094 = vst [vmem:[#allocation134_spill] sm:$0xff] %v5279_v49 }
 0x2b2   : > { %1513 = vperm.xlu0 %4086, %v4950_v38   ;;  %v3789_v38 = vld [vmem:[%s4748_s15 + $0x108] sm:$0xf0] }
 0x2b4   : > { %v5286_v36 = vpop.permute.xlu0 %1337  ;;  %1505 = vperm.xlu2 %4087, %v4936_v39   ;;  %2684 = vmatmul.bf16.gmra.mxu0 %v3708_v17  ;;  %v3792_v39 = vor.u32 %v4020_v9, %v3789_v38  ;;  %v4022_v9 = vld [vmem:[%s4748_s15 + $0x114] sm:$0xf] }
 0x2b6   : > { %1509 = vperm.xlu1 %4088, %v4945_v40   ;;  %v5308_v47 = vpop.permute.xlu2 %1361  ;;  %v5508_v2 = vpop.f32.mrf.mxu1 }
 0x2b7   : > { %3969 = vmatmul.msk.bf16.gmra.mxu1 %vm2545_vm5, %v3792_v39  ;;  %v4003_v39 = vld [vmem:[%s4748_s15 + $0x74] sm:$0xf0]  ;;  %7124 = vst [vmem:[#allocation64_spill] sm:$0xff] %v5508_v2 }
 0x2b8   : > { %v5294_v4 = vpop.permute.xlu1 %1345 }
 0x2ba   : > { %1525 = vperm.xlu0 %4086, %v4971_v5   ;;  %v4023_v5 = vld [vmem:[%s4748_s15 + $0x114] sm:$0xf0] }
 0x2bb   : > { %v3796_v17 = vor.u32 %v4023_v5, %v3795_v22 }
 0x2bc   : > { %v5301_v40 = vpop.permute.xlu0 %1357  ;;  %1517 = vperm.xlu2 %4087, %v4956_v34   ;;  %v3715_v34 = vld [vmem:[%s4748_s15 + $0x70] sm:$0xf] }
 0x2bd   : > { %2739 = vmatmul.bf16.gmra.mxu2 %v3796_v17  ;;  %v3716_v22 = vor.u32 %v4003_v39, %v3715_v34  ;;  %v3803_v17 = vld [vmem:[%s4748_s15 + $0x120] sm:$0xf]  ;;  %v4024_v34 = vld [vmem:[%s4748_s15 + $0x124] sm:$0xf] }
 0x2be   : > { %1521 = vperm.xlu1 %4088, %v4966_v42   ;;  %v3800_v42 = vor.u32 %v4022_v9, %v3797_v35  ;;  %v5325_v5 = vpop.permute.xlu2 %1373  ;;  %v4025_v9 = vld [vmem:[%s4748_s15 + $0x124] sm:$0xf0]  ;;  %v7098_v39 = vld [vmem:[#allocation78_spill] sm:$0xff] }
 0x2bf   : > { %v7097_v35 = vld [vmem:[#allocation83_spill] sm:$0xff] }
 0x2c0   : > { %v5306_v25 = vpop.permute.xlu1 %1353  ;;  %3970 = vmatmul.msk.bf16.vlgmr.msra.gmra.mxu3 %vm2545_vm5, %v3800_v42  ;;  %v3804_v42 = vor.u32 %v4025_v9, %v3803_v17  ;;  %v3723_v17 = vld [vmem:[%s4748_s15 + $0x80] sm:$0xf]  ;;  %v4005_v9 = vld [vmem:[%s4748_s15 + $0x84] sm:$0xf0] }
 0x2c2   : > { %1537 = vperm.xlu0 %4086, %v4989_v32  }
 0x2c4   : > { %v5315_v38 = vpop.permute.xlu0 %1369  ;;  %1529 = vperm.xlu2 %4087, %v4975_v6   ;;  %2689 = vmatmul.bf16.gmra.mxu0 %v3716_v22 }
 0x2c6   : > { %1533 = vperm.xlu1 %4088, %v4984_v33   ;;  %v5339_v11 = vpop.permute.xlu2 %1385 }
 0x2c8   : > { %v5322_v32 = vpop.permute.xlu1 %1365 }
 0x2ca   : > { %1549 = vperm.xlu0 %4086, %v5010_v58   ;;  %v3805_v58 = vld [vmem:[%s4748_s15 + $0x128] sm:$0xf0] }
 0x2cb   : > { %v3808_v22 = vor.u32 %v4024_v34, %v3805_v58  ;;  %v7102_v34 = vld [vmem:[#allocation84_spill] sm:$0xff]  ;;  %v7103_v58 = vld [vmem:[#allocation87_spill] sm:$0xff] }
 0x2cc   : > { %v5327_v6 = vpop.permute.xlu0 %1381  ;;  %1541 = vperm.xlu2 %4087, %v4995_v28  }
 0x2cd   : > { %2744 = vmatmul.bf16.gmra.mxu2 %v3804_v42  ;;  %v7101_v42 = vld [vmem:[#allocation89_spill] sm:$0xff] }
 0x2ce   : > { %1545 = vperm.xlu1 %4088, %v5005_v54   ;;  %v7099_v54 = vld [vmem:[#allocation81_spill] sm:$0xff]  ;;  %v5354_v49 = vpop.permute.xlu2 %1397 }
 0x2d0   : > { %v5331_v33 = vpop.permute.xlu1 %1377  ;;  %3971 = vmatmul.msk.bf16.gmra.mxu3 %vm2545_vm5, %v3808_v22 }
 0x2d1   : > { %v5345_v1 = vpop.f32.mrf.mxu0 }
 0x2d2   : > { %1561 = vperm.xlu0 %4086, %v7097_v35   ;;  %7100 = vst [vmem:[#allocation83_spill] sm:$0xff] %v5345_v1  ;;  %v3724_v35 = vor.u32 %v4005_v9, %v3723_v17  ;;  %v3811_v1 = vld [vmem:[%s4748_s15 + $0x130] sm:$0xf]  ;;  %v4026_v9 = vld [vmem:[%s4748_s15 + $0x134] sm:$0xf] }
 0x2d3   : > { %v3812_v17 = vor.u32 %v4027_v30, %v3811_v1 }
 0x2d4   : > { %1553 = vperm.xlu2 %4087, %v7098_v39   ;;  %v5341_v28 = vpop.permute.xlu0 %1393  ;;  %2694 = vmatmul.bf16.gmra.mxu0 %v3724_v35 }
 0x2d6   : > { %1557 = vperm.xlu1 %4088, %v7099_v54   ;;  %v5374_v30 = vpop.permute.xlu2 %1409 }
 0x2d8   : > { %v5349_v39 = vpop.permute.xlu1 %1389 }
 0x2d9   : > { %v5356_v22 = vpop.f32.mrf.mxu0 }
 0x2da   : > { %1573 = vperm.xlu0 %4086, %v7101_v42   ;;  %7104 = vst [vmem:[#allocation78_spill] sm:$0xff] %v5356_v22  ;;  %v3813_v42 = vld [vmem:[%s4748_s15 + $0x138] sm:$0xf0] }
 0x2dc   : > { %1565 = vperm.xlu2 %4087, %v7102_v34   ;;  %v5358_v54 = vpop.permute.xlu0 %1405  ;;  %v7105_v34 = vld [vmem:[#allocation90_spill] sm:$0xff] }
 0x2dd   : > { %2749 = vmatmul.bf16.gmra.mxu2 %v3812_v17 }
 0x2de   : > { %1569 = vperm.xlu1 %4088, %v7103_v58   ;;  %v3816_v58 = vor.u32 %v4026_v9, %v3813_v42  ;;  %v4029_v42 = vld [vmem:[%s4748_s15 + $0x144] sm:$0xf0] }
 0x2e0   : > { %v5365_v35 = vpop.permute.xlu1 %1401  ;;  %3972 = vmatmul.msk.bf16.gmra.mxu3 %vm2545_vm5, %v3816_v58 }
 0x2e1   : > { %v5370_v22 = vpop.f32.mrf.mxu0 }
 0x2e2   : > { %1585 = vperm.xlu0 %4086, %v5067_v56   ;;  %7107 = vst [vmem:[#allocation81_spill] sm:$0xff] %v5370_v22  ;;  %v4007_v56 = vld [vmem:[%s4748_s15 + $0x94] sm:$0xf0] }
 0x2e3   : > { %v3732_v1 = vor.u32 %v4007_v56, %v3731_v7  ;;  %v5393_v56 = vpop.permute.xlu2 %1421 }
 0x2e4   : > { %1577 = vperm.xlu2 %4087, %v7105_v34   ;;  %v5376_v21 = vpop.permute.xlu0 %1417  ;;  %v5388_v34 = vld [vmem:[%s6952_s5] sm:$0xff] }
 0x2e5   : > { %2699 = vmatmul.bf16.gmra.mxu0 %v3732_v1  ;;  %v5391_v58 = vperm.slane %v5388_v34, 1  ;;  %v3821_v1 = vld [vmem:[%s4748_s15 + $0x148] sm:$0xf0]  ;;  %v5400_v13 = vperm.slane %v5388_v34, 0 }
 0x2e6   : > { %1581 = vperm.xlu1 %4088, %v7106_v31   ;;  %v3819_v31 = vld [vmem:[%s4748_s15 + $0x140] sm:$0xf] }
 0x2e7   : > { %v3820_v7 = vor.u32 %v4029_v42, %v3819_v31  ;;  %v1594_v45 = vmul.f32 %v5391_v58, %v5276_v52  ;;  %v3739_v42 = vld [vmem:[%s4748_s15 + $0xa0] sm:$0xf]  ;;  %v1593_v52 = vmul.f32 %v5391_v58, %v5286_v36  ;;  %v7113_v36 = vld [vmem:[#allocation72_spill] sm:$0xff]  ;;  %v1274_v55 = vmul.f32 %v5400_v13, %v7114_v15 }
 0x2e8   : > { %v5379_v17 = vpop.permute.xlu1 %1413  ;;  %v3740_v8 = vor.u32 %v4009_v37, %v3739_v42  ;;  %v1275_v15 = vmul.f32 %v5400_v13, %v7115_v20  ;;  %v4011_v20 = vld [vmem:[%s4748_s15 + $0xb4] sm:$0xf0] }
 0x2e9   : > { %v5381_v9 = vpop.f32.mrf.mxu0 }
 0x2ea   : > { %7108 = vst [vmem:[#allocation89_spill] sm:$0xff] %v5381_v9 }
 0x2eb   : > { %v5420_v0 = vpop.permute.xlu2 %1433 }
 0x2ec   : > { %1589 = vperm.xlu2 %4087, %v5076_v26   ;;  %v4028_v26 = vld [vmem:[%s4748_s15 + $0x144] sm:$0xf]  ;;  %v5397_v22 = vpop.permute.xlu0 %1429 }
 0x2ed   : > { %2754 = vmatmul.bf16.gmra.mxu2 %v3820_v7  ;;  %v3824_v9 = vor.u32 %v4028_v26, %v3821_v1  ;;  %v1273_v7 = vmul.f32 %v5400_v13, %v7110_v10  ;;  %v5414_v26 = vperm.slane %v5388_v34, 2  ;;  %v7111_v1 = vld [vmem:[#allocation68_spill] sm:$0xff]  ;;  %v1597_v10 = vmul.f32 %v5391_v58, %v5306_v25 }
 0x2f0   : > { %3973 = vmatmul.msk.bf16.gmra.mxu3 %vm2545_vm5, %v3824_v9  ;;  %v5409_v50 = vpop.permute.xlu1 %1425  ;;  %v1658_v9 = vadd.f32 %v1594_v45, %v1273_v7  ;;  %v1595_v45 = vmul.f32 %v5391_v58, %v5294_v4  ;;  %v1276_v7 = vmul.f32 %v5400_v13, %v7113_v36  ;;  %v5443_v4 = vperm.slane %v5388_v34, 4  ;;  %v4030_v36 = vld [vmem:[%s4748_s15 + $0x154] sm:$0xf] }
 0x2f1   : > { %v5405_v31 = vpop.f32.mrf.mxu0 }
 0x2f2   : > { %7109 = vst [vmem:[#allocation84_spill] sm:$0xff] %v5405_v31  ;;  %v1272_v31 = vmul.f32 %v5400_v13, %v7111_v1  ;;  %v1723_v37 = vadd.f32 %v5414_v26, %v1658_v9  ;;  %v3827_v1 = vld [vmem:[%s4748_s15 + $0x150] sm:$0xf]  ;;  %v1659_v44 = vadd.f32 %v1595_v45, %v1274_v55 }
 0x2f4   : > { %v5422_v24 = vpop.permute.xlu0 %1441  ;;  %v1657_v42 = vadd.f32 %v1593_v52, %v1272_v31  ;;  %v1596_v31 = vmul.f32 %v5391_v58, %v5290_v29  ;;  %v3828_v52 = vor.u32 %v4031_v62, %v3827_v1  ;;  %v1787_v60 = vmax.f32 %v1723_v37, 0.0 }
 0x2f5   : > { %2704 = vmatmul.bf16.gmra.mxu0 %v3740_v8  ;;  %v3832_v29 = vor.u32 %v4030_v36, %v3829_v43  ;;  %v1600_v37 = vmul.f32 %v5391_v58, %v5322_v32  ;;  %v1724_v55 = vadd.f32 %v5414_v26, %v1659_v44  ;;  %v1598_v43 = vmul.f32 %v5391_v58, %v5301_v40 }
 0x2f6   : > { %v1722_v25 = vadd.f32 %v5414_v26, %v1657_v42  ;;  %v1660_v41 = vadd.f32 %v1596_v31, %v1275_v15  ;;  %v5453_v42 = vpop.permute.xlu2 %1445  ;;  %v7117_v31 = vld [vmem:[#allocation75_spill] sm:$0xff]  ;;  %v1599_v36 = vmul.f32 %v5391_v58, %v5308_v47 }
 0x2f7   : > { %v1279_v32 = vmul.f32 %v5400_v13, %v7117_v31 }
 0x2f8   : > { %v5439_v9 = vpop.permute.xlu1 %1437 }
 0x2f9   : > { %v5427_v8 = vpop.f32.mrf.mxu0  ;;  %v1664_v44 = vadd.f32 %v1600_v37, %v1279_v32  ;;  %v1603_v37 = vmul.f32 %v5391_v58, %v5331_v33  ;;  %v7122_v33 = vld [vmem:[#allocation79_spill] sm:$0xff] }
 0x2fa   : > { %7112 = vst [vmem:[#allocation87_spill] sm:$0xff] %v5427_v8  ;;  %v1661_v8 = vadd.f32 %v1597_v10, %v1276_v7  ;;  %v1852_v10 = vmul.f32 %v5443_v4, %v1787_v60  ;;  %v1786_v7 = vmax.f32 %v1722_v25, 0.0  ;;  %v1725_v25 = vadd.f32 %v5414_v26, %v1660_v41 }
 0x2fb   : > { %v1729_v47 = vadd.f32 %v5414_v26, %v1664_v44  ;;  %v4033_v44 = vld [vmem:[%s4748_s15 + $0x164] sm:$0xf0] }
 0x2fc   : > { %v1726_v62 = vadd.f32 %v5414_v26, %v1661_v8  ;;  %v5463_v45 = vpop.permute.xlu0 %1453  ;;  %v3748_v8 = vor.u32 %v4011_v20, %v3747_v12  ;;  %v1919_v15 = vsel %vm1915_vm6, %v1852_v10, 0.0  ;;  %v1851_v40 = vmul.f32 %v5443_v4, %v1786_v7 }
 0x2fd   : > { %2759 = vmatmul.bf16.gmra.mxu2 %v3828_v52  ;;  %v7118_v52 = vld [vmem:[#allocation67_spill] sm:$0xff]  ;;  %v1789_v19 = vmax.f32 %v1725_v25, 0.0 }
 0x2fe   : > { %v1277_v60 = vmul.f32 %v5400_v13, %v7118_v52  ;;  %v1788_v52 = vmax.f32 %v1724_v55, 0.0  ;;  %v1916_v10 = vsel %vm1915_vm6, %v1851_v40, 0.0  ;;  %v5493_v25 = vpop.permute.xlu2 %1457 }
 0x300   : > { %3974 = vmatmul.msk.bf16.gmra.mxu3 %vm2545_vm5, %v3832_v29  ;;  %v1790_v29 = vmax.f32 %v1726_v62, 0.0  ;;  %v1662_v20 = vadd.f32 %v1598_v43, %v1277_v60  ;;  %v5476_v31 = vpop.permute.xlu1 %1449  ;;  %v1601_v43 = vmul.f32 %v5391_v58, %v5315_v38  ;;  %v1853_v55 = vmul.f32 %v5443_v4, %v1788_v52 }
 0x301   : > { %v5456_v1 = vpop.f32.mrf.mxu0  ;;  %v1282_v60 = vmul.f32 %v5400_v13, %v7122_v33  ;;  %v1602_v38 = vmul.f32 %v5391_v58, %v5325_v5  ;;  %v1793_v33 = vmax.f32 %v1729_v47, 0.0 }
 0x302   : > { %7116 = vst [vmem:[#allocation90_spill] sm:$0xff] %v5456_v1  ;;  %v7119_v1 = vld [vmem:[#allocation74_spill] sm:$0xff]  ;;  %v1855_v62 = vmul.f32 %v5443_v4, %v1790_v29 }
 0x303   : > { %v1278_v12 = vmul.f32 %v5400_v13, %v7119_v1  ;;  %v1727_v1 = vadd.f32 %v5414_v26, %v1662_v20 }
 0x304   : > { %v5501_v29 = vpop.permute.xlu0 %1465 }
 0x305   : > { %2709 = vmatmul.bf16.gmra.mxu0 %v3748_v8  ;;  %v1663_v41 = vadd.f32 %v1599_v36, %v1278_v12  ;;  %v7121_v8 = vld [vmem:[#allocation70_spill] sm:$0xff]  ;;  %v1854_v12 = vmul.f32 %v5443_v4, %v1789_v19  ;;  %v1791_v5 = vmax.f32 %v1727_v1, 0.0 }
 0x306   : > { %v1280_v32 = vmul.f32 %v5400_v13, %v7121_v8  ;;  %v3835_v36 = vld [vmem:[%s4748_s15 + $0x160] sm:$0xf]  ;;  %v1928_v8 = vsel %vm1915_vm6, %v1855_v62, 0.0  ;;  %v1606_v62 = vmul.f32 %v5391_v58, %v5349_v39  ;;  %v7126_v39 = vld [vmem:[#allocation73_spill] sm:$0xff] }
 0x307   : > { %v3836_v20 = vor.u32 %v4033_v44, %v3835_v36  ;;  %v1728_v52 = vadd.f32 %v5414_v26, %v1663_v41  ;;  %v7125_v36 = vld [vmem:[#allocation85_spill] sm:$0xff] }
 0x308   : > { %v1665_v48 = vadd.f32 %v1601_v43, %v1280_v32  ;;  %v5511_v41 = vpop.permute.xlu1 %1461  ;;  %v1858_v43 = vmul.f32 %v5443_v4, %v1793_v33  ;;  %v1285_v44 = vmul.f32 %v5400_v13, %v7125_v36  ;;  %v7127_v33 = vld [vmem:[#allocation82_spill] sm:$0xff] }
 0x309   : > { %v5483_v7 = vpop.f32.mrf.mxu0  ;;  %v1792_v1 = vmax.f32 %v1728_v52, 0.0 }
 0x30a   : > { %7120 = vst [vmem:[#allocation93_spill] sm:$0xff] %v5483_v7  ;;  %v4032_v7 = vld [vmem:[%s4748_s15 + $0x164] sm:$0xf]  ;;  %v1937_v52 = vsel %vm1915_vm6, %v1858_v43, 0.0 }
 0x30b   : > { %v3840_v51 = vor.u32 %v4032_v7, %v3837_v59  ;;  %v1604_v59 = vmul.f32 %v5391_v58, %v5327_v6  ;;  %v1856_v7 = vmul.f32 %v5443_v4, %v1791_v5  ;;  %v1670_v6 = vadd.f32 %v1606_v62, %v1285_v44 }
 0x30c   : > { %1920 = vadd.xlane.f32.xlu0 %v1919_v15  ;;  %v7123_v15 = vld [vmem:[#allocation77_spill] sm:$0xff] }
 0x30d   : > { %v1281_v40 = vmul.f32 %v5400_v13, %v7123_v15  ;;  %v1922_v15 = vsel %vm1915_vm6, %v1853_v55, 0.0  ;;  %2764 = vmatmul.bf16.gmra.mxu2 %v3836_v20  ;;  %v1730_v55 = vadd.f32 %v5414_v26, %v1665_v48  ;;  %v1605_v48 = vmul.f32 %v5391_v58, %v5339_v11  ;;  %v5534_v20 = vpop.permute.xlu2 %1469  ;;  %v5543_v11 = vpop.f32.mrf.mxu1 }
 0x30e   : > { %7128 = vst [vmem:[#allocation68_spill] sm:$0xff] %v5543_v11  ;;  %v1735_v43 = vadd.f32 %v5414_v26, %v1670_v6 }
 0x30f   : > { %v1666_v19 = vadd.f32 %v1602_v38, %v1281_v40  ;;  %v1283_v38 = vmul.f32 %v5400_v13, %v7126_v39  ;;  %v7129_v39 = vld [vmem:[#allocation91_spill] sm:$0xff] }
 0x310   : > { %1917 = vadd.xlane.f32.xlu1 %v1916_v10  ;;  %v1667_v10 = vadd.f32 %v1603_v37, %v1282_v60  ;;  %v1925_v37 = vsel %vm1915_vm6, %v1854_v12, 0.0  ;;  %3975 = vmatmul.msk.bf16.gmra.mxu3 %vm2545_vm5, %v3840_v51  ;;  %v3755_v60 = vld [vmem:[%s4748_s15 + $0xc0] sm:$0xf]  ;;  %v4013_v51 = vld [vmem:[%s4748_s15 + $0xc4] sm:$0xf0] }
 0x311   : > { %v5523_v32 = vpop.f32.mrf.mxu0  ;;  %v3756_v40 = vor.u32 %v4013_v51, %v3755_v60  ;;  %v1731_v12 = vadd.f32 %v5414_v26, %v1666_v19  ;;  %v1668_v5 = vadd.f32 %v1604_v59, %v1283_v38  ;;  %v1931_v19 = vsel %vm1915_vm6, %v1856_v7, 0.0  ;;  %v5553_v7 = vpop.permute.xlu1 %1473  ;;  %v7130_v38 = vld [vmem:[#allocation76_spill] sm:$0xff] }
 0x312   : > { %v1732_v47 = vadd.f32 %v5414_v26, %v1667_v10  ;;  %v1857_v10 = vmul.f32 %v5443_v4, %v1792_v1  ;;  %v1794_v60 = vmax.f32 %v1730_v55, 0.0  ;;  %v1607_v55 = vmul.f32 %v5391_v58, %v5341_v28 }
 0x313   : > { %v1795_v51 = vmax.f32 %v1731_v12, 0.0  ;;  %v1733_v36 = vadd.f32 %v5414_v26, %v1668_v5  ;;  %v1286_v12 = vmul.f32 %v5400_v13, %v7130_v38  ;;  %v1608_v28 = vmul.f32 %v5391_v58, %v5354_v49  ;;  %v3845_v38 = vld [vmem:[%s4748_s15 + $0x178] sm:$0xf0] }
 0x314   : > { %1929 = vadd.xlane.f32.xlu0 %v1928_v8  ;;  %v1796_v8 = vmax.f32 %v1732_v47, 0.0  ;;  %v1609_v47 = vmul.f32 %v5391_v58, %v5365_v35  ;;  %v1934_v1 = vsel %vm1915_vm6, %v1857_v10, 0.0  ;;  %v1859_v44 = vmul.f32 %v5443_v4, %v1794_v60  ;;  %v4035_v10 = vld [vmem:[%s4748_s15 + $0x174] sm:$0xf0] }
 0x315   : > { %1923 = vadd.xlane.f32.xlu2 %v1922_v15  ;;  %2714 = vmatmul.bf16.gmra.mxu0 %v3756_v40  ;;  %v1284_v15 = vmul.f32 %v5400_v13, %v7127_v33  ;;  %v1288_v35 = vmul.f32 %v5400_v13, %v7129_v39  ;;  %v1860_v6 = vmul.f32 %v5443_v4, %v1795_v51  ;;  %v4034_v39 = vld [vmem:[%s4748_s15 + $0x174] sm:$0xf]  ;;  %v5574_v49 = vpop.permute.xlu2 %1481 }
 0x316   : > { %v1861_v59 = vmul.f32 %v5443_v4, %v1796_v8  ;;  %v1940_v60 = vsel %vm1915_vm6, %v1859_v44, 0.0  ;;  %v1612_v44 = vmul.f32 %v5391_v58, %v5379_v17 }
 0x317   : > { %v1669_v62 = vadd.f32 %v1605_v48, %v1284_v15  ;;  %v1673_v8 = vadd.f32 %v1609_v47, %v1288_v35  ;;  %v1799_v15 = vmax.f32 %v1735_v43, 0.0  ;;  %v1943_v43 = vsel %vm1915_vm6, %v1860_v6, 0.0 }
 0x318   : > { %1926 = vadd.xlane.f32.xlu1 %v1925_v37  ;;  %v5540_v37 = vpop.permute.xlu0 %1477  ;;  %v1946_v33 = vsel %vm1915_vm6, %v1861_v59, 0.0  ;;  %v3848_v59 = vor.u32 %v4034_v39, %v3845_v38 }
 0x319   : > { %v5556_v40 = vpop.f32.mrf.mxu0  ;;  %v1734_v48 = vadd.f32 %v5414_v26, %v1669_v62  ;;  %v7131_v62 = vld [vmem:[#allocation88_spill] sm:$0xff]  ;;  %v1864_v35 = vmul.f32 %v5443_v4, %v1799_v15 }
 0x31a   : > { %v1287_v11 = vmul.f32 %v5400_v13, %v7131_v62  ;;  %v7134_v15 = vld [vmem:[#allocation80_spill] sm:$0xff] }
 0x31b   : > { %v1798_v47 = vmax.f32 %v1734_v48, 0.0  ;;  %v3763_v48 = vld [vmem:[%s4748_s15 + $0xd0] sm:$0xf]  ;;  %v1955_v38 = vsel %vm1915_vm6, %v1864_v35, 0.0 }
 0x31c   : > { %1938 = vadd.xlane.f32.xlu0 %v1937_v52  ;;  %v3843_v52 = vld [vmem:[%s4748_s15 + $0x170] sm:$0xf] }
 0x31d   : > { %1932 = vadd.xlane.f32.xlu2 %v1931_v19  ;;  %v3844_v5 = vor.u32 %v4035_v10, %v3843_v52  ;;  %v1671_v19 = vadd.f32 %v1607_v55, %v1286_v12  ;;  %v1672_v55 = vadd.f32 %v1608_v28, %v1287_v11  ;;  %v5583_v12 = vpop.f32.mrf.mxu1  ;;  %v1610_v10 = vmul.f32 %v5391_v58, %v5358_v54  ;;  %v4015_v28 = vld [vmem:[%s4748_s15 + $0xd4] sm:$0xf0]  ;;  %v5600_v54 = vpop.permute.xlu1 %1485 }
 0x31e   : > { %7132 = vst [vmem:[#allocation72_spill] sm:$0xff] %v5583_v12  ;;  %v3853_v12 = vld [vmem:[%s4748_s15 + $0x188] sm:$0xf0] }
 0x31f   : > { %2769 = vmatmul.bf16.gmra.mxu2 %v3844_v5  ;;  %v1736_v52 = vadd.f32 %v5414_v26, %v1671_v19  ;;  %v1289_v5 = vmul.f32 %v5400_v13, %v7134_v15  ;;  %v1611_v19 = vmul.f32 %v5391_v58, %v5374_v30 }
 0x320   : > { %1935 = vadd.xlane.f32.xlu1 %v1934_v1  ;;  %v1797_v1 = vmax.f32 %v1733_v36, 0.0  ;;  %v5576_v51 = vpop.permute.xlu0 %1489  ;;  %v1738_v36 = vadd.f32 %v5414_v26, %v1673_v8  ;;  %3976 = vmatmul.msk.bf16.gmra.mxu3 %vm2545_vm5, %v3848_v59  ;;  %v7133_v8 = vld [vmem:[#allocation95_spill] sm:$0xff] }
 0x321   : > { %v5590_v11 = vpop.f32.mrf.mxu0  ;;  %v1291_v17 = vmul.f32 %v5400_v13, %v7133_v8  ;;  %v1800_v8 = vmax.f32 %v1736_v52, 0.0  ;;  %v1613_v52 = vmul.f32 %v5391_v58, %v5376_v21 }
 0x322   : > { %v1862_v6 = vmul.f32 %v5443_v4, %v1797_v1  ;;  %v1737_v1 = vadd.f32 %v5414_v26, %v1672_v55  ;;  %v1802_v62 = vmax.f32 %v1738_v36, 0.0  ;;  %v1615_v55 = vmul.f32 %v5391_v58, %v5409_v50  ;;  %v5612_v36 = vpop.permute.xlu2 %1493  ;;  %v7136_v50 = vld [vmem:[#allocation98_spill] sm:$0xff] }
 0x323   : > { %v1676_v39 = vadd.f32 %v1612_v44, %v1291_v17  ;;  %v1865_v17 = vmul.f32 %v5443_v4, %v1800_v8 }
 0x324   : > { %1947 = vadd.xlane.f32.xlu0 %v1946_v33  ;;  %v3764_v33 = vor.u32 %v4015_v28, %v3763_v48  ;;  %v1674_v48 = vadd.f32 %v1610_v10, %v1289_v5  ;;  %v1949_v28 = vsel %vm1915_vm6, %v1862_v6, 0.0  ;;  %v1867_v44 = vmul.f32 %v5443_v4, %v1802_v62 }
 0x325   : > { %1941 = vadd.xlane.f32.xlu2 %v1940_v60  ;;  %v1863_v60 = vmul.f32 %v5443_v4, %v1798_v47  ;;  %v1741_v47 = vadd.f32 %v5414_v26, %v1676_v39  ;;  %v1801_v35 = vmax.f32 %v1737_v1, 0.0  ;;  %v1294_v5 = vmul.f32 %v5400_v13, %v7136_v50  ;;  %v7138_v39 = vld [vmem:[#allocation97_spill] sm:$0xff] }
 0x326   : > { %2719 = vmatmul.bf16.gmra.mxu0 %v3764_v33  ;;  %v1739_v10 = vadd.f32 %v5414_v26, %v1674_v48  ;;  %v1293_v1 = vmul.f32 %v5400_v13, %v7138_v39  ;;  %v1614_v62 = vmul.f32 %v5391_v58, %v5393_v56  ;;  %v1958_v39 = vsel %vm1915_vm6, %v1865_v17, 0.0 }
 0x327   : > { %v1952_v15 = vsel %vm1915_vm6, %v1863_v60, 0.0  ;;  %v1679_v48 = vadd.f32 %v1615_v55, %v1294_v5  ;;  %v1866_v8 = vmul.f32 %v5443_v4, %v1801_v35  ;;  %v1616_v5 = vmul.f32 %v5391_v58, %v5397_v22 }
 0x328   : > { %1944 = vadd.xlane.f32.xlu1 %v1943_v43  ;;  %v7135_v43 = vld [vmem:[#allocation94_spill] sm:$0xff]  ;;  %v5618_v6 = vpop.permute.xlu0 %1501  ;;  %v1678_v56 = vadd.f32 %v1614_v62, %v1293_v1  ;;  %v1297_v1 = vmul.f32 %v5400_v13, %v5111_v3 }
 0x329   : > { %v1290_v59 = vmul.f32 %v5400_v13, %v7135_v43  ;;  %v5621_v33 = vpop.f32.mrf.mxu0  ;;  %v3851_v43 = vld [vmem:[%s4748_s15 + $0x180] sm:$0xf]  ;;  %v1744_v35 = vadd.f32 %v5414_v26, %v1679_v48 }
 0x32a   : > { %v1743_v22 = vadd.f32 %v5414_v26, %v1678_v56 }
 0x32b   : > { %v1675_v30 = vadd.f32 %v1611_v19, %v1290_v59  ;;  %v7137_v19 = vld [vmem:[#allocation86_spill] sm:$0xff]  ;;  %v4037_v59 = vld [vmem:[%s4748_s15 + $0x184] sm:$0xf0] }
 0x32c   : > { %1956 = vadd.xlane.f32.xlu0 %v1955_v38  ;;  %v1292_v60 = vmul.f32 %v5400_v13, %v7137_v19  ;;  %v5629_v38 = vpop.f32.mrf.mxu1  ;;  %v5638_v19 = vpop.permute.xlu1 %1497  ;;  %v3852_v2 = vor.u32 %v4037_v59, %v3851_v43  ;;  %v7141_v43 = vld [vmem:[#allocation92_spill] sm:$0xff] }
 0x32d   : > { %1950 = vadd.xlane.f32.xlu2 %v1949_v28  ;;  %7139 = vst [vmem:[#allocation69_spill] sm:$0xff] %v5629_v38  ;;  %v1740_v21 = vadd.f32 %v5414_v26, %v1675_v30  ;;  %v1964_v28 = vsel %vm1915_vm6, %v1867_v44, 0.0  ;;  %v1803_v38 = vmax.f32 %v1739_v10, 0.0  ;;  %v4036_v30 = vld [vmem:[%s4748_s15 + $0x184] sm:$0xf]  ;;  %v1295_v59 = vmul.f32 %v5400_v13, %v7141_v43 }
 0x32e   : > { %v1677_v50 = vadd.f32 %v1613_v52, %v1292_v60  ;;  %v3856_v44 = vor.u32 %v4036_v30, %v3853_v12  ;;  %v1961_v52 = vsel %vm1915_vm6, %v1866_v8, 0.0  ;;  %v4017_v12 = vld [vmem:[%s4748_s15 + $0xe4] sm:$0xf0]  ;;  %v1617_v8 = vmul.f32 %v5391_v58, %v5420_v0 }
 0x32f   : > { %v1804_v55 = vmax.f32 %v1740_v21, 0.0  ;;  %2774 = vmatmul.bf16.gmra.mxu2 %v3852_v2  ;;  %v1868_v60 = vmul.f32 %v5443_v4, %v1803_v38  ;;  %v3771_v2 = vld [vmem:[%s4748_s15 + $0xe0] sm:$0xf]  ;;  %v1680_v30 = vadd.f32 %v1616_v5, %v1295_v59  ;;  %v1621_v5 = vmul.f32 %v5391_v58, %v5476_v31  ;;  %v7143_v59 = vld [vmem:[#allocation96_spill] sm:$0xff] }
 0x330   : > { %1953 = vadd.xlane.f32.xlu1 %v1952_v15  ;;  %v1805_v15 = vmax.f32 %v1741_v47, 0.0  ;;  %v1618_v47 = vmul.f32 %v5391_v58, %v5439_v9  ;;  %v1742_v10 = vadd.f32 %v5414_v26, %v1677_v50  ;;  %3977 = vmatmul.msk.bf16.gmra.mxu3 %vm2545_vm5, %v3856_v44  ;;  %v5657_v9 = vpop.permute.xlu2 %1505  ;;  %v5659_v21 = vpop.f32.mrf.mxu2  ;;  %v3772_v62 = vor.u32 %v4017_v12, %v3771_v2  ;;  %v3859_v12 = vld [vmem:[%s4748_s15 + $0x190] sm:$0xf] }
 0x331   : > { %7140 = vst [vmem:[#allocation71_spill] sm:$0xff] %v5659_v21  ;;  %v5664_v48 = vpop.permute.xlu0 %1513  ;;  %v1869_v38 = vmul.f32 %v5443_v4, %v1804_v55  ;;  %v1808_v50 = vmax.f32 %v1744_v35, 0.0  ;;  %v1967_v56 = vsel %vm1915_vm6, %v1868_v60, 0.0  ;;  %v1296_v55 = vmul.f32 %v5400_v13, %v5103_v61  ;;  %v4044_v21 = vld [vmem:[%s4748_s15 + $0x1c4] sm:$0xf] }
 0x332   : > { %v1870_v17 = vmul.f32 %v5443_v4, %v1805_v15  ;;  %v1682_v3 = vadd.f32 %v1618_v47, %v1297_v1  ;;  %v1806_v44 = vmax.f32 %v1742_v10, 0.0  ;;  %v1807_v47 = vmax.f32 %v1743_v22, 0.0  ;;  %v4039_v1 = vld [vmem:[%s4748_s15 + $0x194] sm:$0xf0] }
 0x333   : > { %v1970_v0 = vsel %vm1915_vm6, %v1869_v38, 0.0  ;;  %v1681_v35 = vadd.f32 %v1617_v8, %v1296_v55  ;;  %v1873_v2 = vmul.f32 %v5443_v4, %v1808_v50  ;;  %v1745_v60 = vadd.f32 %v5414_v26, %v1680_v30 }
 0x334   : > { %1965 = vadd.xlane.f32.xlu0 %v1964_v28  ;;  %v5667_v28 = vpop.f32.mrf.mxu0  ;;  %v1973_v15 = vsel %vm1915_vm6, %v1870_v17, 0.0  ;;  %v1747_v17 = vadd.f32 %v5414_v26, %v1682_v3  ;;  %v1619_v10 = vmul.f32 %v5391_v58, %v5422_v24  ;;  %v1871_v61 = vmul.f32 %v5443_v4, %v1806_v44 }
 0x335   : > { %1959 = vadd.xlane.f32.xlu2 %v1958_v39  ;;  %v5672_v39 = vpop.f32.mrf.mxu1  ;;  %v1298_v31 = vmul.f32 %v5400_v13, %v7143_v59  ;;  %v1620_v22 = vmul.f32 %v5391_v58, %v5453_v42  ;;  %v1872_v24 = vmul.f32 %v5443_v4, %v1807_v47  ;;  %v3860_v38 = vor.u32 %v4039_v1, %v3859_v12  ;;  %v4038_v47 = vld [vmem:[%s4748_s15 + $0x194] sm:$0xf] }
 0x336   : > { %2724 = vmatmul.bf16.gmra.mxu0 %v3772_v62  ;;  %v1300_v62 = vmul.f32 %v5400_v13, %v5127_v46  ;;  %v1746_v8 = vadd.f32 %v5414_v26, %v1681_v35  ;;  %v1982_v46 = vsel %vm1915_vm6, %v1873_v2, 0.0  ;;  %v1811_v50 = vmax.f32 %v1747_v17, 0.0  ;;  %v3861_v35 = vld [vmem:[%s4748_s15 + $0x198] sm:$0xf0] }
 0x337   : > { %v1299_v30 = vmul.f32 %v5400_v13, %v5121_v27  ;;  %v1976_v42 = vsel %vm1915_vm6, %v1871_v61, 0.0  ;;  %v1809_v55 = vmax.f32 %v1745_v60, 0.0  ;;  %v1979_v17 = vsel %vm1915_vm6, %v1872_v24, 0.0  ;;  %v3779_v24 = vld [vmem:[%s4748_s15 + $0xf0] sm:$0xf] }
 0x338   : > { %1962 = vadd.xlane.f32.xlu1 %v1961_v52  ;;  %v5677_v52 = vpop.permute.xlu1 %1509  ;;  %v5692_v43 = vpop.f32.mrf.mxu2  ;;  %v1685_v3 = vadd.f32 %v1621_v5, %v1300_v62  ;;  %v3864_v27 = vor.u32 %v4038_v47, %v3861_v35  ;;  %v1624_v61 = vmul.f32 %v5391_v58, %v5511_v41  ;;  %v1876_v60 = vmul.f32 %v5443_v4, %v1811_v50  ;;  %v4019_v41 = vld [vmem:[%s4748_s15 + $0xf4] sm:$0xf0] }
 0x339   : > { %7142 = vst [vmem:[#allocation75_spill] sm:$0xff] %v5692_v43  ;;  %v5705_v44 = vpop.permute.xlu0 %1525  ;;  %v1684_v2 = vadd.f32 %v1620_v22, %v1299_v30  ;;  %v1810_v12 = vmax.f32 %v1746_v8, 0.0  ;;  %v5721_v62 = vperm.slane %v5388_v34, 3  ;;  %v1622_v59 = vmul.f32 %v5391_v58, %v5463_v45 }
 0x33a   : > { %v1874_v22 = vmul.f32 %v5443_v4, %v1809_v55  ;;  %v1302_v8 = vmul.f32 %v5400_v13, %v5136_v14  ;;  %v1303_v34 = vmul.f32 %v5400_v13, %v5143_v57  ;;  %v1623_v50 = vmul.f32 %v5391_v58, %v5493_v25 }
 0x33b   : > { %v1991_v55 = vsel %vm1915_vm6, %v1876_v60, 0.0 }
 0x33c   : > { %1974 = vadd.xlane.f32.xlu0 %v1973_v15  ;;  %v5700_v15 = vpop.permute.xlu2 %1517  ;;  %v1985_v57 = vsel %vm1915_vm6, %v1874_v22, 0.0  ;;  %v1687_v25 = vadd.f32 %v1623_v50, %v1302_v8  ;;  %v3867_v8 = vld [vmem:[%s4748_s15 + $0x1a0] sm:$0xf] }
 0x33d   : > { %1968 = vadd.xlane.f32.xlu2 %v1967_v56  ;;  %v1683_v56 = vadd.f32 %v1619_v10, %v1298_v31  ;;  %v5712_v5 = vpop.f32.mrf.mxu1  ;;  %v1750_v10 = vadd.f32 %v5414_v26, %v1685_v3 }
 0x33e   : > { %v1752_v50 = vadd.f32 %v5414_v26, %v1687_v25  ;;  %v4040_v25 = vld [vmem:[%s4748_s15 + $0x1a4] sm:$0xf] }
 0x33f   : > { %2779 = vmatmul.bf16.gmra.mxu2 %v3860_v38  ;;  %v1748_v1 = vadd.f32 %v5414_v26, %v1683_v56  ;;  %v1301_v38 = vmul.f32 %v5400_v13, %v5101_v18  ;;  %v3780_v56 = vor.u32 %v4019_v41, %v3779_v24  ;;  %v1875_v18 = vmul.f32 %v5443_v4, %v1810_v12 }
 0x340   : > { %1971 = vadd.xlane.f32.xlu1 %v1970_v0  ;;  %v5708_v0 = vpop.f32.mrf.mxu0  ;;  %v5725_v31 = vpop.permute.xlu1 %1521  ;;  %3978 = vmatmul.msk.bf16.gmra.mxu3 %vm2545_vm5, %v3864_v27  ;;  %v1814_v47 = vmax.f32 %v1750_v10, 0.0  ;;  %v1627_v12 = vmul.f32 %v5391_v58, %v5553_v7  ;;  %v1625_v41 = vmul.f32 %v5391_v58, %v5501_v29  ;;  %v1306_v7 = vmul.f32 %v5400_v13, %v5155_v63 }
 0x341   : > { %v2740_v3 = vpop.f32.mrf.mxu2  ;;  %v1686_v14 = vadd.f32 %v1622_v59, %v1301_v38  ;;  %v1812_v35 = vmax.f32 %v1748_v1, 0.0  ;;  %v5748_v27 = vpop.permute.xlu0 %1537  ;;  %v1988_v1 = vsel %vm1915_vm6, %v1875_v18, 0.0 }
 0x342   : > { %v2741_v30 = vadd.f32 %v2740_v3, %v5721_v62  ;;  %v1879_v59 = vmul.f32 %v5443_v4, %v1814_v47  ;;  %v1304_v3 = vmul.f32 %v5400_v13, %v5119_v16  ;;  %v1691_v16 = vadd.f32 %v1627_v12, %v1306_v7 }
 0x343   : > { %v2909_v45 = vpop.f32.mrf.mxu3  ;;  %v1751_v24 = vadd.f32 %v5414_v26, %v1686_v14  ;;  %v1877_v38 = vmul.f32 %v5443_v4, %v1812_v35 }
 0x344   : > { %1983 = vadd.xlane.f32.xlu0 %v1982_v46  ;;  %v1749_v46 = vadd.f32 %v5414_v26, %v1684_v2  ;;  %v5746_v2 = vpop.permute.xlu2 %1529  ;;  %v2000_v18 = vsel %vm1915_vm6, %v1879_v59, 0.0  ;;  %v1689_v47 = vadd.f32 %v1625_v41, %v1304_v3  ;;  %v1630_v41 = vmul.f32 %v5391_v58, %v5600_v54 }
 0x345   : > { %1977 = vadd.xlane.f32.xlu2 %v1976_v42  ;;  %v1688_v42 = vadd.f32 %v1624_v61, %v1303_v34  ;;  %v5757_v22 = vpop.f32.mrf.mxu1  ;;  %v4041_v34 = vld [vmem:[%s4748_s15 + $0x1a4] sm:$0xf0]  ;;  %v1994_v14 = vsel %vm1915_vm6, %v1877_v38, 0.0  ;;  %v1307_v54 = vmul.f32 %v5400_v13, %v5134_v23 }
 0x346   : > { %2729 = vmatmul.bf16.gmra.mxu0 %v3780_v56  ;;  %v1813_v61 = vmax.f32 %v1749_v46, 0.0 }
 0x347   : > { %v1753_v10 = vadd.f32 %v5414_v26, %v1688_v42  ;;  %v3868_v42 = vor.u32 %v4041_v34, %v3867_v8  ;;  %v1754_v34 = vadd.f32 %v5414_v26, %v1689_v47 }
 0x348   : > { %1980 = vadd.xlane.f32.xlu1 %v1979_v17  ;;  %v5744_v17 = vadd.f32 %v2909_v45, %v2741_v30  ;;  %v5750_v60 = vpop.f32.mrf.mxu0  ;;  %v5770_v30 = vpop.permute.xlu1 %1533  ;;  %v1878_v29 = vmul.f32 %v5443_v4, %v1813_v61  ;;  %v1305_v61 = vmul.f32 %v5400_v13, %v5150_v53  ;;  %v1628_v53 = vmul.f32 %v5391_v58, %v5540_v37 }
 0x349   : > { %v2742_v45 = vpop.f32.mrf.mxu2  ;;  %v1817_v63 = vmax.f32 %v1753_v10, 0.0  ;;  %v1756_v10 = vadd.f32 %v5414_v26, %v1691_v16  ;;  %v5794_v3 = vpop.permute.xlu0 %1549  ;;  %v1629_v16 = vmul.f32 %v5391_v58, %v5574_v49 }
 0x34a   : > { %7144 = vst [vmem:[#allocation67_spill] sm:$0xff] %v5744_v17  ;;  %v2743_v56 = vadd.f32 %v2742_v45, %v5721_v62  ;;  %v1997_v8 = vsel %vm1915_vm6, %v1878_v29, 0.0  ;;  %v4042_v17 = vld [vmem:[%s4748_s15 + $0x1b4] sm:$0xf] }
 0x34b   : > { %v2911_v46 = vpop.f32.mrf.mxu3  ;;  %v1882_v38 = vmul.f32 %v5443_v4, %v1817_v63 }
 0x34c   : > { %1992 = vadd.xlane.f32.xlu0 %v1991_v55  ;;  %v1626_v55 = vmul.f32 %v5391_v58, %v5534_v20  ;;  %v5778_v35 = vadd.f32 %v2911_v46, %v2743_v56  ;;  %v1816_v20 = vmax.f32 %v1752_v50, 0.0  ;;  %v7146_v46 = vld [vmem:[#allocation103_spill] sm:$0xff] }
 0x34d   : > { %1986 = vadd.xlane.f32.xlu2 %v1985_v57  ;;  %v1815_v57 = vmax.f32 %v1751_v24, 0.0  ;;  %v5788_v24 = vpop.permute.xlu2 %1541  ;;  %v1309_v50 = vmul.f32 %v5400_v13, %v7146_v46  ;;  %v4043_v46 = vld [vmem:[%s4748_s15 + $0x1b4] sm:$0xf0] }
 0x34e   : > { %7145 = vst [vmem:[#allocation74_spill] sm:$0xff] %v5778_v35  ;;  %v1690_v59 = vadd.f32 %v1626_v55, %v1305_v61  ;;  %v5806_v55 = vpop.f32.mrf.mxu1 }
 0x34f   : > { %2784 = vmatmul.bf16.gmra.mxu2 %v3868_v42  ;;  %v1880_v7 = vmul.f32 %v5443_v4, %v1815_v57  ;;  %v7147_v42 = vld [vmem:[#allocation102_spill] sm:$0xff]  ;;  %v1694_v23 = vadd.f32 %v1630_v41, %v1309_v50  ;;  %v1820_v57 = vmax.f32 %v1756_v10, 0.0  ;;  %v1633_v10 = vmul.f32 %v5391_v58, %v5638_v19  ;;  %v7149_v50 = vld [vmem:[#allocation99_spill] sm:$0xff] }
 0x350   : > { %1989 = vadd.xlane.f32.xlu1 %v1988_v1  ;;  %v3869_v1 = vld [vmem:[%s4748_s15 + $0x1a8] sm:$0xf0]  ;;  %v5797_v45 = vpop.f32.mrf.mxu0  ;;  %v1308_v37 = vmul.f32 %v5400_v13, %v7147_v42  ;;  %v1755_v47 = vadd.f32 %v5414_v26, %v1690_v59 }
 0x351   : > { %v3872_v12 = vor.u32 %v4040_v25, %v3869_v1  ;;  %v2745_v29 = vpop.f32.mrf.mxu2  ;;  %v1692_v25 = vadd.f32 %v1628_v53, %v1307_v54  ;;  %v5814_v1 = vpop.permute.xlu1 %1545  ;;  %v2003_v61 = vsel %vm1915_vm6, %v1880_v7, 0.0  ;;  %v1759_v59 = vadd.f32 %v5414_v26, %v1694_v23  ;;  %v3875_v54 = vld [vmem:[%s4748_s15 + $0x1b0] sm:$0xf]  ;;  %v7151_v19 = vld [vmem:[#allocation107_spill] sm:$0xff] }
 0x352   : > { %v2746_v63 = vadd.f32 %v2745_v29, %v5721_v62  ;;  %v1885_v41 = vmul.f32 %v5443_v4, %v1820_v57  ;;  %v1631_v7 = vmul.f32 %v5391_v58, %v5576_v51  ;;  %v1310_v29 = vmul.f32 %v5400_v13, %v7149_v50 }
 0x353   : > { %3979 = vmatmul.msk.bf16.gmra.mxu3 %vm2545_vm5, %v3872_v12  ;;  %v2914_v56 = vpop.f32.mrf.mxu3  ;;  %v1757_v53 = vadd.f32 %v5414_v26, %v1692_v25  ;;  %v1632_v51 = vmul.f32 %v5391_v58, %v5612_v36  ;;  %v3876_v57 = vor.u32 %v4043_v46, %v3875_v54 }
 0x354   : > { %2001 = vadd.xlane.f32.xlu0 %v2000_v18  ;;  %v1881_v18 = vmul.f32 %v5443_v4, %v1816_v20  ;;  %v5817_v49 = vadd.f32 %v2914_v56, %v2746_v63  ;;  %v1693_v20 = vadd.f32 %v1629_v16, %v1308_v37  ;;  %v7150_v56 = vld [vmem:[#allocation106_spill] sm:$0xff]  ;;  %v1312_v37 = vmul.f32 %v5400_v13, %v7151_v19 }
 0x355   : > { %1995 = vadd.xlane.f32.xlu2 %v1994_v14  ;;  %v2009_v14 = vsel %vm1915_vm6, %v1882_v38, 0.0  ;;  %v1819_v38 = vmax.f32 %v1755_v47, 0.0  ;;  %v1311_v42 = vmul.f32 %v5400_v13, %v7150_v56  ;;  %v5839_v47 = vpop.permute.xlu2 %1553  ;;  %v1695_v36 = vadd.f32 %v1631_v7, %v1310_v29 }
 0x356   : > { %7148 = vst [vmem:[#allocation70_spill] sm:$0xff] %v5817_v49  ;;  %v2006_v12 = vsel %vm1915_vm6, %v1881_v18, 0.0  ;;  %v1758_v63 = vadd.f32 %v5414_v26, %v1693_v20  ;;  %v1697_v25 = vadd.f32 %v1633_v10, %v1312_v37  ;;  %v1823_v20 = vmax.f32 %v1759_v59, 0.0  ;;  %v5848_v50 = vpop.f32.mrf.mxu1 }
 0x357   : > { %v1821_v19 = vmax.f32 %v1757_v53, 0.0  ;;  %v1696_v54 = vadd.f32 %v1632_v51, %v1311_v42  ;;  %v1634_v29 = vmul.f32 %v5391_v58, %v5618_v6  ;;  %v7153_v42 = vld [vmem:[#allocation111_spill] sm:$0xff]  ;;  %v1635_v6 = vmul.f32 %v5391_v58, %v5657_v9 }
 0x358   : > { %1998 = vadd.xlane.f32.xlu1 %v1997_v8  ;;  %v1818_v8 = vmax.f32 %v1754_v34, 0.0  ;;  %v5841_v23 = vpop.f32.mrf.mxu0  ;;  %v1762_v59 = vadd.f32 %v5414_v26, %v1697_v25  ;;  %v1888_v53 = vmul.f32 %v5443_v4, %v1823_v20  ;;  %v1315_v37 = vmul.f32 %v5400_v13, %v7153_v42 }
 0x359   : > { %v2747_v16 = vpop.f32.mrf.mxu2  ;;  %v5855_v46 = vpop.permute.xlu1 %1557 }
 0x35a   : > { %v1883_v34 = vmul.f32 %v5443_v4, %v1818_v8  ;;  %v2018_v8 = vsel %vm1915_vm6, %v1885_v41, 0.0  ;;  %v1822_v41 = vmax.f32 %v1758_v63, 0.0  ;;  %v1826_v20 = vmax.f32 %v1762_v59, 0.0 }
 0x35b   : > { %v2916_v18 = vpop.f32.mrf.mxu3 }
 0x35c   : > { %2010 = vadd.xlane.f32.xlu0 %v2009_v14  ;;  %v2748_v14 = vadd.f32 %v2747_v16, %v5721_v62  ;;  %v2012_v56 = vsel %vm1915_vm6, %v1883_v34, 0.0  ;;  %v3877_v16 = vld [vmem:[%s4748_s15 + $0x1b8] sm:$0xf0]  ;;  %v1760_v34 = vadd.f32 %v5414_v26, %v1695_v36 }
 0x35d   : > { %2004 = vadd.xlane.f32.xlu2 %v2003_v61  ;;  %v5844_v61 = vpop.permute.xlu0 %1561  ;;  %v3880_v10 = vor.u32 %v4042_v17, %v3877_v16  ;;  %v1886_v17 = vmul.f32 %v5443_v4, %v1821_v19 }
 0x35e   : > { %v5851_v35 = vadd.f32 %v2916_v18, %v2748_v14  ;;  %v1761_v14 = vadd.f32 %v5414_v26, %v1696_v54  ;;  %v1824_v16 = vmax.f32 %v1760_v34, 0.0  ;;  %v5888_v9 = vpop.f32.mrf.mxu1 }
 0x35f   : > { %2789 = vmatmul.bf16.gmra.mxu2 %v3876_v57  ;;  %v1887_v57 = vmul.f32 %v5443_v4, %v1822_v41  ;;  %v2021_v19 = vsel %vm1915_vm6, %v1886_v17, 0.0  ;;  %v7156_v41 = vld [vmem:[#allocation110_spill] sm:$0xff]  ;;  %v1891_v17 = vmul.f32 %v5443_v4, %v1826_v20 }
 0x360   : > { %2007 = vadd.xlane.f32.xlu1 %v2006_v12  ;;  %v1884_v12 = vmul.f32 %v5443_v4, %v1819_v38  ;;  %7152 = vst [vmem:[#allocation79_spill] sm:$0xff] %v5851_v35  ;;  %v1636_v38 = vmul.f32 %v5391_v58, %v5677_v52  ;;  %v7154_v52 = vld [vmem:[#allocation101_spill] sm:$0xff]  ;;  %v3883_v20 = vld [vmem:[%s4748_s15 + $0x1c0] sm:$0xf] }
 0x361   : > { %v2750_v18 = vpop.f32.mrf.mxu2  ;;  %v1313_v51 = vmul.f32 %v5400_v13, %v7154_v52  ;;  %v2024_v59 = vsel %vm1915_vm6, %v1887_v57, 0.0  ;;  %v1889_v52 = vmul.f32 %v5443_v4, %v1824_v16  ;;  %v7158_v57 = vld [vmem:[#allocation113_spill] sm:$0xff] }
 0x362   : > { %v2015_v7 = vsel %vm1915_vm6, %v1884_v12, 0.0  ;;  %v2751_v25 = vadd.f32 %v2750_v18, %v5721_v62  ;;  %v2027_v12 = vsel %vm1915_vm6, %v1888_v53, 0.0  ;;  %v1637_v18 = vmul.f32 %v5391_v58, %v5664_v48  ;;  %v4045_v48 = vld [vmem:[%s4748_s15 + $0x1c4] sm:$0xf0] }
 0x363   : > { %3980 = vmatmul.msk.bf16.gmra.mxu3 %vm2545_vm5, %v3880_v10  ;;  %v2919_v63 = vpop.f32.mrf.mxu3  ;;  %v1698_v36 = vadd.f32 %v1634_v29, %v1313_v51  ;;  %v5880_v10 = vpop.f32.mrf.mxu0  ;;  %v1639_v29 = vmul.f32 %v5391_v58, %v5725_v31  ;;  %v7157_v51 = vld [vmem:[#allocation105_spill] sm:$0xff] }
 0x364   : > { %2019 = vadd.xlane.f32.xlu0 %v2018_v8  ;;  %v1700_v8 = vadd.f32 %v1636_v38, %v1315_v37  ;;  %v5882_v54 = vadd.f32 %v2919_v63, %v2751_v25  ;;  %v1825_v38 = vmax.f32 %v1761_v14, 0.0  ;;  %v5898_v63 = vpop.permute.xlu1 %1569  ;;  %v1316_v14 = vmul.f32 %v5400_v13, %v7157_v51 }
 0x365   : > { %2013 = vadd.xlane.f32.xlu2 %v2012_v56  ;;  %v5877_v56 = vpop.permute.xlu2 %1565  ;;  %v5886_v42 = vpop.permute.xlu0 %1573  ;;  %v1763_v37 = vadd.f32 %v5414_v26, %v1698_v36  ;;  %v1317_v25 = vmul.f32 %v5400_v13, %v7158_v57  ;;  %v1638_v36 = vmul.f32 %v5391_v58, %v5700_v15  ;;  %v2036_v51 = vsel %vm1915_vm6, %v1891_v17, 0.0  ;;  %v3885_v15 = vld [vmem:[%s4748_s15 + $0x1c8] sm:$0xf0] }
 0x366   : > { %7155 = vst [vmem:[#allocation77_spill] sm:$0xff] %v5882_v54  ;;  %v1765_v34 = vadd.f32 %v5414_v26, %v1700_v8  ;;  %v2030_v54 = vsel %vm1915_vm6, %v1889_v52, 0.0  ;;  %v1642_v17 = vmul.f32 %v5391_v58, %v5770_v30 }
 0x367   : > { %v1827_v35 = vmax.f32 %v1763_v37, 0.0  ;;  %v1702_v43 = vadd.f32 %v1638_v36, %v1317_v25 }
 0x368   : > { %2016 = vadd.xlane.f32.xlu1 %v2015_v7  ;;  %v1314_v7 = vmul.f32 %v5400_v13, %v7156_v41  ;;  %v3884_v41 = vor.u32 %v4045_v48, %v3883_v20  ;;  %v1829_v57 = vmax.f32 %v1765_v34, 0.0 }
 0x369   : > { %v2752_v8 = vpop.f32.mrf.mxu2  ;;  %v1892_v25 = vmul.f32 %v5443_v4, %v1827_v35 }
 0x36a   : > { %v1699_v53 = vadd.f32 %v1635_v6, %v1314_v7  ;;  %v7159_v6 = vld [vmem:[#allocation115_spill] sm:$0xff]  ;;  %v2753_v16 = vadd.f32 %v2752_v8, %v5721_v62 }
 0x36b   : > { %v1318_v31 = vmul.f32 %v5400_v13, %v7159_v6  ;;  %v1701_v6 = vadd.f32 %v1637_v18, %v1316_v14  ;;  %v1894_v18 = vmul.f32 %v5443_v4, %v1829_v57  ;;  %v1640_v14 = vmul.f32 %v5391_v58, %v5705_v44 }
 0x36c   : > { %2028 = vadd.xlane.f32.xlu0 %v2027_v12  ;;  %v2921_v12 = vpop.f32.mrf.mxu3  ;;  %v1764_v7 = vadd.f32 %v5414_v26, %v1699_v53  ;;  %v1641_v44 = vmul.f32 %v5391_v58, %v5746_v2 }
 0x36d   : > { %2022 = vadd.xlane.f32.xlu2 %v2021_v19  ;;  %v1890_v19 = vmul.f32 %v5443_v4, %v1825_v38  ;;  %v5916_v49 = vadd.f32 %v2921_v12, %v2753_v16  ;;  %v3888_v38 = vor.u32 %v4044_v21, %v3885_v15  ;;  %v5920_v8 = vpop.permute.xlu2 %1577  ;;  %v5928_v37 = vpop.permute.xlu0 %1585  ;;  %v1766_v21 = vadd.f32 %v5414_v26, %v1701_v6  ;;  %v7162_v12 = vld [vmem:[#allocation119_spill] sm:$0xff] }
 0x36e   : > { %v1828_v52 = vmax.f32 %v1764_v7, 0.0  ;;  %v1321_v20 = vmul.f32 %v5400_v13, %v7162_v12  ;;  %v2045_v57 = vsel %vm1915_vm6, %v1894_v18, 0.0 }
 0x36f   : > { %7160 = vst [vmem:[#allocation85_spill] sm:$0xff] %v5916_v49  ;;  %v2033_v53 = vsel %vm1915_vm6, %v1890_v19, 0.0  ;;  %2794 = vmatmul.bf16.gmra.mxu2 %v3884_v41  ;;  %v7163_v19 = vld [vmem:[#allocation117_spill] sm:$0xff]  ;;  %v1767_v41 = vadd.f32 %v5414_v26, %v1702_v43 }
 0x370   : > { %2025 = vadd.xlane.f32.xlu1 %v2024_v59  ;;  %v1703_v59 = vadd.f32 %v1639_v29, %v1318_v31  ;;  %v5923_v29 = vpop.f32.mrf.mxu0  ;;  %v7161_v31 = vld [vmem:[#allocation109_spill] sm:$0xff]  ;;  %v1320_v16 = vmul.f32 %v5400_v13, %v7163_v19  ;;  %v1893_v6 = vmul.f32 %v5443_v4, %v1828_v52 }
 0x371   : > { %v1319_v30 = vmul.f32 %v5400_v13, %v7161_v31  ;;  %v2755_v48 = vpop.f32.mrf.mxu2  ;;  %v1831_v43 = vmax.f32 %v1767_v41, 0.0  ;;  %v3893_v49 = vld [vmem:[%s4748_s15 + $0x1d8] sm:$0xf0] }
 0x372   : > { %v1768_v34 = vadd.f32 %v5414_v26, %v1703_v59  ;;  %v2756_v35 = vadd.f32 %v2755_v48, %v5721_v62  ;;  %v1706_v59 = vadd.f32 %v1642_v17, %v1321_v20  ;;  %v1705_v2 = vadd.f32 %v1641_v44, %v1320_v16  ;;  %v7166_v48 = vld [vmem:[#allocation112_spill] sm:$0xff] }
 0x373   : > { %3981 = vmatmul.msk.bf16.gmra.mxu3 %vm2545_vm5, %v3888_v38  ;;  %v1704_v15 = vadd.f32 %v1640_v14, %v1319_v30  ;;  %v2039_v38 = vsel %vm1915_vm6, %v1892_v25, 0.0  ;;  %v1645_v17 = vmul.f32 %v5391_v58, %v5814_v1  ;;  %v2042_v52 = vsel %vm1915_vm6, %v1893_v6, 0.0  ;;  %v3891_v44 = vld [vmem:[%s4748_s15 + $0x1d0] sm:$0xf] }
 0x374   : > { %2037 = vadd.xlane.f32.xlu0 %v2036_v51  ;;  %v2924_v36 = vpop.f32.mrf.mxu3  ;;  %v1832_v7 = vmax.f32 %v1768_v34, 0.0  ;;  %v5948_v51 = vpop.permute.xlu1 %1581  ;;  %v1771_v34 = vadd.f32 %v5414_v26, %v1706_v59  ;;  %v1643_v25 = vmul.f32 %v5391_v58, %v5748_v27  ;;  %v1322_v1 = vmul.f32 %v5400_v13, %v7166_v48 }
 0x375   : > { %2031 = vadd.xlane.f32.xlu2 %v2030_v54  ;;  %v5931_v54 = vpop.f32.mrf.mxu1  ;;  %v5953_v31 = vadd.f32 %v2924_v36, %v2756_v35  ;;  %v5965_v30 = vpop.permute.xlu2 %1589  ;;  %v7167_v36 = vld [vmem:[#allocation122_spill] sm:$0xff]  ;;  %v4047_v35 = vld [vmem:[%s4748_s15 + $0x1d4] sm:$0xf0]  ;;  %v1770_v27 = vadd.f32 %v5414_v26, %v1705_v2  ;;  %v1896_v59 = vmul.f32 %v5443_v4, %v1831_v43  ;;  %v4046_v43 = vld [vmem:[%s4748_s15 + $0x1d4] sm:$0xf] }
 0x376   : > { %v1897_v14 = vmul.f32 %v5443_v4, %v1832_v7  ;;  %v1324_v19 = vmul.f32 %v5400_v13, %v7167_v36  ;;  %v3892_v6 = vor.u32 %v4047_v35, %v3891_v44  ;;  %v7171_v35 = vld [vmem:[#allocation116_spill] sm:$0xff] }
 0x377   : > { %7164 = vst [vmem:[#allocation73_spill] sm:$0xff] %v5953_v31 }
 0x378   : > { %2034 = vadd.xlane.f32.xlu1 %v2033_v53  ;;  %v1830_v53 = vmax.f32 %v1766_v21, 0.0  ;;  %v1769_v21 = vadd.f32 %v5414_v26, %v1704_v15  ;;  %v5968_v20 = vpop.f32.mrf.mxu0  ;;  %v1644_v15 = vmul.f32 %v5391_v58, %v5788_v24  ;;  %v3896_v24 = vor.u32 %v4046_v43, %v3893_v49 }
 0x379   : > { %v2757_v16 = vpop.f32.mrf.mxu2 }
 0x37a   : > { %v1895_v12 = vmul.f32 %v5443_v4, %v1830_v53  ;;  %v1709_v53 = vadd.f32 %v1645_v17, %v1324_v19  ;;  %v1833_v36 = vmax.f32 %v1769_v21, 0.0  ;;  %v2051_v17 = vsel %vm1915_vm6, %v1896_v59, 0.0 }
 0x37c   : > { %2046 = vadd.xlane.f32.xlu0 %v2045_v57  ;;  %v2926_v41 = vpop.f32.mrf.mxu3  ;;  %v2758_v57 = vadd.f32 %v2757_v16, %v5721_v62  ;;  %v2048_v31 = vsel %vm1915_vm6, %v1895_v12, 0.0  ;;  %v7168_v16 = vld [vmem:[#allocation121_spill] sm:$0xff]  ;;  %v1774_v21 = vadd.f32 %v5414_v26, %v1709_v53 }
 0x37d   : > { %2040 = vadd.xlane.f32.xlu2 %v2039_v38  ;;  %v5976_v7 = vpop.f32.mrf.mxu1  ;;  %v1835_v38 = vmax.f32 %v1771_v34, 0.0  ;;  %v1323_v44 = vmul.f32 %v5400_v13, %v7168_v16  ;;  %v1834_v34 = vmax.f32 %v1770_v27, 0.0  ;;  %v1325_v27 = vmul.f32 %v5400_v13, %v7171_v35 }
 0x37e   : > { %v5987_v2 = vadd.f32 %v2926_v41, %v2758_v57  ;;  %v1898_v41 = vmul.f32 %v5443_v4, %v1833_v36  ;;  %v1838_v43 = vmax.f32 %v1774_v21, 0.0 }
 0x37f   : > { %v5958_v18 = vpop.xlane.xlu0 %1920  ;;  %2799 = vmatmul.bf16.gmra.mxu2 %v3892_v6 }
 0x380   : > { %7165 = vst [vmem:[#allocation82_spill] sm:$0xff] %v5958_v18  ;;  %2043 = vadd.xlane.f32.xlu1 %v2042_v52  ;;  %v2054_v52 = vsel %vm1915_vm6, %v1897_v14, 0.0  ;;  %v1707_v18 = vadd.f32 %v1643_v25, %v1322_v1  ;;  %v1708_v14 = vadd.f32 %v1644_v15, %v1323_v44  ;;  %v1648_v25 = vmul.f32 %v5391_v58, %v5855_v46  ;;  %v7172_v46 = vld [vmem:[#allocation126_spill] sm:$0xff]  ;;  %v7173_v15 = vld [vmem:[#allocation124_spill] sm:$0xff]  ;;  %v6016_v53 = vpop.f32.mrf.mxu0 }
 0x381   : > { %v1900_v1 = vmul.f32 %v5443_v4, %v1835_v38  ;;  %v1327_v59 = vmul.f32 %v5400_v13, %v7172_v46  ;;  %v2760_v57 = vpop.f32.mrf.mxu2  ;;  %v1899_v38 = vmul.f32 %v5443_v4, %v1834_v34 }
 0x382   : > { %v1772_v19 = vadd.f32 %v5414_v26, %v1707_v18  ;;  %v1326_v18 = vmul.f32 %v5400_v13, %v7173_v15  ;;  %v1773_v36 = vadd.f32 %v5414_v26, %v1708_v14 }
 0x383   : > { %v5984_v48 = vpop.xlane.xlu1 %1917  ;;  %3982 = vmatmul.msk.bf16.gmra.mxu3 %vm2545_vm5, %v3896_v24  ;;  %v1712_v16 = vadd.f32 %v1648_v25, %v1327_v59  ;;  %v2063_v44 = vsel %vm1915_vm6, %v1900_v1, 0.0  ;;  %v1651_v25 = vmul.f32 %v5391_v58, %v5898_v63 }
 0x384   : > { %2055 = vadd.xlane.f32.xlu0 %v2054_v52  ;;  %v2929_v6 = vpop.f32.mrf.mxu3  ;;  %v2761_v52 = vadd.f32 %v2760_v57, %v5721_v62  ;;  %v1836_v35 = vmax.f32 %v1772_v19, 0.0  ;;  %v2060_v57 = vsel %vm1915_vm6, %v1899_v38, 0.0  ;;  %v1837_v14 = vmax.f32 %v1773_v36, 0.0  ;;  %v7179_v38 = vld [vmem:[#allocation130_spill] sm:$0xff] }
 0x385   : > { %2049 = vadd.xlane.f32.xlu2 %v2048_v31  ;;  %v1646_v31 = vmul.f32 %v5391_v58, %v5794_v3  ;;  %v1647_v3 = vmul.f32 %v5391_v58, %v5839_v47  ;;  %v2057_v47 = vsel %vm1915_vm6, %v1898_v41, 0.0  ;;  %v1777_v21 = vadd.f32 %v5414_v26, %v1712_v16  ;;  %v3899_v16 = vld [vmem:[%s4748_s15 + $0x1e0] sm:$0xf] }
 0x386   : > { %v6026_v34 = vadd.f32 %v2929_v6, %v2761_v52  ;;  %v1903_v19 = vmul.f32 %v5443_v4, %v1838_v43  ;;  %v1649_v41 = vmul.f32 %v5391_v58, %v5844_v61  ;;  %v1901_v59 = vmul.f32 %v5443_v4, %v1836_v35  ;;  %v7177_v6 = vld [vmem:[#allocation120_spill] sm:$0xff] }
 0x387   : > { %v5997_v12 = vpop.xlane.xlu0 %1929  ;;  %v1710_v46 = vadd.f32 %v1646_v31, %v1325_v27  ;;  %v1711_v15 = vadd.f32 %v1647_v3, %v1326_v18  ;;  %v1328_v18 = vmul.f32 %v5400_v13, %v7177_v6  ;;  %v7178_v3 = vld [vmem:[#allocation128_spill] sm:$0xff]  ;;  %v1330_v52 = vmul.f32 %v5400_v13, %v7179_v38 }
 0x388   : > { %7169 = vst [vmem:[#allocation91_spill] sm:$0xff] %v5997_v12  ;;  %v6003_v49 = vpop.xlane.xlu2 %1923  ;;  %2052 = vadd.xlane.f32.xlu1 %v2051_v17  ;;  %v6023_v17 = vpop.f32.mrf.mxu1  ;;  %v1329_v63 = vmul.f32 %v5400_v13, %v7178_v3  ;;  %v1650_v35 = vmul.f32 %v5391_v58, %v5877_v56  ;;  %v2072_v3 = vsel %vm1915_vm6, %v1903_v19, 0.0  ;;  %v1902_v38 = vmul.f32 %v5443_v4, %v1837_v14  ;;  %v4048_v56 = vld [vmem:[%s4748_s15 + $0x1e4] sm:$0xf] }
 0x389   : > { %7170 = vst [vmem:[#allocation76_spill] sm:$0xff] %v6003_v49  ;;  %v1775_v31 = vadd.f32 %v5414_v26, %v1710_v46  ;;  %v2762_v36 = vpop.f32.mrf.mxu2  ;;  %v1776_v61 = vadd.f32 %v5414_v26, %v1711_v15  ;;  %v1715_v6 = vadd.f32 %v1651_v25, %v1330_v52  ;;  %v1713_v12 = vadd.f32 %v1649_v41, %v1328_v18  ;;  %v6058_v49 = vpop.f32.mrf.mxu0 }
 0x38a   : > { %v2763_v46 = vadd.f32 %v2762_v36, %v5721_v62  ;;  %v2066_v15 = vsel %vm1915_vm6, %v1901_v59, 0.0  ;;  %v3901_v36 = vld [vmem:[%s4748_s15 + $0x1e8] sm:$0xf0]  ;;  %v1714_v52 = vadd.f32 %v1650_v35, %v1329_v63  ;;  %v2069_v59 = vsel %vm1915_vm6, %v1902_v38, 0.0 }
 0x38b   : > { %v6021_v24 = vpop.xlane.xlu1 %1926  ;;  %v1840_v19 = vmax.f32 %v1776_v61, 0.0  ;;  %v1780_v14 = vadd.f32 %v5414_v26, %v1715_v6  ;;  %v7182_v61 = vld [vmem:[#allocation133_spill] sm:$0xff] }
 0x38c   : > { %7174 = vst [vmem:[#allocation88_spill] sm:$0xff] %v6021_v24  ;;  %2064 = vadd.xlane.f32.xlu0 %v2063_v44  ;;  %v2931_v43 = vpop.f32.mrf.mxu3  ;;  %v4049_v44 = vld [vmem:[%s4748_s15 + $0x1e4] sm:$0xf0] }
 0x38d   : > { %2058 = vadd.xlane.f32.xlu2 %v2057_v47  ;;  %v3900_v47 = vor.u32 %v4049_v44, %v3899_v16  ;;  %v6060_v24 = vadd.f32 %v2931_v43, %v2763_v46  ;;  %v1778_v43 = vadd.f32 %v5414_v26, %v1713_v12  ;;  %v1652_v16 = vmul.f32 %v5391_v58, %v5886_v42 }
 0x38e   : > { %v1779_v12 = vadd.f32 %v5414_v26, %v1714_v52  ;;  %v1905_v6 = vmul.f32 %v5443_v4, %v1840_v19  ;;  %v7184_v52 = vld [vmem:[#allocation131_spill] sm:$0xff] }
 0x38f   : > { %v6032_v1 = vpop.xlane.xlu0 %1938  ;;  %2804 = vmatmul.bf16.gmra.mxu2 %v3900_v47  ;;  %v7183_v47 = vld [vmem:[#allocation125_spill] sm:$0xff]  ;;  %v1332_v19 = vmul.f32 %v5400_v13, %v7184_v52 }
 0x390   : > { %7175 = vst [vmem:[#allocation95_spill] sm:$0xff] %v6032_v1  ;;  %2061 = vadd.xlane.f32.xlu1 %v2060_v57  ;;  %v6038_v27 = vpop.xlane.xlu2 %1932  ;;  %v1841_v57 = vmax.f32 %v1777_v21, 0.0  ;;  %v3904_v21 = vor.u32 %v4048_v56, %v3901_v36  ;;  %v6064_v25 = vpop.f32.mrf.mxu1  ;;  %v1842_v36 = vmax.f32 %v1778_v43, 0.0  ;;  %v2078_v43 = vsel %vm1915_vm6, %v1905_v6, 0.0  ;;  %v3907_v6 = vld [vmem:[%s4748_s15 + $0x1f0] sm:$0xf] }
 0x391   : > { %7176 = vst [vmem:[#allocation80_spill] sm:$0xff] %v6038_v27  ;;  %v1839_v27 = vmax.f32 %v1775_v31, 0.0  ;;  %v1654_v31 = vmul.f32 %v5391_v58, %v5948_v51  ;;  %v1333_v51 = vmul.f32 %v5400_v13, %v7182_v61  ;;  %v2765_v35 = vpop.f32.mrf.mxu2 }
 0x392   : > { %v1906_v18 = vmul.f32 %v5443_v4, %v1841_v57  ;;  %v1331_v57 = vmul.f32 %v5400_v13, %v7183_v47  ;;  %v2766_v42 = vadd.f32 %v2765_v35, %v5721_v62  ;;  %v1843_v35 = vmax.f32 %v1779_v12, 0.0  ;;  %v7187_v12 = vld [vmem:[#allocation129_spill] sm:$0xff] }
 0x393   : > { %v6054_v1 = vpop.xlane.xlu1 %1935  ;;  %v1904_v63 = vmul.f32 %v5443_v4, %v1839_v27  ;;  %3983 = vmatmul.msk.bf16.gmra.mxu3 %vm2545_vm5, %v3904_v21  ;;  %v1844_v27 = vmax.f32 %v1780_v14, 0.0  ;;  %v1718_v38 = vadd.f32 %v1654_v31, %v1333_v51 }
 0x394   : > { %2073 = vadd.xlane.f32.xlu0 %v2072_v3  ;;  %v2934_v46 = vpop.f32.mrf.mxu3  ;;  %v1653_v3 = vmul.f32 %v5391_v58, %v5920_v8  ;;  %v1716_v21 = vadd.f32 %v1652_v16, %v1331_v57  ;;  %v6097_v8 = vpop.f32.mrf.mxu0  ;;  %v1907_v57 = vmul.f32 %v5443_v4, %v1842_v36  ;;  %v1656_v36 = vmul.f32 %v5391_v58, %v5965_v30 }
 0x395   : > { %2067 = vadd.xlane.f32.xlu2 %v2066_v15  ;;  %v2081_v15 = vsel %vm1915_vm6, %v1906_v18, 0.0  ;;  %v6093_v61 = vadd.f32 %v2934_v46, %v2766_v42  ;;  %v1783_v31 = vadd.f32 %v5414_v26, %v1718_v38  ;;  %v1909_v16 = vmul.f32 %v5443_v4, %v1844_v27  ;;  %v4051_v27 = vld [vmem:[%s4748_s15 + $0x1f4] sm:$0xf0] }
 0x396   : > { %v1717_v14 = vadd.f32 %v1653_v3, %v1332_v19  ;;  %v1781_v51 = vadd.f32 %v5414_v26, %v1716_v21  ;;  %v1655_v46 = vmul.f32 %v5391_v58, %v5928_v37  ;;  %v1334_v42 = vmul.f32 %v5400_v13, %v7187_v12  ;;  %v7191_v58 = vld [vmem:[#allocation100_spill] sm:$0xff] }
 0x397   : > { %v6069_v41 = vpop.xlane.xlu0 %1947  ;;  %v3908_v52 = vor.u32 %v4051_v27, %v3907_v6  ;;  %v2090_v12 = vsel %vm1915_vm6, %v1909_v16, 0.0  ;;  %v7190_v6 = vld [vmem:[#allocation134_spill] sm:$0xff] }
 0x398   : > { %7180 = vst [vmem:[#allocation94_spill] sm:$0xff] %v6069_v41  ;;  %2070 = vadd.xlane.f32.xlu1 %v2069_v59  ;;  %v6076_v44 = vpop.xlane.xlu2 %1941  ;;  %v2075_v59 = vsel %vm1915_vm6, %v1904_v63, 0.0  ;;  %v6104_v63 = vpop.f32.mrf.mxu1  ;;  %v1782_v19 = vadd.f32 %v5414_v26, %v1717_v14  ;;  %v1719_v41 = vadd.f32 %v1655_v46, %v1334_v42  ;;  %v1335_v14 = vmul.f32 %v5400_v13, %v7190_v6  ;;  %v7196_v6 = vld [vmem:[#allocation78_spill] sm:$0xff] }
 0x399   : > { %7181 = vst [vmem:[#allocation98_spill] sm:$0xff] %v6076_v44  ;;  %v2767_v3 = vpop.f32.mrf.mxu2 }
 0x39a   : > { %v2768_v37 = vadd.f32 %v2767_v3, %v5721_v62  ;;  %v3909_v3 = vld [vmem:[%s4748_s15 + $0x1f8] sm:$0xf0]  ;;  %v1720_v16 = vadd.f32 %v1656_v36, %v1335_v14  ;;  %v2658_v14 = vadd.f32 %v7196_v6, %v5721_v62  ;;  %v7200_v6 = vld [vmem:[#allocation104_spill] sm:$0xff] }
 0x39b   : > { %v6090_v56 = vpop.xlane.xlu1 %1944 }
 0x39c   : > { %2082 = vadd.xlane.f32.xlu0 %v2081_v15  ;;  %v2936_v38 = vpop.f32.mrf.mxu3  ;;  %v7188_v15 = vld [vmem:[#allocation83_spill] sm:$0xff] }
 0x39d   : > { %2076 = vadd.xlane.f32.xlu2 %v2075_v59  ;;  %v2656_v21 = vadd.f32 %v7188_v15, %v5721_v62  ;;  %v1908_v59 = vmul.f32 %v5443_v4, %v1843_v35  ;;  %v2084_v15 = vsel %vm1915_vm6, %v1907_v57, 0.0  ;;  %v6127_v44 = vadd.f32 %v2936_v38, %v2768_v37  ;;  %v4050_v35 = vld [vmem:[%s4748_s15 + $0x1f4] sm:$0xf]  ;;  %v6142_v38 = vpop.f32.mrf.mxu0 }
 0x39e   : > { %v3912_v27 = vor.u32 %v4050_v35, %v3909_v3  ;;  %v1784_v57 = vadd.f32 %v5414_v26, %v1719_v41 }
 0x39f   : > { %v6100_v18 = vpop.xlane.xlu0 %1956  ;;  %v2825_v30 = vadd.f32 %v7191_v58, %v2656_v21  ;;  %2809 = vmatmul.bf16.gmra.mxu2 %v3908_v52 }
 0x3a0   : > { %7185 = vst [vmem:[#allocation86_spill] sm:$0xff] %v6100_v18  ;;  %2079 = vadd.xlane.f32.xlu1 %v2078_v43  ;;  %v6109_v47 = vpop.xlane.xlu2 %1950  ;;  %v1847_v43 = vmax.f32 %v1783_v31, 0.0  ;;  %v1846_v31 = vmax.f32 %v1782_v19, 0.0  ;;  %v6145_v52 = vpop.f32.mrf.mxu1 }
 0x3a1   : > { %7186 = vst [vmem:[#allocation97_spill] sm:$0xff] %v6109_v47  ;;  %v1845_v47 = vmax.f32 %v1781_v51, 0.0  ;;  %v2087_v51 = vsel %vm1915_vm6, %v1908_v59, 0.0  ;;  %v2984_v37 = vmax.f32 %v2825_v30, 0.0  ;;  %v6150_v59 = vld [vmem:[%s6952_s5] sm:$0xff] }
 0x3a2   : > { %v1912_v46 = vmul.f32 %v5443_v4, %v1847_v43  ;;  %v2770_v21 = vpop.f32.mrf.mxu2  ;;  %v6153_v41 = vperm.slane %v6150_v59, 5  ;;  %v1785_v43 = vadd.f32 %v5414_v26, %v1720_v16  ;;  %v1911_v35 = vmul.f32 %v5443_v4, %v1846_v31  ;;  %v7197_v26 = vld [vmem:[#allocation81_spill] sm:$0xff] }
 0x3a3   : > { %v6124_v18 = vpop.xlane.xlu1 %1953  ;;  %v1910_v13 = vmul.f32 %v5443_v4, %v1845_v47  ;;  %3984 = vmatmul.msk.bf16.gmra.mxu3 %vm2545_vm5, %v3912_v27  ;;  %v2771_v19 = vadd.f32 %v2770_v21, %v5721_v62  ;;  %v7194_v47 = vld [vmem:[#allocation89_spill] sm:$0xff]  ;;  %v1848_v27 = vmax.f32 %v1784_v57, 0.0  ;;  %v2661_v16 = vadd.f32 %v7197_v26, %v5721_v62 }
 0x3a4   : > { %7189 = vst [vmem:[#allocation92_spill] sm:$0xff] %v6124_v18  ;;  %2091 = vadd.xlane.f32.xlu0 %v2090_v12  ;;  %v2663_v36 = vadd.f32 %v7194_v47, %v5721_v62  ;;  %v2099_v12 = vsel %vm1915_vm6, %v1912_v46, 0.0  ;;  %v2939_v3 = vpop.f32.mrf.mxu3  ;;  %v7198_v46 = vld [vmem:[#allocation114_spill] sm:$0xff]  ;;  %v1849_v47 = vmax.f32 %v1785_v43, 0.0  ;;  %v2827_v57 = vadd.f32 %v7200_v6, %v2658_v14 }
 0x3a5   : > { %2085 = vadd.xlane.f32.xlu2 %v2084_v15  ;;  %v2093_v58 = vsel %vm1915_vm6, %v1910_v13, 0.0  ;;  %v6166_v30 = vadd.f32 %v2939_v3, %v2771_v19  ;;  %v1913_v13 = vmul.f32 %v5443_v4, %v1848_v27  ;;  %v6180_v3 = vpop.f32.mrf.mxu0  ;;  %v7205_v27 = vld [vmem:[#allocation84_spill] sm:$0xff] }
 0x3a6   : > { %v2832_v21 = vadd.f32 %v7198_v46, %v2663_v36  ;;  %v7202_v36 = vld [vmem:[#allocation108_spill] sm:$0xff]  ;;  %v7203_v46 = vld [vmem:[#allocation90_spill] sm:$0xff]  ;;  %v2985_v6 = vmax.f32 %v2827_v57, 0.0 }
 0x3a7   : > { %v6134_v18 = vpop.xlane.xlu0 %1965  ;;  %v2830_v43 = vadd.f32 %v7202_v36, %v2661_v16  ;;  %v7206_v16 = vld [vmem:[#allocation87_spill] sm:$0xff] }
 0x3a8   : > { %7192 = vst [vmem:[#allocation96_spill] sm:$0xff] %v6134_v18  ;;  %2088 = vadd.xlane.f32.xlu1 %v2087_v51  ;;  %v6139_v42 = vpop.xlane.xlu2 %1959  ;;  %v3049_v51 = vmul.f32 %v6153_v41, %v2984_v37  ;;  %v2096_v18 = vsel %vm1915_vm6, %v1911_v35, 0.0  ;;  %v2987_v26 = vmax.f32 %v2832_v21, 0.0  ;;  %v2671_v35 = vadd.f32 %v7203_v46, %v5721_v62  ;;  %v7207_v46 = vld [vmem:[#allocation127_spill] sm:$0xff] }
 0x3a9   : > { %7193 = vst [vmem:[#allocation103_spill] sm:$0xff] %v6139_v42  ;;  %v2668_v21 = vadd.f32 %v7206_v16, %v5721_v62  ;;  %v2986_v36 = vmax.f32 %v2830_v43, 0.0 }
 0x3aa   : > { %v2772_v19 = vpop.f32.mrf.mxu2  ;;  %v3113_v37 = vsel %vm1915_vm6, %v3049_v51, 0.0  ;;  %v6191_v51 = vpop.f32.mrf.mxu1  ;;  %v3052_v57 = vmul.f32 %v6153_v41, %v2987_v26 }
 0x3ab   : > { %v6160_v15 = vpop.xlane.xlu1 %1962 }
 0x3ac   : > { %7195 = vst [vmem:[#allocation102_spill] sm:$0xff] %v6160_v15  ;;  %2100 = vadd.xlane.f32.xlu0 %v2099_v12  ;;  %v2941_v14 = vpop.f32.mrf.mxu3 }
 0x3ad   : > { %2094 = vadd.xlane.f32.xlu2 %v2093_v58  ;;  %v2773_v58 = vadd.f32 %v2772_v19, %v5721_v62  ;;  %v2102_v19 = vsel %vm1915_vm6, %v1913_v13, 0.0  ;;  %v3050_v13 = vmul.f32 %v6153_v41, %v2985_v6 }
 0x3af   : > { %v6172_v31 = vpop.xlane.xlu0 %1974  ;;  %v6194_v42 = vadd.f32 %v2941_v14, %v2773_v58  ;;  %v7211_v14 = vld [vmem:[#allocation123_spill] sm:$0xff] }
 0x3b0   : > { %7199 = vst [vmem:[#allocation99_spill] sm:$0xff] %v6172_v31  ;;  %2097 = vadd.xlane.f32.xlu1 %v2096_v18  ;;  %v6176_v12 = vpop.xlane.xlu2 %1968  ;;  %v1914_v18 = vmul.f32 %v5443_v4, %v1849_v47 }
 0x3b1   : > { %7201 = vst [vmem:[#allocation106_spill] sm:$0xff] %v6176_v12  ;;  %v2666_v12 = vadd.f32 %v7205_v27, %v5721_v62  ;;  %v7209_v27 = vld [vmem:[#allocation118_spill] sm:$0xff] }
 0x3b2   : > { %v2105_v47 = vsel %vm1915_vm6, %v1914_v18, 0.0  ;;  %v2775_v58 = vpop.f32.mrf.mxu2  ;;  %v3122_v18 = vsel %vm1915_vm6, %v3052_v57, 0.0  ;;  %v2676_v57 = vadd.f32 %v5523_v32, %v5721_v62 }
 0x3b3   : > { %v6186_v31 = vpop.xlane.xlu1 %1971  ;;  %v2835_v15 = vadd.f32 %v7209_v27, %v2666_v12  ;;  %v2776_v43 = vadd.f32 %v2775_v58, %v5721_v62  ;;  %v3051_v12 = vmul.f32 %v6153_v41, %v2986_v36  ;;  %v7213_v27 = vld [vmem:[#allocation93_spill] sm:$0xff]  ;;  %v6222_v58 = vpop.f32.mrf.mxu1  ;;  %v7214_v36 = vld [vmem:[#allocation136_spill] sm:$0xff] }
 0x3b4   : > { %7204 = vst [vmem:[#allocation107_spill] sm:$0xff] %v6186_v31  ;;  %3114 = vadd.xlane.f32.xlu0 %v3113_v37  ;;  %v2840_v31 = vadd.f32 %v7207_v46, %v2671_v35  ;;  %v2678_v35 = vadd.f32 %v5556_v40, %v5721_v62  ;;  %v2944_v26 = vpop.f32.mrf.mxu3  ;;  %v2673_v6 = vadd.f32 %v7213_v27, %v5721_v62 }
 0x3b5   : > { %2103 = vadd.xlane.f32.xlu2 %v2102_v19  ;;  %v2837_v19 = vadd.f32 %v7211_v14, %v2668_v21  ;;  %v3116_v21 = vsel %vm1915_vm6, %v3050_v13, 0.0  ;;  %v6218_v14 = vpop.f32.mrf.mxu0  ;;  %v3119_v27 = vsel %vm1915_vm6, %v3051_v12, 0.0  ;;  %v7216_v13 = vld [vmem:[#allocation132_spill] sm:$0xff]  ;;  %v2686_v12 = vadd.f32 %v5667_v28, %v5721_v62 }
 0x3b6   : > { %v2990_v16 = vmax.f32 %v2840_v31, 0.0  ;;  %v6220_v31 = vadd.f32 %v2944_v26, %v2776_v43 }
 0x3b7   : > { %v6199_v4 = vpop.xlane.xlu0 %1983  ;;  %v2989_v40 = vmax.f32 %v2837_v19, 0.0 }
 0x3b8   : > { %7208 = vst [vmem:[#allocation111_spill] sm:$0xff] %v6199_v4  ;;  %2106 = vadd.xlane.f32.xlu1 %v2105_v47  ;;  %v6204_v37 = vpop.xlane.xlu2 %1977  ;;  %v2988_v47 = vmax.f32 %v2835_v15, 0.0  ;;  %v2847_v4 = vadd.f32 %v7214_v36, %v2678_v35 }
 0x3b9   : > { %7210 = vst [vmem:[#allocation101_spill] sm:$0xff] %v6204_v37  ;;  %v2842_v37 = vadd.f32 %v7216_v13, %v2673_v6 }
 0x3ba   : > { %v3053_v19 = vmul.f32 %v6153_v41, %v2988_v47  ;;  %v2777_v26 = vpop.f32.mrf.mxu2  ;;  %v2993_v36 = vmax.f32 %v2847_v4, 0.0  ;;  %v2681_v47 = vadd.f32 %v5590_v11, %v5721_v62  ;;  %v2683_v4 = vadd.f32 %v5621_v33, %v5721_v62 }
 0x3bb   : > { %v6212_v46 = vpop.xlane.xlu1 %1980  ;;  %v2778_v32 = vadd.f32 %v2777_v26, %v5721_v62 }
 0x3bc   : > { %7212 = vst [vmem:[#allocation110_spill] sm:$0xff] %v6212_v46  ;;  %3123 = vadd.xlane.f32.xlu0 %v3122_v18  ;;  %v3055_v18 = vmul.f32 %v6153_v41, %v2990_v16  ;;  %v7218_v46 = vld [vmem:[#allocation135_spill] sm:$0xff]  ;;  %v2946_v6 = vpop.f32.mrf.mxu3  ;;  %v3058_v11 = vmul.f32 %v6153_v41, %v2993_v36 }
 0x3bd   : > { %3117 = vadd.xlane.f32.xlu2 %v3116_v21  ;;  %v3054_v21 = vmul.f32 %v6153_v41, %v2989_v40  ;;  %v2845_v35 = vadd.f32 %v7218_v46, %v2676_v57  ;;  %v3125_v40 = vsel %vm1915_vm6, %v3053_v19, 0.0  ;;  %v6246_v13 = vadd.f32 %v2946_v6, %v2778_v32  ;;  %v6250_v46 = vpop.f32.mrf.mxu0  ;;  %v7219_v57 = vld [vmem:[#allocation72_spill] sm:$0xff] }
 0x3be   : > { %v3131_v16 = vsel %vm1915_vm6, %v3055_v18, 0.0  ;;  %v2855_v18 = vadd.f32 %v7219_v57, %v2686_v12  ;;  %v7221_v19 = vld [vmem:[#allocation64_spill] sm:$0xff]  ;;  %v3140_v36 = vsel %vm1915_vm6, %v3058_v11, 0.0 }
 0x3bf   : > { %v6227_v15 = vpop.xlane.xlu0 %1992  ;;  %v2992_v28 = vmax.f32 %v2845_v35, 0.0  ;;  %v2850_v32 = vadd.f32 %v7221_v19, %v2681_v47 }
 0x3c0   : > { %7215 = vst [vmem:[#allocation105_spill] sm:$0xff] %v6227_v15  ;;  %3120 = vadd.xlane.f32.xlu1 %v3119_v27  ;;  %v6232_v43 = vpop.xlane.xlu2 %1986  ;;  %v2991_v27 = vmax.f32 %v2842_v37, 0.0  ;;  %v3128_v37 = vsel %vm1915_vm6, %v3054_v21, 0.0  ;;  %v2996_v57 = vmax.f32 %v2855_v18, 0.0  ;;  %v2693_v21 = vadd.f32 %v5797_v45, %v5721_v62 }
 0x3c1   : > { %7217 = vst [vmem:[#allocation113_spill] sm:$0xff] %v6232_v43  ;;  %v7223_v43 = vld [vmem:[#allocation68_spill] sm:$0xff]  ;;  %v3057_v47 = vmul.f32 %v6153_v41, %v2992_v28  ;;  %v2994_v19 = vmax.f32 %v2850_v32, 0.0  ;;  %v2691_v45 = vadd.f32 %v5750_v60, %v5721_v62 }
 0x3c2   : > { %v3056_v33 = vmul.f32 %v6153_v41, %v2991_v27  ;;  %v2852_v35 = vadd.f32 %v7223_v43, %v2683_v4  ;;  %v2688_v27 = vadd.f32 %v5708_v0, %v5721_v62  ;;  %v2862_v11 = vadd.f32 %v5712_v5, %v2693_v21 }
 0x3c3   : > { %v6241_v15 = vpop.xlane.xlu1 %1989  ;;  %v3137_v28 = vsel %vm1915_vm6, %v3057_v47, 0.0  ;;  %v3061_v32 = vmul.f32 %v6153_v41, %v2996_v57  ;;  %v2860_v21 = vadd.f32 %v5672_v39, %v2691_v45  ;;  %v2698_v39 = vadd.f32 %v5880_v10, %v5721_v62 }
 0x3c4   : > { %3132 = vadd.xlane.f32.xlu0 %v3131_v16  ;;  %v6257_v16 = vpop.f32.mrf.mxu1  ;;  %v3134_v43 = vsel %vm1915_vm6, %v3056_v33, 0.0  ;;  %v2995_v18 = vmax.f32 %v2852_v35, 0.0  ;;  %v3059_v35 = vmul.f32 %v6153_v41, %v2994_v19  ;;  %v2999_v47 = vmax.f32 %v2862_v11, 0.0 }
 0x3c5   : > { %3126 = vadd.xlane.f32.xlu2 %v3125_v40  ;;  %v2780_v40 = vpop.f32.mrf.mxu2  ;;  %v3149_v57 = vsel %vm1915_vm6, %v3061_v32, 0.0  ;;  %v2696_v19 = vadd.f32 %v5841_v23, %v5721_v62  ;;  %v2998_v45 = vmax.f32 %v2860_v21, 0.0 }
 0x3c6   : > { %v2781_v12 = vadd.f32 %v2780_v40, %v5721_v62  ;;  %v3060_v5 = vmul.f32 %v6153_v41, %v2995_v18  ;;  %v3143_v18 = vsel %vm1915_vm6, %v3059_v35, 0.0 }
 0x3c7   : > { %v6253_v26 = vpop.xlane.xlu0 %2001  ;;  %v2865_v23 = vadd.f32 %v5757_v22, %v2696_v19  ;;  %v3063_v22 = vmul.f32 %v6153_v41, %v2998_v45 }
 0x3c8   : > { %7220 = vst [vmem:[#allocation115_spill] sm:$0xff] %v6253_v26  ;;  %3129 = vadd.xlane.f32.xlu1 %v3128_v37  ;;  %v6260_v6 = vpop.xlane.xlu2 %1995  ;;  %v2949_v37 = vpop.f32.mrf.mxu3  ;;  %v3146_v32 = vsel %vm1915_vm6, %v3060_v5, 0.0  ;;  %v2708_v5 = vadd.f32 %v6058_v49, %v5721_v62 }
 0x3c9   : > { %7222 = vst [vmem:[#allocation109_spill] sm:$0xff] %v6260_v6  ;;  %v6274_v4 = vadd.f32 %v2949_v37, %v2781_v12  ;;  %v7225_v6 = vld [vmem:[#allocation69_spill] sm:$0xff]  ;;  %v3000_v19 = vmax.f32 %v2865_v23, 0.0 }
 0x3ca   : > { %v2857_v0 = vadd.f32 %v7225_v6, %v2688_v27  ;;  %v2701_v6 = vadd.f32 %v5923_v29, %v5721_v62 }
 0x3cb   : > { %v6268_v26 = vpop.xlane.xlu1 %1998 }
 0x3cc   : > { %3141 = vadd.xlane.f32.xlu0 %v3140_v36  ;;  %v6284_v36 = vpop.f32.mrf.mxu0  ;;  %v6289_v37 = vpop.f32.mrf.mxu1  ;;  %v2870_v29 = vadd.f32 %v5848_v50, %v2701_v6 }
 0x3cd   : > { %3135 = vadd.xlane.f32.xlu2 %v3134_v43  ;;  %v2782_v12 = vpop.f32.mrf.mxu2 }
 0x3ce   : > { %v2783_v60 = vadd.f32 %v2782_v12, %v5721_v62  ;;  %v3002_v21 = vmax.f32 %v2870_v29, 0.0  ;;  %v2706_v29 = vadd.f32 %v6016_v53, %v5721_v62 }
 0x3cf   : > { %v6279_v40 = vpop.xlane.xlu0 %2010 }
 0x3d0   : > { %7224 = vst [vmem:[#allocation119_spill] sm:$0xff] %v6279_v40  ;;  %3138 = vadd.xlane.f32.xlu1 %v3137_v28  ;;  %v6286_v33 = vpop.xlane.xlu2 %2004  ;;  %v2951_v43 = vpop.f32.mrf.mxu3  ;;  %v2997_v28 = vmax.f32 %v2857_v0, 0.0  ;;  %v3064_v0 = vmul.f32 %v6153_v41, %v2999_v47 }
 0x3d1   : > { %v6302_v40 = vadd.f32 %v2951_v43, %v2783_v60 }
 0x3d2   : > { %v3062_v35 = vmul.f32 %v6153_v41, %v2997_v28  ;;  %v3158_v47 = vsel %vm1915_vm6, %v3064_v0, 0.0  ;;  %v2703_v28 = vadd.f32 %v5968_v20, %v5721_v62  ;;  %v3155_v0 = vsel %vm1915_vm6, %v3063_v22, 0.0 }
 0x3d3   : > { %v6297_v27 = vpop.xlane.xlu1 %2007  ;;  %v3067_v20 = vmul.f32 %v6153_v41, %v3002_v21 }
 0x3d4   : > { %3150 = vadd.xlane.f32.xlu0 %v3149_v57  ;;  %v2867_v57 = vadd.f32 %v5806_v55, %v2698_v39  ;;  %v6316_v10 = vpop.f32.mrf.mxu0  ;;  %v3152_v55 = vsel %vm1915_vm6, %v3062_v35, 0.0  ;;  %v6330_v39 = vpop.f32.mrf.mxu1  ;;  %v2872_v23 = vadd.f32 %v5888_v9, %v2703_v28  ;;  %v2711_v9 = vadd.f32 %v6097_v8, %v5721_v62 }
 0x3d5   : > { %3144 = vadd.xlane.f32.xlu2 %v3143_v18  ;;  %v2785_v60 = vpop.f32.mrf.mxu2 }
 0x3d6   : > { %v2786_v50 = vadd.f32 %v2785_v60, %v5721_v62  ;;  %v3001_v49 = vmax.f32 %v2867_v57, 0.0  ;;  %v3065_v60 = vmul.f32 %v6153_v41, %v3000_v19  ;;  %v3003_v21 = vmax.f32 %v2872_v23, 0.0 }
 0x3d7   : > { %v6307_v11 = vpop.xlane.xlu0 %2019 }
 0x3d8   : > { %3147 = vadd.xlane.f32.xlu1 %v3146_v32  ;;  %v6312_v12 = vpop.xlane.xlu2 %2013  ;;  %v2954_v43 = vpop.f32.mrf.mxu3  ;;  %v2877_v32 = vadd.f32 %v5976_v7, %v2708_v5  ;;  %v3066_v57 = vmul.f32 %v6153_v41, %v3001_v49  ;;  %v2716_v7 = vadd.f32 %v6180_v3, %v5721_v62  ;;  %v3167_v5 = vsel %vm1915_vm6, %v3067_v20, 0.0 }
 0x3d9   : > { %v6328_v18 = vadd.f32 %v2954_v43, %v2786_v50  ;;  %v2875_v50 = vadd.f32 %v5931_v54, %v2706_v29  ;;  %v3161_v22 = vsel %vm1915_vm6, %v3065_v60, 0.0  ;;  %v2713_v54 = vadd.f32 %v6142_v38, %v5721_v62 }
 0x3da   : > { %v3005_v53 = vmax.f32 %v2877_v32, 0.0  ;;  %v3164_v29 = vsel %vm1915_vm6, %v3066_v57, 0.0  ;;  %v2880_v32 = vadd.f32 %v6023_v17, %v2711_v9  ;;  %v3068_v20 = vmul.f32 %v6153_v41, %v3003_v21 }
 0x3db   : > { %v6322_v6 = vpop.xlane.xlu1 %2016  ;;  %v3004_v3 = vmax.f32 %v2875_v50, 0.0  ;;  %v2882_v38 = vadd.f32 %v6064_v25, %v2713_v54 }
 0x3dc   : > { %3159 = vadd.xlane.f32.xlu0 %v3158_v47  ;;  %v2727_v19 = vpop.f32.mrf.mxu0  ;;  %v6357_v28 = vpop.f32.mrf.mxu1  ;;  %v3070_v8 = vmul.f32 %v6153_v41, %v3005_v53  ;;  %v3006_v17 = vmax.f32 %v2880_v32, 0.0 }
 0x3dd   : > { %3153 = vadd.xlane.f32.xlu2 %v3152_v55  ;;  %v6353_v43 = vpop.f32.mrf.mxu2  ;;  %v2885_v55 = vadd.f32 %v6104_v63, %v2716_v7  ;;  %v2723_v63 = vadd.f32 %v6284_v36, %v5721_v62  ;;  %v3069_v53 = vmul.f32 %v6153_v41, %v3004_v3  ;;  %v2718_v7 = vadd.f32 %v6218_v14, %v5721_v62 }
 0x3de   : > { %v3176_v57 = vsel %vm1915_vm6, %v3070_v8, 0.0  ;;  %v3007_v21 = vmax.f32 %v2882_v38, 0.0  ;;  %v2721_v36 = vadd.f32 %v6250_v46, %v5721_v62  ;;  %v3071_v8 = vmul.f32 %v6153_v41, %v3006_v17 }
 0x3df   : > { %v6335_v45 = vpop.xlane.xlu0 %2028  ;;  %v3008_v60 = vmax.f32 %v2885_v55, 0.0  ;;  %v2892_v9 = vadd.f32 %v6222_v58, %v2723_v63  ;;  %v3173_v3 = vsel %vm1915_vm6, %v3069_v53, 0.0  ;;  %v2887_v14 = vadd.f32 %v6145_v52, %v2718_v7 }
 0x3e0   : > { %3156 = vadd.xlane.f32.xlu1 %v3155_v0  ;;  %v6340_v35 = vpop.xlane.xlu2 %2022  ;;  %v6368_v23 = vpop.f32.mrf.mxu3  ;;  %v2890_v58 = vadd.f32 %v6191_v51, %v2721_v36  ;;  %v2726_v53 = vadd.f32 %v6316_v10, %v5721_v62  ;;  %v3179_v17 = vsel %vm1915_vm6, %v3071_v8, 0.0  ;;  %v2728_v51 = vadd.f32 %v2727_v19, %v5721_v62  ;;  %v7227_v8 = vld [vmem:[#allocation75_spill] sm:$0xff] }
 0x3e1   : > { %v3073_v55 = vmul.f32 %v6153_v41, %v3008_v60  ;;  %v3011_v38 = vmax.f32 %v2892_v9, 0.0  ;;  %v3009_v52 = vmax.f32 %v2887_v14, 0.0 }
 0x3e2   : > { %v2897_v19 = vadd.f32 %v6289_v37, %v2728_v51 }
 0x3e3   : > { %v6348_v47 = vpop.xlane.xlu1 %2025  ;;  %v3185_v60 = vsel %vm1915_vm6, %v3073_v55, 0.0  ;;  %v3076_v9 = vmul.f32 %v6153_v41, %v3011_v38  ;;  %v3074_v10 = vmul.f32 %v6153_v41, %v3009_v52 }
 0x3e4   : > { %3168 = vadd.xlane.f32.xlu0 %v3167_v5  ;;  %v3170_v5 = vsel %vm1915_vm6, %v3068_v20, 0.0  ;;  %v2904_v32 = vpop.f32.mrf.mxu1  ;;  %v3072_v20 = vmul.f32 %v6153_v41, %v3007_v21 }
 0x3e5   : > { %3162 = vadd.xlane.f32.xlu2 %v3161_v22  ;;  %v6380_v25 = vpop.f32.mrf.mxu2  ;;  %v2730_v22 = vpop.f32.mrf.mxu0  ;;  %v3194_v38 = vsel %vm1915_vm6, %v3076_v9, 0.0  ;;  %v3188_v52 = vsel %vm1915_vm6, %v3074_v10, 0.0 }
 0x3e6   : > { %v2731_v63 = vadd.f32 %v2730_v22, %v5721_v62  ;;  %v3182_v7 = vsel %vm1915_vm6, %v3072_v20, 0.0  ;;  %v2895_v22 = vadd.f32 %v6257_v16, %v2726_v53  ;;  %v2738_v20 = vadd.f32 %v7227_v8, %v5721_v62 }
 0x3e7   : > { %v6360_v49 = vpop.xlane.xlu0 %2037 }
 0x3e8   : > { %3165 = vadd.xlane.f32.xlu1 %v3164_v29  ;;  %v6365_v0 = vpop.xlane.xlu2 %2031  ;;  %v6394_v46 = vpop.f32.mrf.mxu3  ;;  %v2900_v21 = vadd.f32 %v6330_v39, %v2731_v63 }
 0x3ea   : > { %v3014_v39 = vmax.f32 %v2900_v21, 0.0  ;;  %v3013_v21 = vmax.f32 %v2897_v19, 0.0 }
 0x3eb   : > { %v6373_v50 = vpop.xlane.xlu1 %2034 }
 0x3ec   : > { %3177 = vadd.xlane.f32.xlu0 %v3176_v57  ;;  %v2906_v63 = vpop.f32.mrf.mxu1  ;;  %v3078_v19 = vmul.f32 %v6153_v41, %v3013_v21 }
 0x3ed   : > { %3171 = vadd.xlane.f32.xlu2 %v3170_v5  ;;  %v3010_v5 = vmax.f32 %v2890_v58, 0.0  ;;  %v6414_v55 = vpop.f32.mrf.mxu2  ;;  %v2732_v14 = vpop.f32.mrf.mxu0  ;;  %v2907_v51 = vadd.f32 %v2906_v63, %v2738_v20 }
 0x3ee   : > { %v2733_v53 = vadd.f32 %v2732_v14, %v5721_v62 }
 0x3ef   : > { %v6385_v54 = vpop.xlane.xlu0 %2046  ;;  %v3075_v16 = vmul.f32 %v6153_v41, %v3010_v5  ;;  %v3079_v5 = vmul.f32 %v6153_v41, %v3014_v39 }
 0x3f0   : > { %3174 = vadd.xlane.f32.xlu1 %v3173_v3  ;;  %v6390_v29 = vpop.xlane.xlu2 %2040 }
 0x3f1   : > { %v3191_v9 = vsel %vm1915_vm6, %v3075_v16, 0.0  ;;  %v3203_v20 = vsel %vm1915_vm6, %v3079_v5, 0.0 }
 0x3f3   : > { %v6398_v57 = vpop.xlane.xlu1 %2043 }
 0x3f4   : > { %3186 = vadd.xlane.f32.xlu0 %v3185_v60  ;;  %v3012_v60 = vmax.f32 %v2895_v22, 0.0  ;;  %v2902_v22 = vadd.f32 %v6357_v28, %v2733_v53 }
 0x3f5   : > { %3180 = vadd.xlane.f32.xlu2 %v3179_v17  ;;  %v6425_v17 = vpop.f32.mrf.mxu3 }
 0x3f6   : > { %v3077_v10 = vmul.f32 %v6153_v41, %v3012_v60  ;;  %v3015_v16 = vmax.f32 %v2902_v22, 0.0 }
 0x3f7   : > { %v6407_v36 = vpop.xlane.xlu0 %2055 }
 0x3f8   : > { %7226 = vst [vmem:[#allocation117_spill] sm:$0xff] %v6407_v36  ;;  %3183 = vadd.xlane.f32.xlu1 %v3182_v7  ;;  %v6411_v3 = vpop.xlane.xlu2 %2049  ;;  %v7228_v7 = vld [vmem:[#allocation71_spill] sm:$0xff]  ;;  %v3017_v36 = vmax.f32 %v2907_v51, 0.0  ;;  %v3197_v39 = vsel %vm1915_vm6, %v3077_v10, 0.0  ;;  %v3080_v51 = vmul.f32 %v6153_v41, %v3015_v16 }
 0x3f9   : > { %v2736_v37 = vadd.f32 %v7228_v7, %v5721_v62 }
 0x3fa   : > { %v3082_v60 = vmul.f32 %v6153_v41, %v3017_v36  ;;  %v3206_v36 = vsel %vm1915_vm6, %v3080_v51, 0.0 }
 0x3fb   : > { %v6419_v58 = vpop.xlane.xlu1 %2052 }
 0x3fc   : > { %3195 = vadd.xlane.f32.xlu0 %v3194_v38  ;;  %v6437_v38 = vpop.f32.mrf.mxu2  ;;  %v3212_v10 = vsel %vm1915_vm6, %v3082_v60, 0.0 }
 0x3fd   : > { %3189 = vadd.xlane.f32.xlu2 %v3188_v52  ;;  %v2905_v52 = vadd.f32 %v2904_v32, %v2736_v37  ;;  %v6444_v28 = vpop.f32.mrf.mxu3  ;;  %v3200_v32 = vsel %vm1915_vm6, %v3078_v19, 0.0  ;;  %v7235_v19 = vld [vmem:[#allocation74_spill] sm:$0xff] }
 0x3ff   : > { %v6429_v8 = vpop.xlane.xlu0 %2064  ;;  %v3016_v63 = vmax.f32 %v2905_v52, 0.0  ;;  %v7234_v52 = vld [vmem:[#allocation67_spill] sm:$0xff] }
 0x400   : > { %7229 = vst [vmem:[#allocation112_spill] sm:$0xff] %v6429_v8  ;;  %3192 = vadd.xlane.f32.xlu1 %v3191_v9  ;;  %v6434_v14 = vpop.xlane.xlu2 %2058  ;;  %v7232_v9 = vld [vmem:[#allocation70_spill] sm:$0xff] }
 0x401   : > { %v3081_v21 = vmul.f32 %v6153_v41, %v3016_v63  ;;  %v3020_v5 = vmax.f32 %v7232_v9, 0.0 }
 0x403   : > { %v6439_v7 = vpop.xlane.xlu1 %2061  ;;  %v3085_v16 = vmul.f32 %v6153_v41, %v3020_v5  ;;  %v3209_v63 = vsel %vm1915_vm6, %v3081_v21, 0.0  ;;  %v7240_v5 = vld [vmem:[#allocation79_spill] sm:$0xff] }
 0x404   : > { %3204 = vadd.xlane.f32.xlu0 %v3203_v20  ;;  %v3018_v20 = vmax.f32 %v7234_v52, 0.0  ;;  %v3021_v8 = vmax.f32 %v7240_v5, 0.0 }
 0x405   : > { %3198 = vadd.xlane.f32.xlu2 %v3197_v39  ;;  %v6460_v39 = vpop.f32.mrf.mxu2  ;;  %v6470_v52 = vpop.f32.mrf.mxu3 }
 0x406   : > { %v3083_v9 = vmul.f32 %v6153_v41, %v3018_v20 }
 0x407   : > { %v6447_v53 = vpop.xlane.xlu0 %2073 }
 0x408   : > { %7230 = vst [vmem:[#allocation122_spill] sm:$0xff] %v6447_v53  ;;  %3201 = vadd.xlane.f32.xlu1 %v3200_v32  ;;  %v6450_v37 = vpop.xlane.xlu2 %2067  ;;  %v3019_v32 = vmax.f32 %v7235_v19, 0.0  ;;  %v3215_v21 = vsel %vm1915_vm6, %v3083_v9, 0.0 }
 0x409   : > { %7231 = vst [vmem:[#allocation121_spill] sm:$0xff] %v6450_v37 }
 0x40a   : > { %v3084_v19 = vmul.f32 %v6153_v41, %v3019_v32  ;;  %v3086_v32 = vmul.f32 %v6153_v41, %v3021_v8 }
 0x40b   : > { %v6455_v22 = vpop.xlane.xlu1 %2070 }
 0x40c   : > { %7233 = vst [vmem:[#allocation116_spill] sm:$0xff] %v6455_v22  ;;  %3213 = vadd.xlane.f32.xlu0 %v3212_v10  ;;  %v7238_v10 = vld [vmem:[#allocation85_spill] sm:$0xff] }
 0x40d   : > { %3207 = vadd.xlane.f32.xlu2 %v3206_v36  ;;  %v3023_v51 = vmax.f32 %v7238_v10, 0.0  ;;  %v3221_v36 = vsel %vm1915_vm6, %v3085_v16, 0.0  ;;  %v6479_v20 = vpop.f32.mrf.mxu2  ;;  %v3218_v10 = vsel %vm1915_vm6, %v3084_v19, 0.0  ;;  %v6489_v5 = vpop.f32.mrf.mxu3  ;;  %v3025_v19 = vmax.f32 %v5987_v2, 0.0 }
 0x40f   : > { %v6464_v53 = vpop.xlane.xlu0 %2082 }
 0x410   : > { %7236 = vst [vmem:[#allocation126_spill] sm:$0xff] %v6464_v53  ;;  %3210 = vadd.xlane.f32.xlu1 %v3209_v63  ;;  %v6468_v60 = vpop.xlane.xlu2 %2076  ;;  %v7241_v63 = vld [vmem:[#allocation77_spill] sm:$0xff] }
 0x411   : > { %7237 = vst [vmem:[#allocation124_spill] sm:$0xff] %v6468_v60  ;;  %v3022_v53 = vmax.f32 %v7241_v63, 0.0 }
 0x413   : > { %v6473_v37 = vpop.xlane.xlu1 %2079  ;;  %v3087_v9 = vmul.f32 %v6153_v41, %v3022_v53 }
 0x414   : > { %7239 = vst [vmem:[#allocation120_spill] sm:$0xff] %v6473_v37  ;;  %3222 = vadd.xlane.f32.xlu0 %v3221_v36  ;;  %v3088_v37 = vmul.f32 %v6153_v41, %v3023_v51  ;;  %v3026_v36 = vmax.f32 %v6026_v34, 0.0  ;;  %v3224_v51 = vsel %vm1915_vm6, %v3086_v32, 0.0  ;;  %v3029_v32 = vmax.f32 %v6127_v44, 0.0 }
 0x415   : > { %3216 = vadd.xlane.f32.xlu2 %v3215_v21  ;;  %v3227_v53 = vsel %vm1915_vm6, %v3087_v9, 0.0  ;;  %v3028_v44 = vmax.f32 %v6093_v61, 0.0 }
 0x416   : > { %v3230_v63 = vsel %vm1915_vm6, %v3088_v37, 0.0  ;;  %v3091_v8 = vmul.f32 %v6153_v41, %v3026_v36  ;;  %v6506_v37 = vpop.f32.mrf.mxu2  ;;  %v3027_v36 = vmax.f32 %v6060_v24, 0.0 }
 0x417   : > { %v6482_v60 = vpop.xlane.xlu0 %2091 }
 0x418   : > { %7242 = vst [vmem:[#allocation128_spill] sm:$0xff] %v6482_v60  ;;  %3219 = vadd.xlane.f32.xlu1 %v3218_v10  ;;  %v6486_v16 = vpop.xlane.xlu2 %2085  ;;  %v7245_v60 = vld [vmem:[#allocation73_spill] sm:$0xff]  ;;  %v3239_v2 = vsel %vm1915_vm6, %v3091_v8, 0.0  ;;  %v3092_v24 = vmul.f32 %v6153_v41, %v3027_v36  ;;  %v3030_v36 = vmax.f32 %v6166_v30, 0.0 }
 0x419   : > { %7243 = vst [vmem:[#allocation130_spill] sm:$0xff] %v6486_v16  ;;  %v3024_v22 = vmax.f32 %v7245_v60, 0.0  ;;  %v3090_v60 = vmul.f32 %v6153_v41, %v3025_v19  ;;  %v6520_v19 = vperm.slane %v6150_v59, 6  ;;  %v3093_v59 = vmul.f32 %v6153_v41, %v3028_v44 }
 0x41b   : > { %v6493_v21 = vpop.xlane.xlu1 %2088  ;;  %v3089_v34 = vmul.f32 %v6153_v41, %v3024_v22  ;;  %v6515_v22 = vpop.f32.mrf.mxu3  ;;  %v3245_v30 = vsel %vm1915_vm6, %v3093_v59, 0.0 }
 0x41c   : > { %7244 = vst [vmem:[#allocation133_spill] sm:$0xff] %v6493_v21  ;;  %3231 = vadd.xlane.f32.xlu0 %v3230_v63 }
 0x41d   : > { %3225 = vadd.xlane.f32.xlu2 %v3224_v51  ;;  %v3233_v9 = vsel %vm1915_vm6, %v3089_v34, 0.0  ;;  %v7249_v51 = vld [vmem:[#allocation3_spill] sm:$0xff] }
 0x41e   : > { %v6535_v61 = vpop.f32.mrf.mxu2 }
 0x41f   : > { %v6500_v10 = vpop.xlane.xlu0 %2100 }
 0x420   : > { %7246 = vst [vmem:[#allocation125_spill] sm:$0xff] %v6500_v10  ;;  %3228 = vadd.xlane.f32.xlu1 %v3227_v53  ;;  %v6504_v16 = vpop.xlane.xlu2 %2094  ;;  %v3305_v53 = vadd.f32 %v5984_v48, %v7249_v51  ;;  %v3094_v10 = vmul.f32 %v6153_v41, %v3029_v32  ;;  %v7252_v51 = vld [vmem:[#allocation4_spill] sm:$0xff] }
 0x421   : > { %7247 = vst [vmem:[#allocation131_spill] sm:$0xff] %v6504_v16  ;;  %v3236_v16 = vsel %vm1915_vm6, %v3090_v60, 0.0  ;;  %v3032_v60 = vmax.f32 %v6220_v31, 0.0  ;;  %v7254_v31 = vld [vmem:[#allocation2_spill] sm:$0xff] }
 0x423   : > { %v6510_v63 = vpop.xlane.xlu1 %2097  ;;  %v6549_v44 = vpop.f32.mrf.mxu3 }
 0x424   : > { %7248 = vst [vmem:[#allocation129_spill] sm:$0xff] %v6510_v63  ;;  %3240 = vadd.xlane.f32.xlu0 %v3239_v2 }
 0x425   : > { %3234 = vadd.xlane.f32.xlu2 %v3233_v9  ;;  %v3242_v9 = vsel %vm1915_vm6, %v3092_v24, 0.0 }
 0x427   : > { %v3115_v8 = vpop.xlane.xlu0 %3114 }
 0x428   : > { %v3369_v2 = vadd.f32 %v3305_v53, %v3115_v8  ;;  %3237 = vadd.xlane.f32.xlu1 %v3236_v16  ;;  %v6526_v34 = vpop.xlane.xlu2 %2103  ;;  %v3248_v16 = vsel %vm1915_vm6, %v3094_v10, 0.0  ;;  %v7253_v53 = vld [vmem:[#allocation88_spill] sm:$0xff]  ;;  %v3097_v10 = vmul.f32 %v6153_v41, %v3032_v60  ;;  %v3035_v60 = vmax.f32 %v6302_v40, 0.0  ;;  %v7258_v40 = vld [vmem:[#allocation9_spill] sm:$0xff] }
 0x429   : > { %7250 = vst [vmem:[#allocation83_spill] sm:$0xff] %v6526_v34  ;;  %v3308_v8 = vadd.f32 %v7253_v53, %v7252_v51  ;;  %v7255_v34 = vld [vmem:[#allocation82_spill] sm:$0xff] }
 0x42a   : > { %v3434_v48 = vadd.f32 %v6520_v19, %v3369_v2  ;;  %v3031_v2 = vmax.f32 %v6194_v42, 0.0  ;;  %v7256_v51 = vld [vmem:[#allocation6_spill] sm:$0xff]  ;;  %v7257_v42 = vld [vmem:[#allocation76_spill] sm:$0xff] }
 0x42b   : > { %v6539_v32 = vpop.xlane.xlu1 %2106  ;;  %v3307_v53 = vadd.f32 %v7257_v42, %v7256_v51 }
 0x42c   : > { %7251 = vst [vmem:[#allocation134_spill] sm:$0xff] %v6539_v32  ;;  %3249 = vadd.xlane.f32.xlu0 %v3248_v16  ;;  %v3306_v32 = vadd.f32 %v7255_v34, %v7254_v31  ;;  %v3096_v21 = vmul.f32 %v6153_v41, %v3031_v2  ;;  %v2791_v31 = vadd.f32 %v6380_v25, %v5721_v62 }
 0x42d   : > { %3499 = vst.msk [vmem:[%s6532_s18] sm:$0xff] %vm3498_vm7, %v3434_v48  ;;  %3243 = vadd.xlane.f32.xlu2 %v3242_v9  ;;  %v3095_v48 = vmul.f32 %v6153_v41, %v3030_v36  ;;  %v3311_v25 = vadd.f32 %v6054_v1, %v7258_v40 }
 0x42e   : > { %v2960_v42 = vadd.f32 %v6394_v46, %v2791_v31 }
 0x42f   : > { %v3124_v63 = vpop.xlane.xlu0 %3123  ;;  %v3251_v2 = vsel %vm1915_vm6, %v3095_v48, 0.0  ;;  %v3100_v48 = vmul.f32 %v6153_v41, %v3035_v60 }
 0x430   : > { %v3372_v24 = vadd.f32 %v3308_v8, %v3124_v63  ;;  %3246 = vadd.xlane.f32.xlu1 %v3245_v30  ;;  %v3118_v16 = vpop.xlane.xlu2 %3117  ;;  %v3257_v63 = vsel %vm1915_vm6, %v3097_v10, 0.0  ;;  %v3033_v8 = vmax.f32 %v6246_v13, 0.0  ;;  %v6569_v30 = vpop.f32.mrf.mxu2  ;;  %v2788_v13 = vadd.f32 %v6353_v43, %v5721_v62 }
 0x431   : > { %v3370_v9 = vadd.f32 %v3306_v32, %v3118_v16  ;;  %v7259_v16 = vld [vmem:[#allocation5_spill] sm:$0xff]  ;;  %v6587_v43 = vpop.f32.mrf.mxu3 }
 0x432   : > { %v3437_v34 = vadd.f32 %v6520_v19, %v3372_v24  ;;  %v3034_v24 = vmax.f32 %v6274_v4, 0.0  ;;  %v2957_v31 = vadd.f32 %v6368_v23, %v2788_v13 }
 0x433   : > { %v3435_v59 = vadd.f32 %v6520_v19, %v3370_v9  ;;  %v3121_v36 = vpop.xlane.xlu1 %3120  ;;  %v7260_v9 = vld [vmem:[#allocation91_spill] sm:$0xff] }
 0x434   : > { %3502 = vst.msk [vmem:[%s6532_s18 + $0x18] sm:$0xff] %vm3498_vm7, %v3437_v34  ;;  %v3371_v32 = vadd.f32 %v3307_v53, %v3121_v36  ;;  %3258 = vadd.xlane.f32.xlu0 %v3257_v63  ;;  %v3309_v51 = vadd.f32 %v7260_v9, %v7259_v16  ;;  %v3254_v34 = vsel %vm1915_vm6, %v3096_v21, 0.0  ;;  %v7261_v63 = vld [vmem:[#allocation7_spill] sm:$0xff]  ;;  %v3099_v46 = vmul.f32 %v6153_v41, %v3034_v24 }
 0x435   : > { %3500 = vst.msk [vmem:[%s6532_s18 + $0x8] sm:$0xff] %vm3498_vm7, %v3435_v59  ;;  %3252 = vadd.xlane.f32.xlu2 %v3251_v2  ;;  %v3098_v59 = vmul.f32 %v6153_v41, %v3033_v8  ;;  %v3038_v8 = vmax.f32 %v2960_v42, 0.0  ;;  %v2798_v2 = vadd.f32 %v6460_v39, %v5721_v62  ;;  %v3036_v16 = vmax.f32 %v6328_v18, 0.0  ;;  %v7263_v39 = vld [vmem:[#allocation12_spill] sm:$0xff] }
 0x436   : > { %v3436_v10 = vadd.f32 %v6520_v19, %v3371_v32  ;;  %v7262_v32 = vld [vmem:[#allocation80_spill] sm:$0xff]  ;;  %v2793_v9 = vadd.f32 %v6414_v55, %v5721_v62  ;;  %v3314_v13 = vadd.f32 %v6090_v56, %v7263_v39  ;;  %v2796_v18 = vadd.f32 %v6437_v38, %v5721_v62 }
 0x437   : > { %v3133_v53 = vpop.xlane.xlu0 %3132  ;;  %v3310_v60 = vadd.f32 %v7262_v32, %v7261_v63  ;;  %v3260_v23 = vsel %vm1915_vm6, %v3098_v59, 0.0  ;;  %v7264_v42 = vld [vmem:[#allocation8_spill] sm:$0xff]  ;;  %v2967_v59 = vadd.f32 %v6470_v52, %v2798_v2  ;;  %v3101_v56 = vmul.f32 %v6153_v41, %v3036_v16 }
 0x438   : > { %3501 = vst.msk [vmem:[%s6532_s18 + $0x10] sm:$0xff] %vm3498_vm7, %v3436_v10  ;;  %v3375_v1 = vadd.f32 %v3311_v25, %v3133_v53  ;;  %3255 = vadd.xlane.f32.xlu1 %v3254_v34  ;;  %v3127_v4 = vpop.xlane.xlu2 %3126  ;;  %v3266_v10 = vsel %vm1915_vm6, %v3100_v48, 0.0  ;;  %v6611_v55 = vpop.f32.mrf.mxu2  ;;  %v7265_v53 = vld [vmem:[#allocation95_spill] sm:$0xff]  ;;  %v2962_v63 = vadd.f32 %v6425_v17, %v2793_v9 }
 0x439   : > { %v3373_v36 = vadd.f32 %v3309_v51, %v3127_v4  ;;  %v3037_v51 = vmax.f32 %v2957_v31, 0.0  ;;  %v3312_v34 = vadd.f32 %v7265_v53, %v7264_v42  ;;  %v7266_v31 = vld [vmem:[#allocation10_spill] sm:$0xff]  ;;  %v6627_v2 = vpop.f32.mrf.mxu3  ;;  %v3041_v17 = vmax.f32 %v2967_v59, 0.0 }
 0x43a   : > { %v3440_v21 = vadd.f32 %v6520_v19, %v3375_v1  ;;  %v3103_v1 = vmul.f32 %v6153_v41, %v3038_v8  ;;  %v2965_v8 = vadd.f32 %v6444_v28, %v2796_v18  ;;  %v3269_v39 = vsel %vm1915_vm6, %v3101_v56, 0.0  ;;  %v7271_v53 = vld [vmem:[#allocation94_spill] sm:$0xff] }
 0x43b   : > { %v3438_v40 = vadd.f32 %v6520_v19, %v3373_v36  ;;  %v3130_v25 = vpop.xlane.xlu1 %3129  ;;  %v3263_v36 = vsel %vm1915_vm6, %v3099_v46, 0.0  ;;  %v3102_v52 = vmul.f32 %v6153_v41, %v3037_v51 }
 0x43c   : > { %3505 = vst.msk [vmem:[%s6532_s18 + $0x30] sm:$0xff] %vm3498_vm7, %v3440_v21  ;;  %v3374_v24 = vadd.f32 %v3310_v60, %v3130_v25  ;;  %3267 = vadd.xlane.f32.xlu0 %v3266_v10  ;;  %v7267_v21 = vld [vmem:[#allocation98_spill] sm:$0xff]  ;;  %v2806_v25 = vadd.f32 %v6535_v61, %v5721_v62  ;;  %v3275_v9 = vsel %vm1915_vm6, %v3103_v1, 0.0  ;;  %v7268_v61 = vld [vmem:[#allocation15_spill] sm:$0xff]  ;;  %v3040_v18 = vmax.f32 %v2965_v8, 0.0 }
 0x43d   : > { %3503 = vst.msk [vmem:[%s6532_s18 + $0x20] sm:$0xff] %vm3498_vm7, %v3438_v40  ;;  %3261 = vadd.xlane.f32.xlu2 %v3260_v23  ;;  %v3313_v40 = vadd.f32 %v7267_v21, %v7266_v31  ;;  %v2801_v23 = vadd.f32 %v6479_v20, %v5721_v62  ;;  %v7270_v20 = vld [vmem:[#allocation11_spill] sm:$0xff]  ;;  %v3106_v1 = vmul.f32 %v6153_v41, %v3041_v17  ;;  %v7272_v31 = vld [vmem:[#allocation13_spill] sm:$0xff] }
 0x43e   : > { %v3439_v48 = vadd.f32 %v6520_v19, %v3374_v24  ;;  %v3039_v24 = vmax.f32 %v2962_v63, 0.0  ;;  %v2975_v59 = vadd.f32 %v6549_v44, %v2806_v25  ;;  %v7273_v21 = vld [vmem:[#allocation97_spill] sm:$0xff]  ;;  %v3105_v44 = vmul.f32 %v6153_v41, %v3040_v18 }
 0x43f   : > { %v3142_v4 = vpop.xlane.xlu0 %3141  ;;  %v2970_v63 = vadd.f32 %v6489_v5, %v2801_v23  ;;  %v3284_v25 = vsel %vm1915_vm6, %v3106_v1, 0.0 }
 0x440   : > { %3504 = vst.msk [vmem:[%s6532_s18 + $0x28] sm:$0xff] %vm3498_vm7, %v3439_v48  ;;  %v3378_v38 = vadd.f32 %v3314_v13, %v3142_v4  ;;  %3264 = vadd.xlane.f32.xlu1 %v3263_v36  ;;  %v3136_v32 = vpop.xlane.xlu2 %3135  ;;  %v7269_v13 = vld [vmem:[#allocation92_spill] sm:$0xff]  ;;  %v2803_v48 = vadd.f32 %v6506_v37, %v5721_v62  ;;  %v3272_v36 = vsel %vm1915_vm6, %v3102_v52, 0.0  ;;  %v3104_v56 = vmul.f32 %v6153_v41, %v3039_v24 }
 0x441   : > { %v3376_v60 = vadd.f32 %v3312_v34, %v3136_v32  ;;  %v3317_v51 = vadd.f32 %v7269_v13, %v7268_v61  ;;  %v3315_v34 = vadd.f32 %v7271_v53, %v7270_v20  ;;  %v2812_v32 = vpop.f32.mrf.mxu2  ;;  %v2981_v23 = vpop.f32.mrf.mxu3  ;;  %v7276_v13 = vld [vmem:[#allocation18_spill] sm:$0xff]  ;;  %v2811_v20 = vadd.f32 %v6611_v55, %v5721_v62 }
 0x442   : > { %v3443_v46 = vadd.f32 %v6520_v19, %v3378_v38  ;;  %v2972_v52 = vadd.f32 %v6515_v22, %v2803_v48  ;;  %v3278_v22 = vsel %vm1915_vm6, %v3104_v56, 0.0  ;;  %v3281_v1 = vsel %vm1915_vm6, %v3105_v44, 0.0 }
 0x443   : > { %v3441_v10 = vadd.f32 %v6520_v19, %v3376_v60  ;;  %v3139_v16 = vpop.xlane.xlu1 %3138 }
 0x444   : > { %3508 = vst.msk [vmem:[%s6532_s18 + $0x48] sm:$0xff] %vm3498_vm7, %v3443_v46  ;;  %v3377_v28 = vadd.f32 %v3313_v40, %v3139_v16  ;;  %3276 = vadd.xlane.f32.xlu0 %v3275_v9  ;;  %v3316_v40 = vadd.f32 %v7273_v21, %v7272_v31  ;;  %v3044_v46 = vmax.f32 %v2975_v59, 0.0  ;;  %v3042_v16 = vmax.f32 %v2970_v63, 0.0 }
 0x445   : > { %3506 = vst.msk [vmem:[%s6532_s18 + $0x38] sm:$0xff] %vm3498_vm7, %v3441_v10  ;;  %3270 = vadd.xlane.f32.xlu2 %v3269_v39  ;;  %v2813_v10 = vadd.f32 %v2812_v32, %v5721_v62  ;;  %v2808_v9 = vadd.f32 %v6569_v30, %v5721_v62  ;;  %v7275_v39 = vld [vmem:[#allocation86_spill] sm:$0xff]  ;;  %v3043_v48 = vmax.f32 %v2972_v52, 0.0 }
 0x446   : > { %v3442_v42 = vadd.f32 %v6520_v19, %v3377_v28  ;;  %v7274_v28 = vld [vmem:[#allocation14_spill] sm:$0xff]  ;;  %v3107_v59 = vmul.f32 %v6153_v41, %v3042_v16 }
 0x447   : > { %v3151_v4 = vpop.xlane.xlu0 %3150  ;;  %v3318_v61 = vadd.f32 %v7275_v39, %v7274_v28  ;;  %v3108_v62 = vmul.f32 %v6153_v41, %v3043_v48 }
 0x448   : > { %3507 = vst.msk [vmem:[%s6532_s18 + $0x40] sm:$0xff] %vm3498_vm7, %v3442_v42  ;;  %v3381_v38 = vadd.f32 %v3317_v51, %v3151_v4  ;;  %3273 = vadd.xlane.f32.xlu1 %v3272_v36  ;;  %v3145_v37 = vpop.xlane.xlu2 %3144  ;;  %v7277_v51 = vld [vmem:[#allocation102_spill] sm:$0xff]  ;;  %v3109_v42 = vmul.f32 %v6153_v41, %v3044_v46  ;;  %v2977_v4 = vadd.f32 %v6587_v43, %v2808_v9  ;;  %v7280_v46 = vld [vmem:[#allocation21_spill] sm:$0xff] }
 0x449   : > { %v3379_v60 = vadd.f32 %v3315_v34, %v3145_v37  ;;  %v3320_v18 = vadd.f32 %v7277_v51, %v7276_v13  ;;  %v2982_v34 = vadd.f32 %v2981_v23, %v2813_v10  ;;  %v7279_v37 = vld [vmem:[#allocation103_spill] sm:$0xff]  ;;  %v7283_v10 = vld [vmem:[#allocation96_spill] sm:$0xff]  ;;  %v3290_v23 = vsel %vm1915_vm6, %v3108_v62, 0.0 }
 0x44a   : > { %v3446_v8 = vadd.f32 %v6520_v19, %v3381_v38  ;;  %v7278_v38 = vld [vmem:[#allocation16_spill] sm:$0xff]  ;;  %v3045_v44 = vmax.f32 %v2977_v4, 0.0  ;;  %v7284_v51 = vld [vmem:[#allocation19_spill] sm:$0xff] }
 0x44b   : > { %v3444_v5 = vadd.f32 %v6520_v19, %v3379_v60  ;;  %v3148_v17 = vpop.xlane.xlu1 %3147  ;;  %v3319_v32 = vadd.f32 %v7279_v37, %v7278_v38  ;;  %v2980_v60 = vadd.f32 %v6627_v2, %v2811_v20  ;;  %v3047_v31 = vmax.f32 %v2982_v34, 0.0  ;;  %v7286_v4 = vld [vmem:[#allocation24_spill] sm:$0xff]  ;;  %v7289_v38 = vld [vmem:[#allocation99_spill] sm:$0xff] }
 0x44c   : > { %3511 = vst.msk [vmem:[%s6532_s18 + $0x60] sm:$0xff] %vm3498_vm7, %v3446_v8  ;;  %v3380_v24 = vadd.f32 %v3316_v40, %v3148_v17  ;;  %3285 = vadd.xlane.f32.xlu0 %v3284_v25  ;;  %v3293_v40 = vsel %vm1915_vm6, %v3109_v42, 0.0  ;;  %v3287_v8 = vsel %vm1915_vm6, %v3107_v59, 0.0  ;;  %v7282_v25 = vld [vmem:[#allocation17_spill] sm:$0xff]  ;;  %v3110_v28 = vmul.f32 %v6153_v41, %v3045_v44 }
 0x44d   : > { %3509 = vst.msk [vmem:[%s6532_s18 + $0x50] sm:$0xff] %vm3498_vm7, %v3444_v5  ;;  %3279 = vadd.xlane.f32.xlu2 %v3278_v22  ;;  %v7281_v5 = vld [vmem:[#allocation107_spill] sm:$0xff]  ;;  %v3321_v16 = vadd.f32 %v7283_v10, %v7282_v25  ;;  %v3046_v9 = vmax.f32 %v2980_v60, 0.0 }
 0x44e   : > { %v3445_v30 = vadd.f32 %v6520_v19, %v3380_v24  ;;  %v3323_v2 = vadd.f32 %v7281_v5, %v7280_v46  ;;  %v3112_v24 = vmul.f32 %v6153_v41, %v3047_v31  ;;  %v3296_v59 = vsel %vm1915_vm6, %v3110_v28, 0.0  ;;  %v7292_v5 = vld [vmem:[#allocation27_spill] sm:$0xff]  ;;  %v7295_v28 = vld [vmem:[#allocation25_spill] sm:$0xff] }
 0x44f   : > { %v3160_v53 = vpop.xlane.xlu0 %3159  ;;  %v3111_v42 = vmul.f32 %v6153_v41, %v3046_v9  ;;  %v7293_v25 = vld [vmem:[#allocation23_spill] sm:$0xff] }
 0x450   : > { %3510 = vst.msk [vmem:[%s6532_s18 + $0x58] sm:$0xff] %vm3498_vm7, %v3445_v30  ;;  %v3384_v36 = vadd.f32 %v3320_v18, %v3160_v53  ;;  %3282 = vadd.xlane.f32.xlu1 %v3281_v1  ;;  %v3154_v56 = vpop.xlane.xlu2 %3153  ;;  %v7285_v18 = vld [vmem:[#allocation106_spill] sm:$0xff]  ;;  %v3302_v34 = vsel %vm1915_vm6, %v3112_v24, 0.0  ;;  %v7294_v10 = vld [vmem:[#allocation111_spill] sm:$0xff] }
 0x451   : > { %v3382_v63 = vadd.f32 %v3318_v61, %v3154_v56  ;;  %v3322_v48 = vadd.f32 %v7285_v18, %v7284_v51  ;;  %v3299_v62 = vsel %vm1915_vm6, %v3111_v42, 0.0 }
 0x452   : > { %v3449_v55 = vadd.f32 %v6520_v19, %v3384_v36  ;;  %v7287_v36 = vld [vmem:[#allocation110_spill] sm:$0xff] }
 0x453   : > { %v3447_v21 = vadd.f32 %v6520_v19, %v3382_v63  ;;  %v3157_v43 = vpop.xlane.xlu1 %3156  ;;  %v3326_v56 = vadd.f32 %v7287_v36, %v7286_v4  ;;  %v7288_v63 = vld [vmem:[#allocation20_spill] sm:$0xff] }
 0x454   : > { %3514 = vst.msk [vmem:[%s6532_s18 + $0x78] sm:$0xff] %vm3498_vm7, %v3449_v55  ;;  %v3383_v52 = vadd.f32 %v3319_v32, %v3157_v43  ;;  %3294 = vadd.xlane.f32.xlu0 %v3293_v40  ;;  %v3324_v37 = vadd.f32 %v7289_v38, %v7288_v63  ;;  %v7291_v43 = vld [vmem:[#allocation101_spill] sm:$0xff] }
 0x455   : > { %3512 = vst.msk [vmem:[%s6532_s18 + $0x68] sm:$0xff] %vm3498_vm7, %v3447_v21  ;;  %3288 = vadd.xlane.f32.xlu2 %v3287_v8  ;;  %v7290_v21 = vld [vmem:[#allocation22_spill] sm:$0xff] }
 0x456   : > { %v3448_v17 = vadd.f32 %v6520_v19, %v3383_v52  ;;  %v3325_v40 = vadd.f32 %v7291_v43, %v7290_v21  ;;  %v7304_v21 = vld [vmem:[#allocation115_spill] sm:$0xff] }
 0x457   : > { %v3169_v22 = vpop.xlane.xlu0 %3168 }
 0x458   : > { %3513 = vst.msk [vmem:[%s6532_s18 + $0x70] sm:$0xff] %vm3498_vm7, %v3448_v17  ;;  %v3387_v39 = vadd.f32 %v3323_v2, %v3169_v22  ;;  %3291 = vadd.xlane.f32.xlu1 %v3290_v23  ;;  %v3163_v61 = vpop.xlane.xlu2 %3162  ;;  %v3329_v2 = vadd.f32 %v6241_v15, %v7292_v5 }
 0x459   : > { %v3385_v13 = vadd.f32 %v3321_v16, %v3163_v61  ;;  %v3327_v16 = vadd.f32 %v7294_v10, %v7293_v25  ;;  %v7306_v10 = vld [vmem:[#allocation36_spill] sm:$0xff] }
 0x45a   : > { %v3452_v30 = vadd.f32 %v6520_v19, %v3387_v39  ;;  %v7296_v39 = vld [vmem:[#allocation113_spill] sm:$0xff] }
 0x45b   : > { %v3450_v20 = vadd.f32 %v6520_v19, %v3385_v13  ;;  %v3166_v53 = vpop.xlane.xlu1 %3165  ;;  %v3328_v61 = vadd.f32 %v7296_v39, %v7295_v28 }
 0x45c   : > { %3517 = vst.msk [vmem:[%s6532_s18 + $0x90] sm:$0xff] %vm3498_vm7, %v3452_v30  ;;  %v3386_v1 = vadd.f32 %v3322_v48, %v3166_v53  ;;  %3303 = vadd.xlane.f32.xlu0 %v3302_v34  ;;  %v7297_v48 = vld [vmem:[#allocation30_spill] sm:$0xff]  ;;  %v7299_v53 = vld [vmem:[#allocation105_spill] sm:$0xff] }
 0x45d   : > { %3515 = vst.msk [vmem:[%s6532_s18 + $0x80] sm:$0xff] %vm3498_vm7, %v3450_v20  ;;  %3297 = vadd.xlane.f32.xlu2 %v3296_v59  ;;  %v3332_v30 = vadd.f32 %v6268_v26, %v7297_v48  ;;  %v7298_v20 = vld [vmem:[#allocation26_spill] sm:$0xff] }
 0x45e   : > { %v3451_v41 = vadd.f32 %v6520_v19, %v3386_v1  ;;  %v3330_v34 = vadd.f32 %v7299_v53, %v7298_v20  ;;  %v7311_v53 = vld [vmem:[#allocation35_spill] sm:$0xff] }
 0x45f   : > { %v3178_v32 = vpop.xlane.xlu0 %3177 }
 0x460   : > { %3516 = vst.msk [vmem:[%s6532_s18 + $0x88] sm:$0xff] %vm3498_vm7, %v3451_v41  ;;  %v3390_v55 = vadd.f32 %v3326_v56, %v3178_v32  ;;  %3300 = vadd.xlane.f32.xlu1 %v3299_v62  ;;  %v3172_v60 = vpop.xlane.xlu2 %3171  ;;  %v7300_v56 = vld [vmem:[#allocation28_spill] sm:$0xff]  ;;  %v7301_v41 = vld [vmem:[#allocation109_spill] sm:$0xff] }
 0x461   : > { %v3388_v31 = vadd.f32 %v3324_v37, %v3172_v60  ;;  %v3331_v63 = vadd.f32 %v7301_v41, %v7300_v56  ;;  %v7302_v62 = vld [vmem:[#allocation33_spill] sm:$0xff] }
 0x462   : > { %v3455_v44 = vadd.f32 %v6520_v19, %v3390_v55  ;;  %v3335_v55 = vadd.f32 %v6297_v27, %v7302_v62 }
 0x463   : > { %v3453_v52 = vadd.f32 %v6520_v19, %v3388_v31  ;;  %v3175_v8 = vpop.xlane.xlu1 %3174  ;;  %v7303_v31 = vld [vmem:[#allocation29_spill] sm:$0xff] }
 0x464   : > { %3520 = vst.msk [vmem:[%s6532_s18 + $0xa8] sm:$0xff] %vm3498_vm7, %v3455_v44  ;;  %v3389_v46 = vadd.f32 %v3325_v40, %v3175_v8  ;;  %v3333_v43 = vadd.f32 %v7304_v21, %v7303_v31  ;;  %v7315_v21 = vld [vmem:[#allocation40_spill] sm:$0xff] }
 0x465   : > { %3518 = vst.msk [vmem:[%s6532_s18 + $0x98] sm:$0xff] %vm3498_vm7, %v3453_v52 }
 0x466   : > { %v3454_v17 = vadd.f32 %v6520_v19, %v3389_v46  ;;  %v7305_v46 = vld [vmem:[#allocation31_spill] sm:$0xff] }
 0x467   : > { %v3187_v9 = vpop.xlane.xlu0 %3186  ;;  %v3334_v5 = vadd.f32 %v6286_v33, %v7305_v46 }
 0x468   : > { %3519 = vst.msk [vmem:[%s6532_s18 + $0xa0] sm:$0xff] %vm3498_vm7, %v3454_v17  ;;  %v3393_v24 = vadd.f32 %v3329_v2, %v3187_v9  ;;  %v3181_v22 = vpop.xlane.xlu2 %3180 }
 0x469   : > { %v3391_v23 = vadd.f32 %v3327_v16, %v3181_v22  ;;  %v3338_v16 = vadd.f32 %v6322_v6, %v7306_v10  ;;  %v7308_v22 = vld [vmem:[#allocation119_spill] sm:$0xff] }
 0x46a   : > { %v3458_v13 = vadd.f32 %v6520_v19, %v3393_v24  ;;  %v7307_v24 = vld [vmem:[#allocation32_spill] sm:$0xff]  ;;  %v7318_v10 = vld [vmem:[#allocation43_spill] sm:$0xff] }
 0x46b   : > { %v3456_v51 = vadd.f32 %v6520_v19, %v3391_v23  ;;  %v3184_v15 = vpop.xlane.xlu1 %3183  ;;  %v3336_v33 = vadd.f32 %v7308_v22, %v7307_v24 }
 0x46c   : > { %3523 = vst.msk [vmem:[%s6532_s18 + $0xc0] sm:$0xff] %vm3498_vm7, %v3458_v13  ;;  %v3392_v18 = vadd.f32 %v3328_v61, %v3184_v15  ;;  %v7309_v13 = vld [vmem:[#allocation34_spill] sm:$0xff] }
 0x46d   : > { %3521 = vst.msk [vmem:[%s6532_s18 + $0xb0] sm:$0xff] %vm3498_vm7, %v3456_v51  ;;  %v3337_v51 = vadd.f32 %v6312_v12, %v7309_v13  ;;  %v3339_v12 = vadd.f32 %v6307_v11, %v7311_v53  ;;  %v7313_v11 = vld [vmem:[#allocation41_spill] sm:$0xff]  ;;  %v7323_v53 = vld [vmem:[#allocation48_spill] sm:$0xff] }
 0x46e   : > { %v3457_v42 = vadd.f32 %v6520_v19, %v3392_v18 }
 0x46f   : > { %v3196_v1 = vpop.xlane.xlu0 %3195 }
 0x470   : > { %3522 = vst.msk [vmem:[%s6532_s18 + $0xb8] sm:$0xff] %vm3498_vm7, %v3457_v42  ;;  %v3396_v59 = vadd.f32 %v3332_v30, %v3196_v1  ;;  %v3190_v4 = vpop.xlane.xlu2 %3189  ;;  %v7310_v30 = vld [vmem:[#allocation39_spill] sm:$0xff] }
 0x471   : > { %v3394_v36 = vadd.f32 %v3330_v34, %v3190_v4  ;;  %v3341_v42 = vadd.f32 %v6348_v47, %v7310_v30 }
 0x472   : > { %v3461_v38 = vadd.f32 %v6520_v19, %v3396_v59 }
 0x473   : > { %v3459_v37 = vadd.f32 %v6520_v19, %v3394_v36  ;;  %v3193_v26 = vpop.xlane.xlu1 %3192  ;;  %v7312_v36 = vld [vmem:[#allocation37_spill] sm:$0xff] }
 0x474   : > { %3526 = vst.msk [vmem:[%s6532_s18 + $0xd8] sm:$0xff] %vm3498_vm7, %v3461_v38  ;;  %v3395_v32 = vadd.f32 %v3331_v63, %v3193_v26  ;;  %v3340_v56 = vadd.f32 %v6340_v35, %v7312_v36  ;;  %v7325_v36 = vld [vmem:[#allocation49_spill] sm:$0xff] }
 0x475   : > { %3524 = vst.msk [vmem:[%s6532_s18 + $0xc8] sm:$0xff] %vm3498_vm7, %v3459_v37  ;;  %v3344_v37 = vadd.f32 %v6373_v50, %v7313_v11  ;;  %v7327_v11 = vld [vmem:[#allocation116_spill] sm:$0xff] }
 0x476   : > { %v3460_v60 = vadd.f32 %v6520_v19, %v3395_v32  ;;  %v7314_v32 = vld [vmem:[#allocation38_spill] sm:$0xff] }
 0x477   : > { %v3205_v40 = vpop.xlane.xlu0 %3204  ;;  %v3342_v35 = vadd.f32 %v6335_v45, %v7314_v32  ;;  %v7316_v45 = vld [vmem:[#allocation44_spill] sm:$0xff] }
 0x478   : > { %3525 = vst.msk [vmem:[%s6532_s18 + $0xd0] sm:$0xff] %vm3498_vm7, %v3460_v60  ;;  %v3399_v44 = vadd.f32 %v3335_v55, %v3205_v40  ;;  %v3199_v52 = vpop.xlane.xlu2 %3198  ;;  %v7328_v32 = vld [vmem:[#allocation52_spill] sm:$0xff] }
 0x479   : > { %v3397_v8 = vadd.f32 %v3333_v43, %v3199_v52  ;;  %v3343_v43 = vadd.f32 %v6365_v0, %v7315_v21  ;;  %v7330_v21 = vld [vmem:[#allocation51_spill] sm:$0xff] }
 0x47a   : > { %v3464_v2 = vadd.f32 %v6520_v19, %v3399_v44 }
 0x47b   : > { %v3462_v17 = vadd.f32 %v6520_v19, %v3397_v8  ;;  %v3202_v27 = vpop.xlane.xlu1 %3201  ;;  %v3347_v8 = vadd.f32 %v6398_v57, %v7316_v45 }
 0x47c   : > { %3529 = vst.msk [vmem:[%s6532_s18 + $0xf0] sm:$0xff] %vm3498_vm7, %v3464_v2  ;;  %v3398_v25 = vadd.f32 %v3334_v5, %v3202_v27  ;;  %v7317_v5 = vld [vmem:[#allocation42_spill] sm:$0xff] }
 0x47d   : > { %3527 = vst.msk [vmem:[%s6532_s18 + $0xe0] sm:$0xff] %vm3498_vm7, %v3462_v17  ;;  %v3345_v0 = vadd.f32 %v6360_v49, %v7317_v5  ;;  %v7319_v49 = vld [vmem:[#allocation47_spill] sm:$0xff] }
 0x47e   : > { %v3463_v9 = vadd.f32 %v6520_v19, %v3398_v25 }
 0x47f   : > { %v3214_v23 = vpop.xlane.xlu0 %3213 }
 0x480   : > { %3528 = vst.msk [vmem:[%s6532_s18 + $0xe8] sm:$0xff] %vm3498_vm7, %v3463_v9  ;;  %v3402_v28 = vadd.f32 %v3338_v16, %v3214_v23  ;;  %v3208_v39 = vpop.xlane.xlu2 %3207  ;;  %v3346_v16 = vadd.f32 %v6390_v29, %v7318_v10 }
 0x481   : > { %v3400_v61 = vadd.f32 %v3336_v33, %v3208_v39  ;;  %v3350_v33 = vadd.f32 %v6419_v58, %v7319_v49 }
 0x482   : > { %v3467_v15 = vadd.f32 %v6520_v19, %v3402_v28  ;;  %v7320_v28 = vld [vmem:[#allocation45_spill] sm:$0xff] }
 0x483   : > { %v3465_v18 = vadd.f32 %v6520_v19, %v3400_v61  ;;  %v3211_v6 = vpop.xlane.xlu1 %3210  ;;  %v3348_v29 = vadd.f32 %v6385_v54, %v7320_v28  ;;  %v7322_v54 = vld [vmem:[#allocation50_spill] sm:$0xff] }
 0x484   : > { %3532 = vst.msk [vmem:[%s6532_s18 + $0x108] sm:$0xff] %vm3498_vm7, %v3467_v15  ;;  %v3401_v48 = vadd.f32 %v3337_v51, %v3211_v6  ;;  %v7321_v15 = vld [vmem:[#allocation46_spill] sm:$0xff] }
 0x485   : > { %3530 = vst.msk [vmem:[%s6532_s18 + $0xf8] sm:$0xff] %vm3498_vm7, %v3465_v18  ;;  %v3349_v18 = vadd.f32 %v6411_v3, %v7321_v15  ;;  %v7341_v15 = vld [vmem:[#allocation126_spill] sm:$0xff] }
 0x486   : > { %v3466_v20 = vadd.f32 %v6520_v19, %v3401_v48 }
 0x487   : > { %v3223_v34 = vpop.xlane.xlu0 %3222 }
 0x488   : > { %3531 = vst.msk [vmem:[%s6532_s18 + $0x100] sm:$0xff] %vm3498_vm7, %v3466_v20  ;;  %v3405_v1 = vadd.f32 %v3341_v42, %v3223_v34  ;;  %v3217_v59 = vpop.xlane.xlu2 %3216  ;;  %v3353_v42 = vadd.f32 %v6439_v7, %v7322_v54  ;;  %v7342_v54 = vld [vmem:[#allocation57_spill] sm:$0xff] }
 0x489   : > { %v3403_v4 = vadd.f32 %v3339_v12, %v3217_v59  ;;  %v7324_v12 = vld [vmem:[#allocation117_spill] sm:$0xff] }
 0x48a   : > { %v3470_v41 = vadd.f32 %v6520_v19, %v3405_v1  ;;  %v3351_v3 = vadd.f32 %v7324_v12, %v7323_v53 }
 0x48b   : > { %v3468_v63 = vadd.f32 %v6520_v19, %v3403_v4  ;;  %v3220_v47 = vpop.xlane.xlu1 %3219 }
 0x48c   : > { %3535 = vst.msk [vmem:[%s6532_s18 + $0x120] sm:$0xff] %vm3498_vm7, %v3470_v41  ;;  %v3404_v38 = vadd.f32 %v3340_v56, %v3220_v47  ;;  %v3352_v56 = vadd.f32 %v6434_v14, %v7325_v36 }
 0x48d   : > { %3533 = vst.msk [vmem:[%s6532_s18 + $0x110] sm:$0xff] %vm3498_vm7, %v3468_v63 }
 0x48e   : > { %v3469_v26 = vadd.f32 %v6520_v19, %v3404_v38  ;;  %v7326_v38 = vld [vmem:[#allocation53_spill] sm:$0xff] }
 0x48f   : > { %v3232_v62 = vpop.xlane.xlu0 %3231 }
 0x490   : > { %3534 = vst.msk [vmem:[%s6532_s18 + $0x118] sm:$0xff] %vm3498_vm7, %v3469_v26  ;;  %v3408_v55 = vadd.f32 %v3344_v37, %v3232_v62  ;;  %v3226_v60 = vpop.xlane.xlu2 %3225  ;;  %v3356_v37 = vadd.f32 %v7327_v11, %v7326_v38 }
 0x491   : > { %v3406_v31 = vadd.f32 %v3342_v35, %v3226_v60  ;;  %v7329_v35 = vld [vmem:[#allocation112_spill] sm:$0xff] }
 0x492   : > { %v3473_v40 = vadd.f32 %v6520_v19, %v3408_v55  ;;  %v3354_v14 = vadd.f32 %v7329_v35, %v7328_v32 }
 0x493   : > { %v3471_v44 = vadd.f32 %v6520_v19, %v3406_v31  ;;  %v3229_v50 = vpop.xlane.xlu1 %3228 }
 0x494   : > { %3538 = vst.msk [vmem:[%s6532_s18 + $0x138] sm:$0xff] %vm3498_vm7, %v3473_v40  ;;  %v3407_v52 = vadd.f32 %v3343_v43, %v3229_v50  ;;  %v7331_v43 = vld [vmem:[#allocation121_spill] sm:$0xff] }
 0x495   : > { %3536 = vst.msk [vmem:[%s6532_s18 + $0x128] sm:$0xff] %vm3498_vm7, %v3471_v44  ;;  %v3355_v40 = vadd.f32 %v7331_v43, %v7330_v21 }
 0x496   : > { %v3472_v46 = vadd.f32 %v6520_v19, %v3407_v52 }
 0x497   : > { %v3241_v2 = vpop.xlane.xlu0 %3240 }
 0x498   : > { %3537 = vst.msk [vmem:[%s6532_s18 + $0x130] sm:$0xff] %vm3498_vm7, %v3472_v46  ;;  %v3411_v17 = vadd.f32 %v3347_v8, %v3241_v2  ;;  %v3235_v27 = vpop.xlane.xlu2 %3234  ;;  %v7332_v8 = vld [vmem:[#allocation56_spill] sm:$0xff]  ;;  %v7334_v2 = vld [vmem:[#allocation55_spill] sm:$0xff] }
 0x499   : > { %v3409_v25 = vadd.f32 %v3345_v0, %v3235_v27  ;;  %v7333_v46 = vld [vmem:[#allocation120_spill] sm:$0xff] }
 0x49a   : > { %v3476_v9 = vadd.f32 %v6520_v19, %v3411_v17  ;;  %v3359_v5 = vadd.f32 %v7333_v46, %v7332_v8  ;;  %v7335_v17 = vld [vmem:[#allocation122_spill] sm:$0xff] }
 0x49b   : > { %v3474_v24 = vadd.f32 %v6520_v19, %v3409_v25  ;;  %v3238_v57 = vpop.xlane.xlu1 %3237  ;;  %v3357_v27 = vadd.f32 %v7335_v17, %v7334_v2 }
 0x49c   : > { %3541 = vst.msk [vmem:[%s6532_s18 + $0x150] sm:$0xff] %vm3498_vm7, %v3476_v9  ;;  %v3410_v22 = vadd.f32 %v3346_v16, %v3238_v57  ;;  %v7337_v57 = vld [vmem:[#allocation124_spill] sm:$0xff] }
 0x49d   : > { %3539 = vst.msk [vmem:[%s6532_s18 + $0x140] sm:$0xff] %vm3498_vm7, %v3474_v24  ;;  %v7336_v24 = vld [vmem:[#allocation54_spill] sm:$0xff] }
 0x49e   : > { %v3475_v23 = vadd.f32 %v6520_v19, %v3410_v22  ;;  %v3358_v22 = vadd.f32 %v7337_v57, %v7336_v24 }
 0x49f   : > { %v3250_v39 = vpop.xlane.xlu0 %3249 }
 0x4a0   : > { %3540 = vst.msk [vmem:[%s6532_s18 + $0x148] sm:$0xff] %vm3498_vm7, %v3475_v23  ;;  %v3414_v61 = vadd.f32 %v3350_v33, %v3250_v39  ;;  %v3244_v13 = vpop.xlane.xlu2 %3243  ;;  %v7339_v39 = vld [vmem:[#allocation133_spill] sm:$0xff] }
 0x4a1   : > { %v3412_v51 = vadd.f32 %v3348_v29, %v3244_v13  ;;  %v7338_v29 = vld [vmem:[#allocation60_spill] sm:$0xff] }
 0x4a2   : > { %v3479_v6 = vadd.f32 %v6520_v19, %v3414_v61  ;;  %v3362_v61 = vadd.f32 %v7339_v39, %v7338_v29 }
 0x4a3   : > { %v3477_v48 = vadd.f32 %v6520_v19, %v3412_v51  ;;  %v3247_v58 = vpop.xlane.xlu1 %3246  ;;  %v7340_v51 = vld [vmem:[#allocation58_spill] sm:$0xff] }
 0x4a4   : > { %3544 = vst.msk [vmem:[%s6532_s18 + $0x168] sm:$0xff] %vm3498_vm7, %v3479_v6  ;;  %v3413_v30 = vadd.f32 %v3349_v18, %v3247_v58  ;;  %v3360_v18 = vadd.f32 %v7341_v15, %v7340_v51 }
 0x4a5   : > { %3542 = vst.msk [vmem:[%s6532_s18 + $0x158] sm:$0xff] %vm3498_vm7, %v3477_v48 }
 0x4a6   : > { %v3478_v20 = vadd.f32 %v6520_v19, %v3413_v30 }
 0x4a7   : > { %v3259_v34 = vpop.xlane.xlu0 %3258 }
 0x4a8   : > { %3543 = vst.msk [vmem:[%s6532_s18 + $0x160] sm:$0xff] %vm3498_vm7, %v3478_v20  ;;  %v3417_v1 = vadd.f32 %v3353_v42, %v3259_v34  ;;  %v3253_v59 = vpop.xlane.xlu2 %3252  ;;  %v7343_v42 = vld [vmem:[#allocation130_spill] sm:$0xff] }
 0x4a9   : > { %v3415_v4 = vadd.f32 %v3351_v3, %v3253_v59  ;;  %v3361_v20 = vadd.f32 %v7343_v42, %v7342_v54  ;;  %v7345_v59 = vld [vmem:[#allocation129_spill] sm:$0xff] }
 0x4aa   : > { %v3482_v41 = vadd.f32 %v6520_v19, %v3417_v1  ;;  %v7344_v1 = vld [vmem:[#allocation63_spill] sm:$0xff] }
 0x4ab   : > { %v3480_v63 = vadd.f32 %v6520_v19, %v3415_v4  ;;  %v3256_v7 = vpop.xlane.xlu1 %3255  ;;  %v3365_v4 = vadd.f32 %v7345_v59, %v7344_v1 }
 0x4ac   : > { %3547 = vst.msk [vmem:[%s6532_s18 + $0x180] sm:$0xff] %vm3498_vm7, %v3482_v41  ;;  %v3416_v47 = vadd.f32 %v3352_v56, %v3256_v7  ;;  %v7346_v56 = vld [vmem:[#allocation61_spill] sm:$0xff]  ;;  %v7347_v41 = vld [vmem:[#allocation128_spill] sm:$0xff] }
 0x4ad   : > { %3545 = vst.msk [vmem:[%s6532_s18 + $0x170] sm:$0xff] %vm3498_vm7, %v3480_v63  ;;  %v3363_v63 = vadd.f32 %v7347_v41, %v7346_v56 }
 0x4ae   : > { %v3481_v26 = vadd.f32 %v6520_v19, %v3416_v47 }
 0x4af   : > { %v3268_v62 = vpop.xlane.xlu0 %3267 }
 0x4b0   : > { %3546 = vst.msk [vmem:[%s6532_s18 + $0x178] sm:$0xff] %vm3498_vm7, %v3481_v26  ;;  %v3420_v55 = vadd.f32 %v3356_v37, %v3268_v62  ;;  %v3262_v60 = vpop.xlane.xlu2 %3261  ;;  %v7348_v37 = vld [vmem:[#allocation59_spill] sm:$0xff] }
 0x4b1   : > { %v3418_v31 = vadd.f32 %v3354_v14, %v3262_v60  ;;  %v7349_v26 = vld [vmem:[#allocation131_spill] sm:$0xff]  ;;  %v7350_v60 = vld [vmem:[#allocation66_spill] sm:$0xff] }
 0x4b2   : > { %v3485_v44 = vadd.f32 %v6520_v19, %v3420_v55  ;;  %v3364_v32 = vadd.f32 %v7349_v26, %v7348_v37 }
 0x4b3   : > { %v3483_v50 = vadd.f32 %v6520_v19, %v3418_v31  ;;  %v3265_v52 = vpop.xlane.xlu1 %3264  ;;  %v7351_v31 = vld [vmem:[#allocation134_spill] sm:$0xff] }
 0x4b4   : > { %3550 = vst.msk [vmem:[%s6532_s18 + $0x198] sm:$0xff] %vm3498_vm7, %v3485_v44  ;;  %v3419_v45 = vadd.f32 %v3355_v40, %v3265_v52  ;;  %v3368_v21 = vadd.f32 %v7351_v31, %v7350_v60  ;;  %v7352_v40 = vld [vmem:[#allocation65_spill] sm:$0xff] }
 0x4b5   : > { %3548 = vst.msk [vmem:[%s6532_s18 + $0x188] sm:$0xff] %vm3498_vm7, %v3483_v50  ;;  %v7353_v44 = vld [vmem:[#allocation125_spill] sm:$0xff] }
 0x4b6   : > { %v3484_v0 = vadd.f32 %v6520_v19, %v3419_v45  ;;  %v3366_v50 = vadd.f32 %v7353_v44, %v7352_v40 }
 0x4b7   : > { %v3277_v25 = vpop.xlane.xlu0 %3276 }
 0x4b8   : > { %3549 = vst.msk [vmem:[%s6532_s18 + $0x190] sm:$0xff] %vm3498_vm7, %v3484_v0  ;;  %v3423_v10 = vadd.f32 %v3359_v5, %v3277_v25  ;;  %v3271_v16 = vpop.xlane.xlu2 %3270  ;;  %v7354_v5 = vld [vmem:[#allocation62_spill] sm:$0xff]  ;;  %v7355_v0 = vld [vmem:[#allocation83_spill] sm:$0xff] }
 0x4b9   : > { %v3421_v9 = vadd.f32 %v3357_v27, %v3271_v16  ;;  %v3367_v2 = vadd.f32 %v7355_v0, %v7354_v5 }
 0x4ba   : > { %v3488_v49 = vadd.f32 %v6520_v19, %v3423_v10 }
 0x4bb   : > { %v3486_v33 = vadd.f32 %v6520_v19, %v3421_v9  ;;  %v3274_v23 = vpop.xlane.xlu1 %3273 }
 0x4bc   : > { %3553 = vst.msk [vmem:[%s6532_s18 + $0x1b0] sm:$0xff] %vm3498_vm7, %v3488_v49  ;;  %v3422_v28 = vadd.f32 %v3358_v22, %v3274_v23 }
 0x4bd   : > { %3551 = vst.msk [vmem:[%s6532_s18 + $0x1a0] sm:$0xff] %vm3498_vm7, %v3486_v33 }
 0x4be   : > { %v3487_v13 = vadd.f32 %v6520_v19, %v3422_v28 }
 0x4bf   : > { %v3286_v6 = vpop.xlane.xlu0 %3285 }
 0x4c0   : > { %3552 = vst.msk [vmem:[%s6532_s18 + $0x1a8] sm:$0xff] %vm3498_vm7, %v3487_v13  ;;  %v3426_v48 = vadd.f32 %v3362_v61, %v3286_v6  ;;  %v3280_v58 = vpop.xlane.xlu2 %3279 }
 0x4c1   : > { %v3424_v30 = vadd.f32 %v3360_v18, %v3280_v58 }
 0x4c2   : > { %v3491_v53 = vadd.f32 %v6520_v19, %v3426_v48 }
 0x4c3   : > { %v3489_v12 = vadd.f32 %v6520_v19, %v3424_v30  ;;  %v3283_v3 = vpop.xlane.xlu1 %3282 }
 0x4c4   : > { %3556 = vst.msk [vmem:[%s6532_s18 + $0x1c8] sm:$0xff] %vm3498_vm7, %v3491_v53  ;;  %v3425_v34 = vadd.f32 %v3361_v20, %v3283_v3 }
 0x4c5   : > { %3554 = vst.msk [vmem:[%s6532_s18 + $0x1b8] sm:$0xff] %vm3498_vm7, %v3489_v12 }
 0x4c6   : > { %v3490_v36 = vadd.f32 %v6520_v19, %v3425_v34 }
 0x4c7   : > { %v3295_v7 = vpop.xlane.xlu0 %3294 }
 0x4c8   : > { %3555 = vst.msk [vmem:[%s6532_s18 + $0x1c0] sm:$0xff] %vm3498_vm7, %v3490_v36  ;;  %v3429_v47 = vadd.f32 %v3365_v4, %v3295_v7  ;;  %v3289_v38 = vpop.xlane.xlu2 %3288 }
 0x4c9   : > { %v3427_v11 = vadd.f32 %v3363_v63, %v3289_v38 }
 0x4ca   : > { %v3494_v35 = vadd.f32 %v6520_v19, %v3429_v47 }
 0x4cb   : > { %v3492_v14 = vadd.f32 %v6520_v19, %v3427_v11  ;;  %v3292_v62 = vpop.xlane.xlu1 %3291 }
 0x4cc   : > { %3559 = vst.msk [vmem:[%s6532_s18 + $0x1e0] sm:$0xff] %vm3498_vm7, %v3494_v35  ;;  %v3428_v55 = vadd.f32 %v3364_v32, %v3292_v62 }
 0x4cd   : > { %3557 = vst.msk [vmem:[%s6532_s18 + $0x1d0] sm:$0xff] %vm3498_vm7, %v3492_v14 }
 0x4ce   : > { %v3493_v43 = vadd.f32 %v6520_v19, %v3428_v55 }
 0x4cf   : > { %v3304_v52 = vpop.xlane.xlu0 %3303 }
 0x4d0   : > { %3558 = vst.msk [vmem:[%s6532_s18 + $0x1d8] sm:$0xff] %vm3498_vm7, %v3493_v43  ;;  %v3432_v45 = vadd.f32 %v3368_v21, %v3304_v52  ;;  %v3298_v8 = vpop.xlane.xlu2 %3297 }
 0x4d1   : > { %v3430_v46 = vadd.f32 %v3366_v50, %v3298_v8 }
 0x4d2   : > { %v3497_v17 = vadd.f32 %v6520_v19, %v3432_v45 }
 0x4d3   : > { %v3495_v27 = vadd.f32 %v6520_v19, %v3430_v46  ;;  %v3301_v25 = vpop.xlane.xlu1 %3300 }
 0x4d4   : > { %3562 = vst.msk [vmem:[%s6532_s18 + $0x1f8] sm:$0xff] %vm3498_vm7, %v3497_v17  ;;  %v3431_v10 = vadd.f32 %v3367_v2, %v3301_v25 }
 0x4d5   : > { %3560 = vst.msk [vmem:[%s6532_s18 + $0x1e8] sm:$0xff] %vm3498_vm7, %v3495_v27 }
 0x4d6   : > { %v3496_v16 = vadd.f32 %v6520_v19, %v3431_v10 }
 0x4d8   : > { %3561 = vst.msk [vmem:[%s6532_s18 + $0x1f0] sm:$0xff] %vm3498_vm7, %v3496_v16 }
 0x4d9 PF: > { %s16_s21 = sadd.s32 1, %s4097_s21  }
 0x4da   : > { %p13_p4 = scmp.ge.s32.totalorder %s16_s21, 4  }
 0x4dc   :  { %15 = sbr.rel (!%p13_p4) target bundleno = 1 (0x1), region = 80 }

</bundles_post_ra>
